<compile_context>
chip_gen: v7x
topology: tpu7x:2x2x1
jax: 0.10.0
libtpu: 0.0.40
codegen_flags: <defaults>
</compile_context>

<pallas_src>
import jax
import jax.numpy as jnp
from jax.experimental import pallas as pl
from jax.experimental.pallas import tpu as pltpu

NUM_CLASSES = 101
CLASS_PAD = 128                 # one-hot / folded-embedding rows padded to a lane width
EMB_DIM = 10
CURVE_DIM = 111                 # 121 total input = 111 curve features + 10 embedding dims
CURVE_PAD = 128                 # curve features zero-padded to a lane width
IN_DIM = CURVE_DIM + EMB_DIM    # 121  (== "20 + 101" in the PyTorch source)
HID = 512
OUT_PAD = 128                   # true output dim is 1; padded to a full lane width


def _leaky_relu_bf16(x_f32, slope=0.2):
    """Cast the f32 (dot + bias) result to bf16 once, LeakyReLU in bf16."""
    x = x_f32.astype(jnp.bfloat16)
    return jnp.maximum(x, x * jnp.bfloat16(slope))


def disc_kernel(curves_ref, labels_ref,
                w1c_ref, w1e_ref, b1_ref,
                w2_ref, b2_ref, w3_ref, b3_ref,
                w4_ref, b4_ref, out_ref):
    """One batch tile: fused (folded) embedding + 4-layer MLP, operands in VMEM."""
    tb = curves_ref.shape[0]

    # Lane-padded one-hot labels (TB, 128) in bf16 for the folded-embedding matmul.
    onehot = (labels_ref[...] == jax.lax.broadcasted_iota(
        jnp.int32, (tb, CLASS_PAD), 1)).astype(jnp.bfloat16)

    # Layer 1: cat([curves, emb(labels)]) @ W1
    #        == curves @ W1[:111] + onehot @ (emb_table @ W1[111:121])
    h = (jnp.dot(curves_ref[...], w1c_ref[...],
                 preferred_element_type=jnp.float32)
         + jnp.dot(onehot, w1e_ref[...],
                   preferred_element_type=jnp.float32)
         + b1_ref[...])
    h = _leaky_relu_bf16(h)

    # Layer 2 (nn.Dropout(0.4) is eval-mode identity)
    # TODO(synk): training-mode stochastic dropout mask not implemented.
    h = _leaky_relu_bf16(
        jnp.dot(h, w2_ref[...], preferred_element_type=jnp.float32) + b2_ref[...])

    # Layer 3 (second Dropout is also eval-mode identity)
    h = _leaky_relu_bf16(
        jnp.dot(h, w3_ref[...], preferred_element_type=jnp.float32) + b3_ref[...])

    # Output layer: pre-sigmoid logits, 128-lane padded, stored as bf16
    # (sigmoid is applied to the real (B,1) column in the wrapper).
    z = jnp.dot(h, w4_ref[...], preferred_element_type=jnp.float32) + b4_ref[...]
    out_ref[...] = z.astype(jnp.bfloat16)


def init_params(key):
    """Deterministic synthetic parameters (PyTorch-style init shapes).

    Weights are stored transposed vs. PyTorch (in_features, out_features), in
    bf16 (MXU-native) and pre-padded to lane-aligned shapes; biases stay f32.
    The embedding table is pre-folded through W1's embedding rows.
    """
    ks = jax.random.split(key, 9)

    def lin(k, fan_in, shape):
        bound = 1.0 / jnp.sqrt(jnp.float32(fan_in))
        return jax.random.uniform(k, shape, jnp.float32, -bound, bound)

    emb = jax.random.normal(ks[0], (NUM_CLASSES, EMB_DIM), jnp.float32)

    # Linear(121, 512): split into curve rows (padded 111->128) and the
    # embedding rows folded with the embedding table (padded 101->128).
    w1_full = lin(ks[1], IN_DIM, (IN_DIM, HID))
    w1c = jnp.zeros((CURVE_PAD, HID), jnp.float32).at[:CURVE_DIM].set(
        w1_full[:CURVE_DIM]).astype(jnp.bfloat16)                     # (128, 512)
    w1e_eff = jnp.zeros((CLASS_PAD, HID), jnp.float32).at[:NUM_CLASSES].set(
        emb @ w1_full[CURVE_DIM:]).astype(jnp.bfloat16)               # (128, 512)
    b1 = lin(ks[2], IN_DIM, (1, HID))

    w2 = lin(ks[3], HID, (HID, HID)).astype(jnp.bfloat16)
    b2 = lin(ks[4], HID, (1, HID))
    w3 = lin(ks[5], HID, (HID, HID)).astype(jnp.bfloat16)
    b3 = lin(ks[6], HID, (1, HID))

    # Linear(512, 1), zero-padded along the output dim to 128 lanes.
    w4 = jnp.zeros((HID, OUT_PAD), jnp.float32).at[:, :1].set(
        lin(ks[7], HID, (HID, 1))).astype(jnp.bfloat16)
    b4 = jnp.zeros((1, OUT_PAD), jnp.float32).at[:, :1].set(
        lin(ks[8], HID, (1, 1)))

    return dict(w1c=w1c, w1e_eff=w1e_eff, b1=b1,
                w2=w2, b2=b2, w3=w3, b3=b3, w4=w4, b4=b4)


def _choose_tb(B):
    """Largest batch tile (<=512) that still yields >=2 grid steps.

    >=2 steps keeps v7x's two TensorCores busy under dimension_semantics=
    ("parallel",); 512 fills the 256-row MXU (v6e/v7x) and amortizes the
    ~0.35 us per-grid-step overhead. Falls back to 128 for tiny batches.
    """
    for tb in (512, 256, 128):
        if pl.cdiv(B, tb) >= 2:
            return tb
    return 128


def discriminator_forward(params, curves, labels):
    """curves: (B, 111) float, labels: (B,) int in [0, 101) -> (B, 1) validity."""
    B = curves.shape[0]
    TB = _choose_tb(B)
    n_tiles = pl.cdiv(B, TB)
    B_pad = n_tiles * TB

    # bf16, 128-column padded curves (halves input DMA bytes, lane-dense rows).
    curves_p = jnp.zeros((B_pad, CURVE_PAD), jnp.bfloat16).at[:B, :CURVE_DIM].set(
        curves.astype(jnp.bfloat16))
    labels_p = jnp.zeros((B_pad, 1), jnp.int32).at[:B, 0].set(
        labels.astype(jnp.int32))

    act = lambda i: (i, 0)   # batch-tiled activations
    res = lambda i: (0, 0)   # resident across batch tiles (no re-DMA)

    flops = 2 * B_pad * (CURVE_PAD * HID + CLASS_PAD * HID
                         + 2 * HID * HID + HID * OUT_PAD)
    weight_bytes = (2 * (CURVE_PAD * HID + CLASS_PAD * HID
                         + 2 * HID * HID + HID * OUT_PAD)
                    + 4 * (3 * HID + OUT_PAD))
    act_bytes = B_pad * (2 * CURVE_PAD + 4 + 2 * OUT_PAD)
    cost = pl.CostEstimate(flops=flops, transcendentals=0,
                           bytes_accessed=weight_bytes + act_bytes)

    grid_spec = pltpu.PrefetchScalarGridSpec(
        num_scalar_prefetch=0,
        grid=(n_tiles,),
        in_specs=[
            pl.BlockSpec((TB, CURVE_PAD), act),        # curves tile (bf16, padded)
            pl.BlockSpec((TB, 1), act),                # labels tile
            pl.BlockSpec((CURVE_PAD, HID), res),       # w1 curve rows (padded)
            pl.BlockSpec((CLASS_PAD, HID), res),       # folded emb @ w1 rows (padded)
            pl.BlockSpec((1, HID), res),               # b1
            pl.BlockSpec((HID, HID), res),             # w2
            pl.BlockSpec((1, HID), res),               # b2
            pl.BlockSpec((HID, HID), res),             # w3
            pl.BlockSpec((1, HID), res),               # b3
            pl.BlockSpec((HID, OUT_PAD), res),         # w4 (padded out dim)
            pl.BlockSpec((1, OUT_PAD), res),           # b4
        ],
        out_specs=pl.BlockSpec((TB, OUT_PAD), act),
    )

    logits = pl.pallas_call(
        disc_kernel,
        out_shape=jax.ShapeDtypeStruct((B_pad, OUT_PAD), jnp.bfloat16),
        grid_spec=grid_spec,
        compiler_params=pltpu.CompilerParams(dimension_semantics=("parallel",)),
        cost_estimate=cost,
    )(curves_p, labels_p,
      params["w1c"], params["w1e_eff"], params["b1"],
      params["w2"], params["b2"], params["w3"], params["b3"],
      params["w4"], params["b4"])

    # Sigmoid only on the single real output column, in f32, in the wrapper.
    return jax.nn.sigmoid(logits[:B, :1].astype(jnp.float32))


def _reference_forward(params, curves, labels):
    """Pure-JAX reference with matching bf16-operand / f32-accumulate math."""
    labels = labels.astype(jnp.int32)
    h = jnp.dot(curves.astype(jnp.bfloat16), params["w1c"][:CURVE_DIM],
                preferred_element_type=jnp.float32)
    h = h + jnp.take(params["w1e_eff"], labels, axis=0).astype(jnp.float32)
    h = _leaky_relu_bf16(h + params["b1"])
    h = _leaky_relu_bf16(jnp.dot(h, params["w2"],
                                 preferred_element_type=jnp.float32) + params["b2"])
    h = _leaky_relu_bf16(jnp.dot(h, params["w3"],
                                 preferred_element_type=jnp.float32) + params["b3"])
    z = jnp.dot(h, params["w4"], preferred_element_type=jnp.float32) + params["b4"]
    z = z[:, :1].astype(jnp.bfloat16).astype(jnp.float32)
    return jax.nn.sigmoid(z)


if __name__ == "__main__":
    key = jax.random.PRNGKey(0)
    k_params, k_curves, k_labels = jax.random.split(key, 3)

    params = init_params(k_params)

    B = 200  # spans 2 batch tiles (TB=128 via the adaptive picker) to exercise the grid
    curves = jax.random.normal(k_curves, (B, CURVE_DIM), jnp.float32)   # (200, 111)
    labels = jax.random.randint(k_labels, (B,), 0, NUM_CLASSES, jnp.int32)

    validity = jax.block_until_ready(discriminator_forward(params, curves, labels))
    assert validity.shape == (B, 1)
    assert bool(jnp.all((validity >= 0.0) & (validity <= 1.0)))

    ref = _reference_forward(params, curves, labels)
    assert float(jnp.max(jnp.abs(validity - ref))) < 2e-2

    print("KERNEL_OK")
</pallas_src>

<mosaic_0001>
module attributes {stable_mosaic.version = 11 : i64} {
  func.func @disc_kernel(%arg0: i32, %arg1: memref<128x128xbf16, #tpu.memory_space<vmem>>, %arg2: memref<128x1xi32, #tpu.memory_space<vmem>>, %arg3: memref<128x512xbf16, #tpu.memory_space<vmem>>, %arg4: memref<128x512xbf16, #tpu.memory_space<vmem>>, %arg5: memref<1x512xf32, #tpu.memory_space<vmem>>, %arg6: memref<512x512xbf16, #tpu.memory_space<vmem>>, %arg7: memref<1x512xf32, #tpu.memory_space<vmem>>, %arg8: memref<512x512xbf16, #tpu.memory_space<vmem>>, %arg9: memref<1x512xf32, #tpu.memory_space<vmem>>, %arg10: memref<512x128xbf16, #tpu.memory_space<vmem>>, %arg11: memref<1x128xf32, #tpu.memory_space<vmem>>, %arg12: memref<128x128xbf16, #tpu.memory_space<vmem>>) attributes {dimension_semantics = [#tpu.dimension_semantics<parallel>], iteration_bounds = array<i64: 2>, scalar_prefetch = 0 : i64, scratch_operands = 0 : i64, tpu.core_type = #tpu.core_type<tc>, window_params = [{transform_indices = @transform_0, window_bounds = array<i64: 128, 128>}, {transform_indices = @transform_1, window_bounds = array<i64: 128, 1>}, {pipeline_mode = #tpu.pipeline_mode<synchronous>, transform_indices = @transform_2, window_bounds = array<i64: 128, 512>}, {pipeline_mode = #tpu.pipeline_mode<synchronous>, transform_indices = @transform_3, window_bounds = array<i64: 128, 512>}, {pipeline_mode = #tpu.pipeline_mode<synchronous>, transform_indices = @transform_4, window_bounds = array<i64: 1, 512>}, {pipeline_mode = #tpu.pipeline_mode<synchronous>, transform_indices = @transform_5, window_bounds = array<i64: 512, 512>}, {pipeline_mode = #tpu.pipeline_mode<synchronous>, transform_indices = @transform_6, window_bounds = array<i64: 1, 512>}, {pipeline_mode = #tpu.pipeline_mode<synchronous>, transform_indices = @transform_7, window_bounds = array<i64: 512, 512>}, {pipeline_mode = #tpu.pipeline_mode<synchronous>, transform_indices = @transform_8, window_bounds = array<i64: 1, 512>}, {pipeline_mode = #tpu.pipeline_mode<synchronous>, transform_indices = @transform_9, window_bounds = array<i64: 512, 128>}, {pipeline_mode = #tpu.pipeline_mode<synchronous>, transform_indices = @transform_10, window_bounds = array<i64: 1, 128>}, {transform_indices = @transform_11, window_bounds = array<i64: 128, 128>}]} {
    %c0 = arith.constant 0 : index
    %c0_0 = arith.constant 0 : index
    %0 = vector.load %arg2[%c0, %c0_0] : memref<128x1xi32, #tpu.memory_space<vmem>>, vector<128x1xi32>
    %1 = tpu.iota {dimensions = array<i32: 1>} : vector<128x128xi32>
    %2 = vector.broadcast %0 : vector<128x1xi32> to vector<128x128xi32>
    %3 = arith.cmpi eq, %2, %1 : vector<128x128xi32>
    %4 = arith.extui %3 : vector<128x128xi1> to vector<128x128xi32>
    %5 = arith.sitofp %4 : vector<128x128xi32> to vector<128x128xf32>
    %6 = arith.truncf %5 : vector<128x128xf32> to vector<128x128xbf16>
    %c0_1 = arith.constant 0 : index
    %c0_2 = arith.constant 0 : index
    %7 = vector.load %arg1[%c0_1, %c0_2] : memref<128x128xbf16, #tpu.memory_space<vmem>>, vector<128x128xbf16>
    %c0_3 = arith.constant 0 : index
    %c0_4 = arith.constant 0 : index
    %8 = vector.load %arg3[%c0_3, %c0_4] : memref<128x512xbf16, #tpu.memory_space<vmem>>, vector<128x512xbf16>
    %cst = arith.constant dense<0.000000e+00> : vector<128x512xf32>
    %9 = tpu.matmul %7, %8, %cst {dimension_numbers = #tpu.dot_dimension_numbers<[1], [0], [0], [1], [0, 0, 1, 1], [], []>} : vector<128x128xbf16>, vector<128x512xbf16>, vector<128x512xf32> -> vector<128x512xf32>
    %c0_5 = arith.constant 0 : index
    %c0_6 = arith.constant 0 : index
    %10 = vector.load %arg4[%c0_5, %c0_6] : memref<128x512xbf16, #tpu.memory_space<vmem>>, vector<128x512xbf16>
    %cst_7 = arith.constant dense<0.000000e+00> : vector<128x512xf32>
    %11 = tpu.matmul %6, %10, %cst_7 {dimension_numbers = #tpu.dot_dimension_numbers<[1], [0], [0], [1], [0, 0, 1, 1], [], []>} : vector<128x128xbf16>, vector<128x512xbf16>, vector<128x512xf32> -> vector<128x512xf32>
    %12 = arith.addf %9, %11 : vector<128x512xf32>
    %c0_8 = arith.constant 0 : index
    %c0_9 = arith.constant 0 : index
    %13 = vector.load %arg5[%c0_8, %c0_9] : memref<1x512xf32, #tpu.memory_space<vmem>>, vector<1x512xf32>
    %14 = vector.broadcast %13 : vector<1x512xf32> to vector<128x512xf32>
    %15 = arith.addf %12, %14 : vector<128x512xf32>
    %16 = arith.truncf %15 : vector<128x512xf32> to vector<128x512xbf16>
    %cst_10 = arith.constant 2.001950e-01 : bf16
    %17 = vector.broadcast %cst_10 : bf16 to vector<128x512xbf16>
    %18 = arith.mulf %16, %17 : vector<128x512xbf16>
    %19 = arith.maximumf %16, %18 : vector<128x512xbf16>
    %c0_11 = arith.constant 0 : index
    %c0_12 = arith.constant 0 : index
    %20 = vector.load %arg6[%c0_11, %c0_12] : memref<512x512xbf16, #tpu.memory_space<vmem>>, vector<512x512xbf16>
    %cst_13 = arith.constant dense<0.000000e+00> : vector<128x512xf32>
    %21 = tpu.matmul %19, %20, %cst_13 {dimension_numbers = #tpu.dot_dimension_numbers<[1], [0], [0], [1], [0, 0, 1, 1], [], []>} : vector<128x512xbf16>, vector<512x512xbf16>, vector<128x512xf32> -> vector<128x512xf32>
    %c0_14 = arith.constant 0 : index
    %c0_15 = arith.constant 0 : index
    %22 = vector.load %arg7[%c0_14, %c0_15] : memref<1x512xf32, #tpu.memory_space<vmem>>, vector<1x512xf32>
    %23 = vector.broadcast %22 : vector<1x512xf32> to vector<128x512xf32>
    %24 = arith.addf %21, %23 : vector<128x512xf32>
    %25 = arith.truncf %24 : vector<128x512xf32> to vector<128x512xbf16>
    %cst_16 = arith.constant 2.001950e-01 : bf16
    %26 = vector.broadcast %cst_16 : bf16 to vector<128x512xbf16>
    %27 = arith.mulf %25, %26 : vector<128x512xbf16>
    %28 = arith.maximumf %25, %27 : vector<128x512xbf16>
    %c0_17 = arith.constant 0 : index
    %c0_18 = arith.constant 0 : index
    %29 = vector.load %arg8[%c0_17, %c0_18] : memref<512x512xbf16, #tpu.memory_space<vmem>>, vector<512x512xbf16>
    %cst_19 = arith.constant dense<0.000000e+00> : vector<128x512xf32>
    %30 = tpu.matmul %28, %29, %cst_19 {dimension_numbers = #tpu.dot_dimension_numbers<[1], [0], [0], [1], [0, 0, 1, 1], [], []>} : vector<128x512xbf16>, vector<512x512xbf16>, vector<128x512xf32> -> vector<128x512xf32>
    %c0_20 = arith.constant 0 : index
    %c0_21 = arith.constant 0 : index
    %31 = vector.load %arg9[%c0_20, %c0_21] : memref<1x512xf32, #tpu.memory_space<vmem>>, vector<1x512xf32>
    %32 = vector.broadcast %31 : vector<1x512xf32> to vector<128x512xf32>
    %33 = arith.addf %30, %32 : vector<128x512xf32>
    %34 = arith.truncf %33 : vector<128x512xf32> to vector<128x512xbf16>
    %cst_22 = arith.constant 2.001950e-01 : bf16
    %35 = vector.broadcast %cst_22 : bf16 to vector<128x512xbf16>
    %36 = arith.mulf %34, %35 : vector<128x512xbf16>
    %37 = arith.maximumf %34, %36 : vector<128x512xbf16>
    %c0_23 = arith.constant 0 : index
    %c0_24 = arith.constant 0 : index
    %38 = vector.load %arg10[%c0_23, %c0_24] : memref<512x128xbf16, #tpu.memory_space<vmem>>, vector<512x128xbf16>
    %cst_25 = arith.constant dense<0.000000e+00> : vector<128x128xf32>
    %39 = tpu.matmul %37, %38, %cst_25 {dimension_numbers = #tpu.dot_dimension_numbers<[1], [0], [0], [1], [0, 0, 1, 1], [], []>} : vector<128x512xbf16>, vector<512x128xbf16>, vector<128x128xf32> -> vector<128x128xf32>
    %c0_26 = arith.constant 0 : index
    %c0_27 = arith.constant 0 : index
    %40 = vector.load %arg11[%c0_26, %c0_27] : memref<1x128xf32, #tpu.memory_space<vmem>>, vector<1x128xf32>
    %41 = vector.broadcast %40 : vector<1x128xf32> to vector<128x128xf32>
    %42 = arith.addf %39, %41 : vector<128x128xf32>
    %43 = arith.truncf %42 : vector<128x128xf32> to vector<128x128xbf16>
    %c0_28 = arith.constant 0 : index
    %c0_29 = arith.constant 0 : index
    %44 = vector.load %arg12[%c0_28, %c0_29] : memref<128x128xbf16, #tpu.memory_space<vmem>>, vector<128x128xbf16>
    tpu.vector_store %arg12[%c0_28, %c0_29], %43 {strides = array<i32>} : memref<128x128xbf16, #tpu.memory_space<vmem>>, vector<128x128xbf16>,
    return
  }
  func.func @transform_0(%arg0: i32) -> (i32, i32) {
    %c0_i32 = arith.constant 0 : i32
    %c0_i32_0 = arith.constant 0 : i32
    return %arg0, %c0_i32 : i32, i32
  }
  func.func @transform_1(%arg0: i32) -> (i32, i32) {
    %c0_i32 = arith.constant 0 : i32
    %c0_i32_0 = arith.constant 0 : i32
    return %arg0, %c0_i32 : i32, i32
  }
  func.func @transform_2(%arg0: i32) -> (i32, i32) {
    %c0_i32 = arith.constant 0 : i32
    %c0_i32_0 = arith.constant 0 : i32
    %c0_i32_1 = arith.constant 0 : i32
    return %c0_i32, %c0_i32_0 : i32, i32
  }
  func.func @transform_3(%arg0: i32) -> (i32, i32) {
    %c0_i32 = arith.constant 0 : i32
    %c0_i32_0 = arith.constant 0 : i32
    %c0_i32_1 = arith.constant 0 : i32
    return %c0_i32, %c0_i32_0 : i32, i32
  }
  func.func @transform_4(%arg0: i32) -> (i32, i32) {
    %c0_i32 = arith.constant 0 : i32
    %c0_i32_0 = arith.constant 0 : i32
    %c0_i32_1 = arith.constant 0 : i32
    return %c0_i32, %c0_i32_0 : i32, i32
  }
  func.func @transform_5(%arg0: i32) -> (i32, i32) {
    %c0_i32 = arith.constant 0 : i32
    %c0_i32_0 = arith.constant 0 : i32
    %c0_i32_1 = arith.constant 0 : i32
    return %c0_i32, %c0_i32_0 : i32, i32
  }
  func.func @transform_6(%arg0: i32) -> (i32, i32) {
    %c0_i32 = arith.constant 0 : i32
    %c0_i32_0 = arith.constant 0 : i32
    %c0_i32_1 = arith.constant 0 : i32
    return %c0_i32, %c0_i32_0 : i32, i32
  }
  func.func @transform_7(%arg0: i32) -> (i32, i32) {
    %c0_i32 = arith.constant 0 : i32
    %c0_i32_0 = arith.constant 0 : i32
    %c0_i32_1 = arith.constant 0 : i32
    return %c0_i32, %c0_i32_0 : i32, i32
  }
  func.func @transform_8(%arg0: i32) -> (i32, i32) {
    %c0_i32 = arith.constant 0 : i32
    %c0_i32_0 = arith.constant 0 : i32
    %c0_i32_1 = arith.constant 0 : i32
    return %c0_i32, %c0_i32_0 : i32, i32
  }
  func.func @transform_9(%arg0: i32) -> (i32, i32) {
    %c0_i32 = arith.constant 0 : i32
    %c0_i32_0 = arith.constant 0 : i32
    %c0_i32_1 = arith.constant 0 : i32
    return %c0_i32, %c0_i32_0 : i32, i32
  }
  func.func @transform_10(%arg0: i32) -> (i32, i32) {
    %c0_i32 = arith.constant 0 : i32
    %c0_i32_0 = arith.constant 0 : i32
    %c0_i32_1 = arith.constant 0 : i32
    return %c0_i32, %c0_i32_0 : i32, i32
  }
  func.func @transform_11(%arg0: i32) -> (i32, i32) {
    %c0_i32 = arith.constant 0 : i32
    %c0_i32_0 = arith.constant 0 : i32
    return %arg0, %c0_i32 : i32, i32
  }
}

</mosaic_0001>

<bundles_post_ra>
// kernel: tpu_custom_call.1
= control target key start
LH: loop header
LB: loop body
LE: loop exit
PB: predicated region body
PF: predicated region fallthrough
CT: control target
= control target key end

     0   :  { %s7821_s0 = inlined_call_operand.hbm [shape: bf16[256,128], index: 0, kind: input, shape index: {}]   ;;  %s7822_s1 = inlined_call_operand.vmem [shape: s32[256,1], index: 1, kind: input, shape index: {}]   ;;  %s7823_s2 = inlined_call_operand.vmem [shape: bf16[128,512], index: 2, kind: input, shape index: {}]   ;;  %s7824_s3 = inlined_call_operand.hbm [shape: bf16[128,512], index: 3, kind: input, shape index: {}]   ;;  %s7825_s4 = inlined_call_operand.vmem [shape: f32[1,512], index: 4, kind: input, shape index: {}]   ;;  %s7826_s5 = inlined_call_operand.hbm [shape: bf16[512,512], index: 5, kind: input, shape index: {}]   ;;  %s7827_s6 = inlined_call_operand.vmem [shape: f32[1,512], index: 6, kind: input, shape index: {}]   ;;  %s7828_s7 = inlined_call_operand.hbm [shape: bf16[512,512], index: 7, kind: input, shape index: {}]   ;;  %s7829_s8 = inlined_call_operand.vmem [shape: f32[1,512], index: 8, kind: input, shape index: {}]   ;;  %s7830_s9 = inlined_call_operand.hbm [shape: bf16[512,128], index: 9, kind: input, shape index: {}]   ;;  %s7831_s10 = inlined_call_operand.vmem [shape: f32[1,128], index: 10, kind: input, shape index: {}]   ;;  %s7832_s11 = inlined_call_operand.hbm [shape: bf16[256,128], index: 11, kind: output, shape index: {}]  }
   0x1   :  { %7839 = sst [smem:[#allocation18_spill]] %s7829_s8 }
   0x2   :  { %7840 = sst [smem:[#allocation19_spill]] %s7831_s10 }
   0x3   :  { %7841 = sst [smem:[#allocation20_spill]] %s7832_s11 }
   0x4   :  { %16 = vsyncpa [#allocation3], 0 }
   0x5   :  { %18 = vsyncpa [#allocation3 + $0x1], 0 }
   0x6   :  { %19 = vsyncpa [#allocation6], 0 }
   0x7   :  { %20 = vsyncpa [#allocation9], 0 }
   0x8   :  { %21 = vsyncpa [#allocation4], 0 }
   0x9   :  { %23 = vsyncpa [#allocation4 + $0x1], 0  ;;  %s6914_s17 = smov 0   ;;  %s6916_s18 = smov 0  }
   0xa   :  { %s6918_s19 = smov 0   ;;  %s6920_s20 = smov 0  }
   0xb LB: > { %7842 = sst [smem:[#allocation16_spill]] %s6826_s17  ;;  %s6935_s21 = sadd.s32 4294967295, %s6838_s20   ;;  %s6838_s20 = sphi %s6920_s20, %s7870_s20   ;;  %s6834_s19 = sphi %s6918_s19, %s7869_s19   ;;  %s6830_s18 = sphi %s6916_s18, %s7868_s18   ;;  %s6826_s17 = sphi %s6914_s17, %s7867_s17  }
   0xc   : > { %s5043_s22 = sadd.s32 4294967294, %s6838_s20   ;;  %p49_p0 = scmp.ne.s32.totalorder %s6830_s18, %s6826_s17 }
   0xd   : > { %p7834_p1 = scmp.eq.s32.totalorder %s6935_s21, 0  ;;  %p294_p3 = scmp.eq.s32.totalorder %s5043_s22, 1 }
   0xe   : > { %p5044_p5 = scmp.ge.s32.totalorder %s6838_s20, 1  ;;  %p301_p7 = scmp.lt.s32.totalorder %s6838_s20, 3 }
   0xf   : > { %p6944_p4 = por %p7834_p1, %p49_p0  ;;  %p6949_p6 = por %p294_p3, %p49_p0 }
  0x10   : > { %p6954_p8 = pnand %p5044_p5, %p301_p7  ;;  %s6840_s26 = smov [#allocation5]  }
  0x11   : > { %s7843_s23 = scalar_select %p6944_p4, 1, 0 }
  0x12   : > { %s7844_s24 = scalar_select %p6949_p6, 1, 0 }
  0x13   : > { %s7846_s25 = scalar_select %p6954_p8, 1, 0 }
  0x14   : > { %7845 = sst [smem:[#allocation17_spill]] %s7844_s24  ;;  %s316_s27 = sshll.u32 %s6840_s26, 4  ;;  %s6958_s27 = int_to_ptr.vmem [resolvable:$true] %s316_s27 }
  0x15   : > { %p6025_p9 = pneg %p6954_p8  ;;  %s6841_s29 = smov [#allocation8]  }
  0x16   : > { %s348_s30 = sshll.u32 %s6841_s29, 4  ;;  %s6842_s12 = smov [#allocation7]   ;;  %s6969_s30 = int_to_ptr.vmem [resolvable:$true] %s348_s30 }
  0x17   : > { %p6965_p11 = pnand %p6025_p9, %p7834_p1  ;;  %s6971_s13 = sshll.u32 %s6842_s12, 4  ;;  %s333_s13 = int_to_ptr.vmem [resolvable:$true] %s6971_s13 }
  0x18   : > { %s6622_s16 = scalar_lea.hbm %s7824_s3, 4096 }
  0x19   : > { %p6623_p12 = scmp.ne.s32.totalorder %s7824_s3, %s6622_s16  ;;  %p6981_p13 = pneg %p6965_p11 }
  0x1a   : > { %p6629_p5 = scmp.lt.u32.totalorder %s6622_s16, %s7824_s3 }
  0x1b   : > { %p6625_p0 = pnand %p6981_p13, %p6623_p12 }
  0x1d   : > { %p6626_p3 = pneg %p6625_p0 }
  0x1f   : > { %p6631_p7 = pnand %p6629_p5, %p6626_p3 }
  0x21   : > { %6634 = shalt.err (!%p6631_p7)
}
  0x22   : > { %s6635_s14 = scalar_lea.vmem %s6958_s27, 4096  ;;  %p6643_p2 = scmp.lt.s32.totalorder %s6958_s27, %s6958_s27 }
  0x23   : > { %p6636_p9 = scmp.ne.s32.totalorder %s6958_s27, %s6635_s14  ;;  %p6644_p6 = scmp.lt.s32.totalorder %s6635_s14, %s6635_s14 }
  0x25   : > { %p6638_p10 = pnand %p6636_p9, %p6981_p13  ;;  %p6645_p12 = por %p6644_p6, %p6643_p2 }
  0x27   : > { %p6639_p1 = pneg %p6638_p10 }
  0x29   : > { %p6646_p0 = pnand %p6645_p12, %p6639_p1 }
  0x2b   : > { %6649 = shalt.err (!%p6646_p0)
}
  0x2c   : > { %s6843_s15 = smov 256   ;;  %s6844_s16 = smov 16  }
  0x2d   : > { %6028 = dma.hbm_to_vmem [thread:$0]  (!%p6965_p11), %s7824_s3, 4096, %s6958_s27, [#allocation6], %s6843_s15, %s6843_s15, %s6844_s16  }
  0x2e   : > { %s6650_s14 = scalar_lea.hbm %s7828_s7, 16384 }
  0x2f   : > { %p6651_p1 = scmp.ne.s32.totalorder %s7828_s7, %s6650_s14  ;;  %p6657_p10 = scmp.lt.u32.totalorder %s6650_s14, %s7828_s7 }
  0x31   : > { %p6653_p2 = pnand %p6651_p1, %p6981_p13 }
  0x33   : > { %p6654_p6 = pneg %p6653_p2 }
  0x35   : > { %p6659_p3 = pnand %p6657_p10, %p6654_p6 }
  0x37   : > { %6662 = shalt.err (!%p6659_p3)
}
  0x38   : > { %s6663_s27 = scalar_lea.vmem %s6969_s30, 16384  ;;  %p6671_p12 = scmp.lt.s32.totalorder %s6969_s30, %s6969_s30 }
  0x39   : > { %p6664_p5 = scmp.ne.s32.totalorder %s6969_s30, %s6663_s27  ;;  %p6672_p0 = scmp.lt.s32.totalorder %s6663_s27, %s6663_s27 }
  0x3b   : > { %p6666_p7 = pnand %p6664_p5, %p6981_p13  ;;  %p6673_p1 = por %p6672_p0, %p6671_p12 }
  0x3d   : > { %p6667_p9 = pneg %p6666_p7 }
  0x3f   : > { %p6674_p2 = pnand %p6673_p1, %p6667_p9 }
  0x41   : > { %6677 = shalt.err (!%p6674_p2)
}
  0x42   : > { %6034 = dma.hbm_to_vmem [thread:$0]  (!%p6965_p11), %s7828_s7, 16384, %s6969_s30, [#allocation9], %s6843_s15, %s6843_s15, %s6844_s16  }
  0x43   : > { %s6678_s22 = scalar_lea.hbm %s7826_s5, 16384 }
  0x44   : > { %p6679_p6 = scmp.ne.s32.totalorder %s7826_s5, %s6678_s22  ;;  %p6685_p5 = scmp.lt.u32.totalorder %s6678_s22, %s7826_s5 }
  0x46   : > { %p6681_p10 = pnand %p6679_p6, %p6981_p13 }
  0x48   : > { %p6682_p3 = pneg %p6681_p10 }
  0x4a   : > { %p6687_p7 = pnand %p6685_p5, %p6682_p3 }
  0x4c   : > { %6690 = shalt.err (!%p6687_p7)
}
  0x4d   : > { %s6691_s27 = scalar_lea.vmem %s333_s13, 16384  ;;  %p6699_p1 = scmp.lt.s32.totalorder %s333_s13, %s333_s13 }
  0x4e   : > { %p6692_p9 = scmp.ne.s32.totalorder %s333_s13, %s6691_s27  ;;  %p6700_p2 = scmp.lt.s32.totalorder %s6691_s27, %s6691_s27 }
  0x50   : > { %p6694_p12 = pnand %p6692_p9, %p6981_p13  ;;  %p6701_p4 = por %p6700_p2, %p6699_p1 }
  0x52   : > { %p6695_p0 = pneg %p6694_p12 }
  0x54   : > { %p6702_p8 = pnand %p6701_p4, %p6695_p0 }
  0x56   : > { %6705 = shalt.err (!%p6702_p8)
}
  0x57   : > { %6031 = dma.hbm_to_vmem [thread:$0]  (!%p6965_p11), %s7826_s5, 16384, %s333_s13, [#allocation6], %s6843_s15, %s6843_s15, %s6844_s16  }
  0x58   : > { %s6845_s10 = smov [#allocation10]   ;;  %s6706_s26 = scalar_lea.hbm %s7830_s9, 4096 }
  0x59   : > { %s364_s11 = sshll.u32 %s6845_s10, 4  ;;  %p6707_p4 = scmp.ne.s32.totalorder %s7830_s9, %s6706_s26  ;;  %s365_s11 = int_to_ptr.vmem [resolvable:$true] %s364_s11 }
  0x5a   : > { %p6713_p10 = scmp.lt.u32.totalorder %s6706_s26, %s7830_s9 }
  0x5b   : > { %p6709_p8 = pnand %p6707_p4, %p6981_p13 }
  0x5d   : > { %p6710_p6 = pneg %p6709_p8 }
  0x5f   : > { %p6715_p3 = pnand %p6713_p10, %p6710_p6 }
  0x61   : > { %6718 = shalt.err (!%p6715_p3)
}
  0x62   : > { %s6719_s13 = scalar_lea.vmem %s365_s11, 4096  ;;  %p6727_p12 = scmp.lt.s32.totalorder %s365_s11, %s365_s11 }
  0x63   : > { %p6720_p5 = scmp.ne.s32.totalorder %s365_s11, %s6719_s13  ;;  %p6728_p0 = scmp.lt.s32.totalorder %s6719_s13, %s6719_s13 }
  0x65   : > { %p6722_p7 = pnand %p6720_p5, %p6981_p13  ;;  %p6729_p1 = por %p6728_p0, %p6727_p12 }
  0x67   : > { %p6723_p9 = pneg %p6722_p7 }
  0x69   : > { %p6730_p2 = pnand %p6729_p1, %p6723_p9 }
  0x6b   : > { %6733 = shalt.err (!%p6730_p2)
}
  0x6c   : > { %s6846_s15 = smov 64   ;;  %s6847_s24 = smov 4  }
  0x6d   : > { %6037 = dma.hbm_to_vmem [thread:$0]  (!%p6965_p11), %s7830_s9, 4096, %s365_s11, [#allocation9], %s6846_s15, %s6846_s15, %s6847_s24  }
  0x6e   : > { %s7075_s8 = sadd.s32 1, %s6838_s20   ;;  %s36_s17 = sadd.s32 1, %s6834_s19 }
  0x6f   : > { %s33_s10 = ssub.s32 %s6838_s20, %s7075_s8  ;;  %p43_p4 = scmp.ne.s32.totalorder %s6834_s19, %s6830_s18 }
  0x70   : > { %p34_p13 = scmp.eq.s32.totalorder %s33_s10, 0  ;;  %p44_p8 = scmp.eq.s32.totalorder %s6838_s20, 0 }
  0x71   : > { %p7849_p10 = scmp.eq.s32.totalorder %s6935_s21, 1  ;;  %p6050_p5 = scmp.lt.s32.totalorder %s6838_s20, 2 }
  0x72   : > { %s7084_s22 = scalar_select %p34_p13, %s6834_s19, %s36_s17  }
  0x73   : > { %p45_p6 = por %p44_p8, %p43_p4  ;;  %p7088_p3 = por %p7849_p10, %p43_p4 }
  0x74   : > { %s381_s26 = sand.u32 1, %s6834_s19   ;;  %s5492_s11 = sshll.u32 %s6838_s20, 10 }
  0x75   : > { %s5050_s29 = sshll.u32 %s381_s26, 6  ;;  %s7098_s27 = scalar_lea.hbm %s7821_s0, %s5492_s11 }
  0x76   : > { %s385_s13 = scalar_lea.vmem [#allocation2], %s5050_s29  ;;  %p7102_p11 = pnand %p6050_p5, %p45_p6 }
  0x77   : > { %s392_s16 = sshll.u32 %s385_s13, 4  ;;  %s7106_s10 = scalar_lea.sflag [#allocation3], %s381_s26  ;;  %s7100_s16 = int_to_ptr.vmem [resolvable:$true] %s392_s16 }
  0x78   : > { %s6734_s17 = scalar_lea.hbm %s7098_s27, 1024  ;;  %p6736_p9 = pneg %p7102_p11 }
  0x79   : > { %p6735_p7 = scmp.ne.s32.totalorder %s7098_s27, %s6734_s17  ;;  %s6739_s12 = scalar_lea.hbm %s7821_s0, 2048 }
  0x7a   : > { %p6740_p1 = scmp.lt.u32.totalorder %s7098_s27, %s7821_s0  ;;  %p6741_p2 = scmp.lt.u32.totalorder %s6739_s12, %s6734_s17 }
  0x7b   : > { %p6737_p12 = pnand %p6736_p9, %p6735_p7  ;;  %p6743_p4 = scmp.lt.u32.totalorder %s6734_s17, %s7098_s27 }
  0x7c   : > { %p6742_p13 = por %p6741_p2, %p6740_p1 }
  0x7d   : > { %p6738_p0 = pneg %p6737_p12 }
  0x7e   : > { %p6744_p8 = por %p6743_p4, %p6742_p13 }
  0x80   : > { %p6745_p6 = pnand %p6744_p8, %p6738_p0 }
  0x82   : > { %6748 = shalt.err (!%p6745_p6)
}
  0x83   : > { %s6749_s26 = scalar_lea.vmem %s7100_s16, 1024  ;;  %s6848_s29 = smov [#allocation2]  }
  0x84   : > { %p6750_p10 = scmp.ne.s32.totalorder %s7100_s16, %s6749_s26  ;;  %s6754_s11 = sshll.u32 %s6848_s29, 4  ;;  %s6755_s11 = int_to_ptr.vmem [resolvable:$false] %s6754_s11 }
  0x85   : > { %s6756_s14 = scalar_lea.vmem %s6755_s11, 2048  ;;  %p6757_p12 = scmp.lt.s32.totalorder %s7100_s16, %s6755_s11 }
  0x86   : > { %p6752_p5 = pnand %p6750_p10, %p6736_p9  ;;  %p6758_p1 = scmp.lt.s32.totalorder %s6756_s14, %s6749_s26 }
  0x88   : > { %p6753_p7 = pneg %p6752_p5  ;;  %p6759_p2 = por %p6758_p1, %p6757_p12 }
  0x8a   : > { %p6760_p13 = pnand %p6759_p2, %p6753_p7 }
  0x8c   : > { %6763 = shalt.err (!%p6760_p13)
}
  0x8d   : > { %6041 = dma.hbm_to_vmem [thread:$0]  (!%p7102_p11), %s7098_s27, 1024, %s7100_s16, %s7106_s10, %s6846_s15, %s6846_s15, %s6847_s24  }
  0x8e   : > { %p7852_p9 = scmp.ne.s32.totalorder %s7846_s25, 0 }
  0x8f   : > { %s7140_s17 = sand.u32 (!%p7852_p9), 1, %s6830_s18   ;;  %p7853_p0 = scmp.ne.s32.totalorder (!%p7852_p9), %s7843_s23, 0 }
  0x90   : > { %413 = sbr.rel (%p7852_p9) target bundleno = 1458 (0x5b2), region = 64  ;;  %s5054_s12 = sshll.u32 (!%p7852_p9), %s7140_s17, 6 }
  0x91   : > { %s416_s13 = scalar_lea.sflag (!%p7852_p9), [#allocation3], %s7140_s17  ;;  %s7146_s30 = scalar_lea.vmem (!%p7852_p9), [#allocation2], %s5054_s12 }
  0x97   : > { %6809 = dma.done.wait (%p7853_p0), %s416_s13, 1024  }
  0x98   : > { %6811 = vsyncadd (%p7853_p0), %s416_s13, 4294966272  ;;  %p7854_p11 = scmp.eq.s32.totalorder %s6935_s21, 0 }
  0x9a   : > { %6813 = dma.done.wait (%p7854_p11), [#allocation6], 20480   ;;  %p7855_p4 = pmov %p7854_p11 }
  0x9c   : > { %6815 = vsyncadd (%p7855_p4), [#allocation6], 4294946816  ;;  %p7856_p8 = pmov %p7855_p4 }
  0x9d   : > { %p7857_p6 = pmov %p7855_p4 }
  0x9e   : > { %6817 = dma.done.wait (%p7856_p8), [#allocation9], 20480  }
  0x9f   : > { %6819 = vsyncadd (%p7857_p6), [#allocation9], 4294946816  ;;  %s5060_s25 = sshll.u32 %s6935_s21, 4  ;;  %v6849_v0 = vmov 0   ;;  %v6102_v7 = vld [vmem:[#allocation5 + $0x4] ss:$16 sps:$4 sm:$0xff]   ;;  %v505_v51 = vlaneseq }
  0xa0   : > { %6101 = vset.pattern.permute.xlu1 %v6849_v0  ;;  %6100 = vset.pattern.permute.xlu0 %v6849_v0  ;;  %p481_p10 = scmp.lt.s32.totalorder %s5060_s25, 31  ;;  %v6104_v8 = vld [vmem:[#allocation5] ss:$16 sps:$4 sm:$0xff]   ;;  %v6105_v9 = vld [vmem:[#allocation5 + $0xc] ss:$16 sps:$4 sm:$0xff]   ;;  %s7860_s15 = sld [smem:[#allocation18_spill]] }
  0xa1   : > { %883 = vmatprep.mubr.bf16.mxu0 %v6849_v0  ;;  %996 = vmatprep.mubr.bf16.mxu1 %v6849_v0  ;;  %v6107_v10 = vld [vmem:[#allocation5 + $0x8] ss:$16 sps:$4 sm:$0xff]   ;;  %v6108_v12 = vld [vmem:[#allocation5 + $0x24] ss:$16 sps:$4 sm:$0xff]   ;;  %v6110_v14 = vld [vmem:[#allocation5 + $0x20] ss:$16 sps:$4 sm:$0xff]  }
  0xa2   : > { %s7872_s25 = smov (!%p481_p10, %s5060_s25), 31  ;;  %851 = vmatprep.subr.bf16.mxu0 %v6102_v7  ;;  %964 = vmatprep.subr.bf16.mxu1 %v6105_v9  ;;  %v6111_v15 = vld [vmem:[#allocation5 + $0x2c] ss:$16 sps:$4 sm:$0xff]   ;;  %v6113_v16 = vld [vmem:[#allocation5 + $0x28] ss:$16 sps:$4 sm:$0xff]   ;;  %v7193_v54 = vand.u32 127, %v505_v51 }
  0xa3   : > { %s5061_s23 = sshll.u32 %s7872_s25, 3  ;;  %852 = vmatpush1.bf16.msra.mxu0 %v6104_v8  ;;  %965 = vmatpush1.bf16.msra.mxu1 %v6107_v10  ;;  %v6114_v17 = vld [vmem:[#allocation5 + $0x44] ss:$16 sps:$4 sm:$0xff]   ;;  %v6117_v18 = vld [vmem:[#allocation5 + $0x4c] ss:$16 sps:$4 sm:$0xff]   ;;  %s7861_s16 = sld [smem:[#allocation19_spill]] }
  0xa4   : > { %s7168_s27 = scalar_lea.vmem %s7822_s1, %s5061_s23  ;;  %853 = vmatprep.subr.bf16.mxu0 %v6108_v12  ;;  %966 = vmatprep.subr.bf16.mxu1 %v6111_v15  ;;  %v6116_v21 = vld [vmem:[#allocation5 + $0x40] ss:$16 sps:$4 sm:$0xff]   ;;  %v6119_v22 = vld [vmem:[#allocation5 + $0x48] ss:$16 sps:$4 sm:$0xff]   ;;  %v6120_v23 = vld [vmem:[#allocation5 + $0x64] ss:$16 sps:$4 sm:$0xff]  }
  0xa5   : > { %v491_v1 = vld [vmem:[%s7168_s27 + $0x10] sm:$0xff]  ;;  %v489_v2 = vld [vmem:[%s7168_s27] sm:$0xff]  ;;  %v492_v3 = vld [vmem:[%s7168_s27 + $0x18] sm:$0xff]  ;;  %v6850_v60 = vmov 1.0|1.0   ;;  %s7746_s10 = scalar_lea.vmem [#allocation11], %s5054_s12 }
  0xa6   : > { %514 = vperm.xlu1 %6101, %v491_v1   ;;  %508 = vperm.xlu0 %6100, %v489_v2   ;;  %v490_v4 = vld [vmem:[%s7168_s27 + $0x8] sm:$0xff]  ;;  %v493_v6 = vld [vmem:[%s7168_s27 + $0x20] sm:$0xff]  ;;  %v496_v11 = vld [vmem:[%s7168_s27 + $0x38] sm:$0xff]  ;;  %s5509_s12 = sshll.u32 %s6935_s21, 10  ;;  %s4920_s26 = sshll.u32 %s7746_s10, 4  ;;  %s7776_s26 = int_to_ptr.vmem [resolvable:$true] %s4920_s26 }
  0xa7   : > { %v494_v5 = vld [vmem:[%s7168_s27 + $0x28] sm:$0xff]  ;;  %v495_v13 = vld [vmem:[%s7168_s27 + $0x30] sm:$0xff]  ;;  %v497_v20 = vld [vmem:[%s7168_s27 + $0x40] sm:$0xff]  ;;  %854 = vmatpush1.bf16.msra.mxu0 %v6110_v14  ;;  %967 = vmatpush1.bf16.msra.mxu1 %v6113_v16  ;;  %s7862_s11 = sld [smem:[#allocation20_spill]]  ;;  %s4907_s13 = scalar_lea.sflag [#allocation4], %s7140_s17 }
  0xa8   : > { %v498_v19 = vld [vmem:[%s7168_s27 + $0x48] sm:$0xff]  ;;  %855 = vmatprep.subr.bf16.mxu0 %v6114_v17  ;;  %968 = vmatprep.subr.bf16.mxu1 %v6117_v18  ;;  %v500_v25 = vld [vmem:[%s7168_s27 + $0x58] sm:$0xff]  ;;  %v499_v26 = vld [vmem:[%s7168_s27 + $0x50] sm:$0xff]  ;;  %s6764_s25 = scalar_lea.vmem %s7776_s26, 1024  ;;  %s6851_s21 = smov [#allocation11]  }
  0xa9   : > { %v6123_v24 = vld [vmem:[#allocation5 + $0x6c] ss:$16 sps:$4 sm:$0xff]   ;;  %v6122_v27 = vld [vmem:[#allocation5 + $0x60] ss:$16 sps:$4 sm:$0xff]   ;;  %v6125_v28 = vld [vmem:[#allocation5 + $0x68] ss:$16 sps:$4 sm:$0xff]   ;;  %p6765_p5 = scmp.ne.s32.totalorder %s7776_s26, %s6764_s25 }
  0xaa   : > { %517 = vperm.xlu1 %6101, %v492_v3   ;;  %511 = vperm.xlu0 %6100, %v490_v4   ;;  %v6126_v29 = vld [vmem:[#allocation5 + $0x84] ss:$16 sps:$4 sm:$0xff]   ;;  %v6129_v30 = vld [vmem:[#allocation5 + $0x8c] ss:$16 sps:$4 sm:$0xff]   ;;  %v6128_v33 = vld [vmem:[#allocation5 + $0x80] ss:$16 sps:$4 sm:$0xff]  }
  0xab   : > { %856 = vmatpush1.bf16.msra.mxu0 %v6116_v21  ;;  %969 = vmatpush1.bf16.msra.mxu1 %v6119_v22  ;;  %v502_v31 = vld [vmem:[%s7168_s27 + $0x68] sm:$0xff]  ;;  %v501_v32 = vld [vmem:[%s7168_s27 + $0x60] sm:$0xff]  ;;  %v504_v37 = vld [vmem:[%s7168_s27 + $0x78] sm:$0xff]  ;;  %p6766_p7 = pnand %p6765_p5, %p7088_p3  ;;  %s6768_s23 = sshll.u32 %s6851_s21, 4  ;;  %s6769_s23 = int_to_ptr.vmem [resolvable:$false] %s6768_s23 }
  0xac   : > { %857 = vmatprep.subr.bf16.mxu0 %v6120_v23  ;;  %970 = vmatprep.subr.bf16.mxu1 %v6123_v24  ;;  %v6131_v34 = vld [vmem:[#allocation5 + $0x88] ss:$16 sps:$4 sm:$0xff]   ;;  %v6132_v35 = vld [vmem:[#allocation5 + $0xa4] ss:$16 sps:$4 sm:$0xff]   ;;  %v6135_v36 = vld [vmem:[#allocation5 + $0xac] ss:$16 sps:$4 sm:$0xff]   ;;  %p6771_p1 = scmp.lt.s32.totalorder %s7776_s26, %s6769_s23 }
  0xad   : > { %v503_v38 = vld [vmem:[%s7168_s27 + $0x70] sm:$0xff]  ;;  %v6137_v40 = vld [vmem:[#allocation5 + $0xa8] ss:$16 sps:$4 sm:$0xff]   ;;  %v6141_v42 = vld [vmem:[#allocation5 + $0xcc] ss:$16 sps:$4 sm:$0xff]   ;;  %s7774_s14 = scalar_lea.hbm %s7862_s11, %s5509_s12  ;;  %p6767_p12 = pneg %p6766_p7 }
  0xae   : > { %523 = vperm.xlu1 %6101, %v494_v5   ;;  %520 = vperm.xlu0 %6100, %v493_v6   ;;  %v6134_v39 = vld [vmem:[#allocation5 + $0xa0] ss:$16 sps:$4 sm:$0xff]   ;;  %v6138_v41 = vld [vmem:[#allocation5 + $0xc4] ss:$16 sps:$4 sm:$0xff]   ;;  %v6143_v44 = vld [vmem:[#allocation5 + $0xc8] ss:$16 sps:$4 sm:$0xff]  }
  0xaf   : > { %858 = vmatpush1.bf16.msra.mxu0 %v6122_v27  ;;  %971 = vmatpush1.bf16.msra.mxu1 %v6125_v28  ;;  %v6140_v43 = vld [vmem:[#allocation5 + $0xc0] ss:$16 sps:$4 sm:$0xff]   ;;  %v6144_v45 = vld [vmem:[#allocation5 + $0xe4] ss:$16 sps:$4 sm:$0xff]   ;;  %v6147_v46 = vld [vmem:[#allocation5 + $0xec] ss:$16 sps:$4 sm:$0xff]  }
  0xb0   : > { %859 = vmatprep.subr.bf16.mxu0 %v6126_v29  ;;  %972 = vmatprep.subr.bf16.mxu1 %v6129_v30  ;;  %v6146_v47 = vld [vmem:[#allocation5 + $0xe0] ss:$16 sps:$4 sm:$0xff]   ;;  %v6149_v48 = vld [vmem:[#allocation5 + $0xe8] ss:$16 sps:$4 sm:$0xff]   ;;  %v6152_v49 = vld [vmem:[%s7823_s2 + $0x4] ss:$16 sps:$4 sm:$0xff]  }
  0xb1   : > { %v6167_v50 = vld [vmem:[%s7823_s2 + $0xc] ss:$16 sps:$4 sm:$0xff]   ;;  %v6150_v56 = vld [vmem:[%s7823_s2] ss:$16 sps:$4 sm:$0xff]   ;;  %v6155_v57 = vld [vmem:[%s7823_s2 + $0x24] ss:$16 sps:$4 sm:$0xff]  }
  0xb2   : > { %529 = vperm.xlu1 %6101, %v496_v11   ;;  %526 = vperm.xlu0 %6100, %v495_v13   ;;  %v6165_v59 = vld [vmem:[%s7823_s2 + $0x8] ss:$16 sps:$4 sm:$0xff]   ;;  %v6170_v61 = vld [vmem:[%s7823_s2 + $0x2c] ss:$16 sps:$4 sm:$0xff]   ;;  %v6153_v62 = vld [vmem:[%s7823_s2 + $0x20] ss:$16 sps:$4 sm:$0xff]  }
  0xb3   : > { %860 = vmatpush1.bf16.msra.mxu0 %v6128_v33  ;;  %973 = vmatpush1.bf16.msra.mxu1 %v6131_v34  ;;  %v6158_v63 = vld [vmem:[%s7823_s2 + $0x44] ss:$16 sps:$4 sm:$0xff]   ;;  %v6168_v1 = vld [vmem:[%s7823_s2 + $0x28] ss:$16 sps:$4 sm:$0xff]   ;;  %v6156_v4 = vld [vmem:[%s7823_s2 + $0x40] ss:$16 sps:$4 sm:$0xff]  }
  0xb4   : > { %861 = vmatprep.subr.bf16.mxu0 %v6132_v35  ;;  %974 = vmatprep.subr.bf16.mxu1 %v6135_v36  ;;  %v6176_v5 = vld [vmem:[%s7823_s2 + $0x4c] ss:$16 sps:$4 sm:$0xff]   ;;  %v6161_v6 = vld [vmem:[%s7823_s2 + $0x64] ss:$16 sps:$4 sm:$0xff]   ;;  %v6174_v7 = vld [vmem:[%s7823_s2 + $0x48] ss:$16 sps:$4 sm:$0xff]  }
  0xb5   : > { %v6179_v8 = vld [vmem:[%s7823_s2 + $0x6c] ss:$16 sps:$4 sm:$0xff]   ;;  %v6159_v9 = vld [vmem:[%s7823_s2 + $0x60] ss:$16 sps:$4 sm:$0xff]   ;;  %v6164_v10 = vld [vmem:[%s7823_s2 + $0x84] ss:$16 sps:$4 sm:$0xff]  }
  0xb6   : > { %535 = vperm.xlu1 %6101, %v498_v19   ;;  %532 = vperm.xlu0 %6100, %v497_v20   ;;  %v6177_v11 = vld [vmem:[%s7823_s2 + $0x68] ss:$16 sps:$4 sm:$0xff]   ;;  %v6162_v14 = vld [vmem:[%s7823_s2 + $0x80] ss:$16 sps:$4 sm:$0xff]   ;;  %v6185_v15 = vld [vmem:[%s7823_s2 + $0x8c] ss:$16 sps:$4 sm:$0xff]  }
  0xb7   : > { %862 = vmatpush1.bf16.msra.mxu0 %v6134_v39  ;;  %975 = vmatpush1.bf16.msra.mxu1 %v6137_v40  ;;  %v6173_v16 = vld [vmem:[%s7823_s2 + $0xa4] ss:$16 sps:$4 sm:$0xff]   ;;  %v6183_v17 = vld [vmem:[%s7823_s2 + $0x88] ss:$16 sps:$4 sm:$0xff]   ;;  %v6188_v18 = vld [vmem:[%s7823_s2 + $0xac] ss:$16 sps:$4 sm:$0xff]  }
  0xb8   : > { %863 = vmatprep.subr.bf16.mxu0 %v6138_v41  ;;  %976 = vmatprep.subr.bf16.mxu1 %v6141_v42  ;;  %v6171_v19 = vld [vmem:[%s7823_s2 + $0xa0] ss:$16 sps:$4 sm:$0xff]   ;;  %v6182_v22 = vld [vmem:[%s7823_s2 + $0xc4] ss:$16 sps:$4 sm:$0xff]   ;;  %v6186_v23 = vld [vmem:[%s7823_s2 + $0xa8] ss:$16 sps:$4 sm:$0xff]  }
  0xb9   : > { %v6180_v24 = vld [vmem:[%s7823_s2 + $0xc0] ss:$16 sps:$4 sm:$0xff]   ;;  %v6192_v27 = vld [vmem:[%s7823_s2 + $0xc8] ss:$16 sps:$4 sm:$0xff]   ;;  %v6197_v28 = vld [vmem:[%s7823_s2 + $0xec] ss:$16 sps:$4 sm:$0xff]  }
  0xba   : > { %541 = vperm.xlu1 %6101, %v500_v25   ;;  %538 = vperm.xlu0 %6100, %v499_v26   ;;  %v6194_v25 = vld [vmem:[%s7823_s2 + $0xcc] ss:$16 sps:$4 sm:$0xff]   ;;  %v6191_v26 = vld [vmem:[%s7823_s2 + $0xe4] ss:$16 sps:$4 sm:$0xff]   ;;  %v6189_v30 = vld [vmem:[%s7823_s2 + $0xe0] ss:$16 sps:$4 sm:$0xff]  }
  0xbb   : > { %864 = vmatpush1.bf16.msra.mxu0 %v6140_v43  ;;  %977 = vmatpush1.bf16.msra.mxu1 %v6143_v44  ;;  %v6195_v33 = vld [vmem:[%s7823_s2 + $0xe8] ss:$16 sps:$4 sm:$0xff]   ;;  %v6208_v34 = vld [vmem:[#allocation7 + $0x4] ss:$16 sps:$4 sm:$0xff]   ;;  %v6211_v35 = vld [vmem:[#allocation7 + $0xc] ss:$16 sps:$4 sm:$0xff]  }
  0xbc   : > { %865 = vmatprep.subr.bf16.mxu0 %v6144_v45  ;;  %978 = vmatprep.subr.bf16.mxu1 %v6147_v46  ;;  %v6198_v40 = vld [vmem:[%s7146_s30] sm:$0xff]   ;;  %v6209_v42 = vld [vmem:[#allocation7 + $0x8] ss:$16 sps:$4 sm:$0xff]   ;;  %v6217_v44 = vld [vmem:[#allocation7 + $0x2c] ss:$16 sps:$4 sm:$0xff]  }
  0xbd   : > { %v6206_v41 = vld [vmem:[#allocation7] ss:$16 sps:$4 sm:$0xff]   ;;  %v6214_v43 = vld [vmem:[#allocation7 + $0x24] ss:$16 sps:$4 sm:$0xff]   ;;  %v6215_v46 = vld [vmem:[#allocation7 + $0x28] ss:$16 sps:$4 sm:$0xff]  }
  0xbe   : > { %547 = vperm.xlu1 %6101, %v502_v31   ;;  %544 = vperm.xlu0 %6100, %v501_v32   ;;  %v6212_v45 = vld [vmem:[#allocation7 + $0x20] ss:$16 sps:$4 sm:$0xff]   ;;  %v6275_v29 = vld [vmem:[#allocation7 + $0x168] ss:$16 sps:$4 sm:$0xff]  }
  0xbf   : > { %866 = vmatpush1.bf16.msra.mxu0 %v6146_v47  ;;  %979 = vmatpush1.bf16.msra.mxu1 %v6149_v48  ;;  %v6220_v47 = vld [vmem:[#allocation7 + $0x44] ss:$16 sps:$4 sm:$0xff]   ;;  %v6223_v48 = vld [vmem:[#allocation7 + $0x4c] ss:$16 sps:$4 sm:$0xff]  }
  0xc0   : > { %1285 = vmatprep.subr.bf16.mxu0 %v6152_v49  ;;  %1398 = vmatprep.subr.bf16.mxu1 %v6167_v50  ;;  %v6199_v49 = vld [vmem:[%s7146_s30 + $0x8] sm:$0xff]   ;;  %v6218_v50 = vld [vmem:[#allocation7 + $0x40] ss:$16 sps:$4 sm:$0xff]  }
  0xc2   : > { %553 = vperm.xlu1 %6101, %v504_v37   ;;  %550 = vperm.xlu0 %6100, %v503_v38  }
 0x125   : > { %v509_v52 = vpop.permute.xlu0 %508  ;;  %v515_v53 = vpop.permute.xlu1 %514 }
 0x126   : > { %vm555_vm1 = vcmp.eq.s32.totalorder %v509_v52, %v7193_v54  ;;  %vm557_vm3 = vcmp.eq.s32.totalorder %v515_v53, %v7193_v54  ;;  %v6221_v52 = vld [vmem:[#allocation7 + $0x48] ss:$16 sps:$4 sm:$0xff]   ;;  %v6226_v53 = vld [vmem:[#allocation7 + $0x64] ss:$16 sps:$4 sm:$0xff]  }
 0x129   : > { %v512_v55 = vpop.permute.xlu0 %511  ;;  %v518_v58 = vpop.permute.xlu1 %517 }
 0x12a   : > { %vm556_vm0 = vcmp.eq.s32.totalorder %v512_v55, %v7193_v54  ;;  %vm558_vm4 = vcmp.eq.s32.totalorder %v518_v58, %v7193_v54  ;;  %v6224_v55 = vld [vmem:[#allocation7 + $0x60] ss:$16 sps:$4 sm:$0xff]   ;;  %v6235_v58 = vld [vmem:[#allocation7 + $0x8c] ss:$16 sps:$4 sm:$0xff]  }
 0x12b   : > { %vm5110_vm2 = vmpackc.low %vm556_vm0, %vm555_vm1 }
 0x12c   : > { %5111 = vmatmul.mubr.msk.bf16.vlgmr.msra.gmra.mrb[0].mxu0 %vm5110_vm2, %v6850_v60  ;;  %5127 = vmatmul.mubr.msk.bf16.vlgmr.msra.gmra.mrb[0].mxu1 %vm5110_vm2, %v6850_v60  ;;  %vm5112_vm5 = vmpackc.low %vm558_vm4, %vm557_vm3 }
 0x12d   : > { %1286 = vmatpush1.bf16.msra.mxu0 %v6150_v56  ;;  %893 = vmatprep.mubr.bf16.mxu0 %v6849_v0  ;;  %v524_v2 = vpop.permute.xlu1 %523  ;;  %v521_v3 = vpop.permute.xlu0 %520  ;;  %v6227_v56 = vld [vmem:[#allocation7 + $0x68] ss:$16 sps:$4 sm:$0xff]  }
 0x12e   : > { %1006 = vmatprep.mubr.bf16.mxu1 %v6849_v0  ;;  %1287 = vmatprep.subr.bf16.mxu0 %v6155_v57  ;;  %vm560_vm6 = vcmp.eq.s32.totalorder %v524_v2, %v7193_v54  ;;  %vm559_vm7 = vcmp.eq.s32.totalorder %v521_v3, %v7193_v54  ;;  %v6232_v57 = vld [vmem:[#allocation7 + $0x84] ss:$16 sps:$4 sm:$0xff]   ;;  %v6239_v2 = vld [vmem:[#allocation7 + $0xa8] ss:$16 sps:$4 sm:$0xff]  }
 0x12f   : > { %1399 = vmatpush1.bf16.msra.mxu1 %v6165_v59  ;;  %vm5114_vm8 = vmpackc.low %vm560_vm6, %vm559_vm7  ;;  %v6200_v59 = vld [vmem:[%s7146_s30 + $0x10] sm:$0xff]  }
 0x130   : > { %1400 = vmatprep.subr.bf16.mxu1 %v6170_v61  ;;  %v6233_v61 = vld [vmem:[#allocation7 + $0x88] ss:$16 sps:$4 sm:$0xff]   ;;  %v6244_v3 = vld [vmem:[#allocation7 + $0xc4] ss:$16 sps:$4 sm:$0xff]  }
 0x131   : > { %1288 = vmatpush1.bf16.msra.mxu0 %v6153_v62  ;;  %v530_v12 = vpop.permute.xlu1 %529  ;;  %v527_v13 = vpop.permute.xlu0 %526  ;;  %v6238_v62 = vld [vmem:[#allocation7 + $0xa4] ss:$16 sps:$4 sm:$0xff]  }
 0x132   : > { %1289 = vmatprep.subr.bf16.mxu0 %v6158_v63  ;;  %vm562_vm9 = vcmp.eq.s32.totalorder %v530_v12, %v7193_v54  ;;  %vm561_vm10 = vcmp.eq.s32.totalorder %v527_v13, %v7193_v54  ;;  %v6241_v63 = vld [vmem:[#allocation7 + $0xac] ss:$16 sps:$4 sm:$0xff]   ;;  %v6256_v12 = vld [vmem:[#allocation7 + $0x104] ss:$16 sps:$4 sm:$0xff]  }
 0x133   : > { %1401 = vmatpush1.bf16.msra.mxu1 %v6168_v1  ;;  %vm5116_vm13 = vmpackc.low %vm562_vm9, %vm561_vm10  ;;  %v6236_v1 = vld [vmem:[#allocation7 + $0xa0] ss:$16 sps:$4 sm:$0xff]   ;;  %v6259_v13 = vld [vmem:[#allocation7 + $0x10c] ss:$16 sps:$4 sm:$0xff]  }
 0x134   : > { %5113 = vmatmul.mubr.msk.bf16.gmra.mrb[4].mxu0 %vm5112_vm5, %v6850_v60  ;;  %5129 = vmatmul.mubr.msk.bf16.gmra.mrb[4].mxu1 %vm5112_vm5, %v6850_v60 }
 0x135   : > { %903 = vmatprep.mubr.bf16.mxu0 %v6849_v0  ;;  %1016 = vmatprep.mubr.bf16.mxu1 %v6849_v0  ;;  %v536_v20 = vpop.permute.xlu1 %535  ;;  %v533_v21 = vpop.permute.xlu0 %532 }
 0x136   : > { %1290 = vmatpush1.bf16.msra.mxu0 %v6156_v4  ;;  %1402 = vmatprep.subr.bf16.mxu1 %v6176_v5  ;;  %vm564_vm11 = vcmp.eq.s32.totalorder %v536_v20, %v7193_v54  ;;  %vm563_vm12 = vcmp.eq.s32.totalorder %v533_v21, %v7193_v54  ;;  %v6247_v4 = vld [vmem:[#allocation7 + $0xcc] ss:$16 sps:$4 sm:$0xff]   ;;  %v6263_v20 = vld [vmem:[#allocation7 + $0x128] ss:$16 sps:$4 sm:$0xff]   ;;  %v6268_v21 = vld [vmem:[#allocation7 + $0x144] ss:$16 sps:$4 sm:$0xff]  }
 0x137   : > { %1291 = vmatprep.subr.bf16.mxu0 %v6161_v6  ;;  %1403 = vmatpush1.bf16.msra.mxu1 %v6174_v7  ;;  %vm7301_vm14 = vmpackc.low %vm564_vm11, %vm563_vm12  ;;  %v6201_v5 = vld [vmem:[%s7146_s30 + $0x18] sm:$0xff]   ;;  %v6242_v6 = vld [vmem:[#allocation7 + $0xc0] ss:$16 sps:$4 sm:$0xff]  }
 0x138   : > { %1404 = vmatprep.subr.bf16.mxu1 %v6179_v8  ;;  %v6245_v7 = vld [vmem:[#allocation7 + $0xc8] ss:$16 sps:$4 sm:$0xff]   ;;  %v6250_v8 = vld [vmem:[#allocation7 + $0xe4] ss:$16 sps:$4 sm:$0xff]  }
 0x139   : > { %v542_v31 = vpop.permute.xlu1 %541  ;;  %v539_v32 = vpop.permute.xlu0 %538 }
 0x13a   : > { %1292 = vmatpush1.bf16.msra.mxu0 %v6159_v9  ;;  %vm566_vm15 = vcmp.eq.s32.totalorder %v542_v31, %v7193_v54  ;;  %vm565_vm0 = vcmp.eq.s32.totalorder %v539_v32, %v7193_v54  ;;  %v6253_v9 = vld [vmem:[#allocation7 + $0xec] ss:$16 sps:$4 sm:$0xff]   ;;  %v6204_v32 = vld [vmem:[%s7146_s30 + $0x30] sm:$0xff]  }
 0x13b   : > { %1293 = vmatprep.subr.bf16.mxu0 %v6164_v10  ;;  %1405 = vmatpush1.bf16.msra.mxu1 %v6177_v11  ;;  %vm5120_vm1 = vmpackc.low %vm566_vm15, %vm565_vm0  ;;  %v6248_v10 = vld [vmem:[#allocation7 + $0xe0] ss:$16 sps:$4 sm:$0xff]   ;;  %v6251_v11 = vld [vmem:[#allocation7 + $0xe8] ss:$16 sps:$4 sm:$0xff]  }
 0x13c   : > { %5115 = vmatmul.mubr.msk.bf16.gmra.mrb[8].mxu0 %vm5114_vm8, %v6850_v60  ;;  %5131 = vmatmul.mubr.msk.bf16.gmra.mrb[8].mxu1 %vm5114_vm8, %v6850_v60  ;;  %v6283_v31 = vld [vmem:[#allocation7 + $0x18c] ss:$16 sps:$4 sm:$0xff]  }
 0x13d   : > { %913 = vmatprep.mubr.bf16.mxu0 %v6849_v0  ;;  %1026 = vmatprep.mubr.bf16.mxu1 %v6849_v0  ;;  %v548_v36 = vpop.permute.xlu1 %547  ;;  %v545_v37 = vpop.permute.xlu0 %544 }
 0x13e   : > { %1294 = vmatpush1.bf16.msra.mxu0 %v6162_v14  ;;  %1406 = vmatprep.subr.bf16.mxu1 %v6185_v15  ;;  %vm568_vm2 = vcmp.eq.s32.totalorder %v548_v36, %v7193_v54  ;;  %vm567_vm3 = vcmp.eq.s32.totalorder %v545_v37, %v7193_v54  ;;  %v6202_v14 = vld [vmem:[%s7146_s30 + $0x20] sm:$0xff]   ;;  %v6289_v37 = vld [vmem:[#allocation7 + $0x1ac] ss:$16 sps:$4 sm:$0xff]  }
 0x13f   : > { %1295 = vmatprep.subr.bf16.mxu0 %v6173_v16  ;;  %1407 = vmatpush1.bf16.msra.mxu1 %v6183_v17  ;;  %vm5122_vm4 = vmpackc.low %vm568_vm2, %vm567_vm3  ;;  %v6254_v15 = vld [vmem:[#allocation7 + $0x100] ss:$16 sps:$4 sm:$0xff]   ;;  %v6257_v16 = vld [vmem:[#allocation7 + $0x108] ss:$16 sps:$4 sm:$0xff]  }
 0x140   : > { %1408 = vmatprep.subr.bf16.mxu1 %v6188_v18  ;;  %v6262_v17 = vld [vmem:[#allocation7 + $0x124] ss:$16 sps:$4 sm:$0xff]   ;;  %v6265_v18 = vld [vmem:[#allocation7 + $0x12c] ss:$16 sps:$4 sm:$0xff]  }
 0x141   : > { %v554_v38 = vpop.permute.xlu1 %553  ;;  %v551_v39 = vpop.permute.xlu0 %550  ;;  %v6286_v36 = vld [vmem:[#allocation7 + $0x1a4] ss:$16 sps:$4 sm:$0xff]  }
 0x142   : > { %1296 = vmatpush1.bf16.msra.mxu0 %v6171_v19  ;;  %vm570_vm5 = vcmp.eq.s32.totalorder %v554_v38, %v7193_v54  ;;  %vm569_vm6 = vcmp.eq.s32.totalorder %v551_v39, %v7193_v54  ;;  %v6229_v54 = vld [vmem:[#allocation7 + $0x6c] ss:$16 sps:$4 sm:$0xff]   ;;  %v6260_v19 = vld [vmem:[#allocation7 + $0x120] ss:$16 sps:$4 sm:$0xff]   ;;  %v6287_v39 = vld [vmem:[#allocation7 + $0x1a8] ss:$16 sps:$4 sm:$0xff]  }
 0x143   : > { %1297 = vmatprep.subr.bf16.mxu0 %v6182_v22  ;;  %1409 = vmatpush1.bf16.msra.mxu1 %v6186_v23  ;;  %vm5124_vm7 = vmpackc.low %vm570_vm5, %vm569_vm6  ;;  %v6271_v22 = vld [vmem:[#allocation7 + $0x14c] ss:$16 sps:$4 sm:$0xff]   ;;  %v6284_v38 = vld [vmem:[#allocation7 + $0x1a0] ss:$16 sps:$4 sm:$0xff]  }
 0x144   : > { %5117 = vmatmul.mubr.msk.bf16.gmra.mrb[12].mxu0 %vm5116_vm13, %v6850_v60  ;;  %5133 = vmatmul.mubr.msk.bf16.gmra.mrb[12].mxu1 %vm5116_vm13, %v6850_v60  ;;  %v6203_v23 = vld [vmem:[%s7146_s30 + $0x28] sm:$0xff]  }
 0x145   : > { %923 = vmatprep.mubr.bf16.mxu0 %v6849_v0  ;;  %1036 = vmatprep.mubr.bf16.mxu1 %v6849_v0 }
 0x146   : > { %1298 = vmatpush1.bf16.msra.mxu0 %v6180_v24  ;;  %1410 = vmatprep.subr.bf16.mxu1 %v6194_v25  ;;  %v6266_v24 = vld [vmem:[#allocation7 + $0x140] ss:$16 sps:$4 sm:$0xff]   ;;  %v6269_v25 = vld [vmem:[#allocation7 + $0x148] ss:$16 sps:$4 sm:$0xff]  }
 0x147   : > { %1299 = vmatprep.subr.bf16.mxu0 %v6191_v26  ;;  %1411 = vmatpush1.bf16.msra.mxu1 %v6192_v27  ;;  %v6274_v26 = vld [vmem:[#allocation7 + $0x164] ss:$16 sps:$4 sm:$0xff]   ;;  %v6277_v27 = vld [vmem:[#allocation7 + $0x16c] ss:$16 sps:$4 sm:$0xff]  }
 0x148   : > { %1412 = vmatprep.subr.bf16.mxu1 %v6197_v28  ;;  %v6272_v28 = vld [vmem:[#allocation7 + $0x160] ss:$16 sps:$4 sm:$0xff]  }
 0x14a   : > { %1300 = vmatpush1.bf16.msra.mxu0 %v6189_v30  ;;  %v6280_v30 = vld [vmem:[#allocation7 + $0x184] ss:$16 sps:$4 sm:$0xff]  }
 0x14b   : > { %1413 = vmatpush1.bf16.msra.mxu1 %v6195_v33  ;;  %2483 = vmatprep.subr.bf16.mxu0 %v6208_v34  ;;  %v6278_v33 = vld [vmem:[#allocation7 + $0x180] ss:$16 sps:$4 sm:$0xff]   ;;  %v6281_v34 = vld [vmem:[#allocation7 + $0x188] ss:$16 sps:$4 sm:$0xff]  }
 0x14c   : > { %5119 = vmatmul.mubr.msk.bf16.gmra.mrb[16].mxu0 %vm7301_vm14, %v6850_v60  ;;  %5135 = vmatmul.mubr.msk.bf16.gmra.mrb[16].mxu1 %vm7301_vm14, %v6850_v60 }
 0x14d   : > { %933 = vmatprep.mubr.bf16.mxu0 %v6849_v0  ;;  %1046 = vmatprep.mubr.bf16.mxu1 %v6849_v0 }
 0x14e   : > { %2709 = vmatprep.subr.bf16.mxu1 %v6211_v35  ;;  %v6205_v35 = vld [vmem:[%s7146_s30 + $0x38] sm:$0xff]  }
 0x154   : > { %5121 = vmatmul.mubr.msk.bf16.gmra.mrb[20].mxu0 %vm5120_vm1, %v6850_v60  ;;  %5137 = vmatmul.mubr.msk.bf16.gmra.mrb[20].mxu1 %vm5120_vm1, %v6850_v60 }
 0x155   : > { %943 = vmatprep.mubr.bf16.mxu0 %v6849_v0  ;;  %1056 = vmatprep.mubr.bf16.mxu1 %v6849_v0 }
 0x15c   : > { %5123 = vmatmul.mubr.msk.bf16.gmra.mrb[24].mxu0 %vm5122_vm4, %v6850_v60  ;;  %5139 = vmatmul.mubr.msk.bf16.gmra.mrb[24].mxu1 %vm5122_vm4, %v6850_v60 }
 0x15d   : > { %953 = vmatprep.mubr.bf16.mxu0 %v6849_v0  ;;  %1066 = vmatprep.mubr.bf16.mxu1 %v6849_v0 }
 0x164   : > { %5125 = vmatmul.mubr.msk.bf16.gmra.mrb[28].mxu0 %vm5124_vm7, %v6850_v60  ;;  %5141 = vmatmul.mubr.msk.bf16.gmra.mrb[28].mxu1 %vm5124_vm7, %v6850_v60  ;;  %v6230_v60 = vld [vmem:[#allocation7 + $0x80] ss:$16 sps:$4 sm:$0xff]  }
 0x165   : > { %1317 = vmatprep.mubr.bf16.mxu0 %v6849_v0  ;;  %1430 = vmatprep.mubr.bf16.mxu1 %v6849_v0 }
 0x16c   : > { %1318 = vmatmul.mubr.bf16.vlgmr.msra.gmra.mrb[0].mxu0 %v6198_v40  ;;  %1431 = vmatmul.mubr.bf16.vlgmr.msra.gmra.mrb[0].mxu1 %v6198_v40  ;;  %v6292_v40 = vld [vmem:[#allocation7 + $0x1c4] ss:$16 sps:$4 sm:$0xff]  }
 0x16d   : > { %1327 = vmatprep.mubr.bf16.mxu0 %v6849_v0  ;;  %1440 = vmatprep.mubr.bf16.mxu1 %v6849_v0 }
 0x16e   : > { %2484 = vmatpush1.bf16.msra.mxu0 %v6206_v41  ;;  %2710 = vmatpush1.bf16.msra.mxu1 %v6209_v42  ;;  %v6295_v41 = vld [vmem:[#allocation7 + $0x1cc] ss:$16 sps:$4 sm:$0xff]   ;;  %v6290_v42 = vld [vmem:[#allocation7 + $0x1c0] ss:$16 sps:$4 sm:$0xff]  }
 0x16f   : > { %2485 = vmatprep.subr.bf16.mxu0 %v6214_v43  ;;  %2711 = vmatprep.subr.bf16.mxu1 %v6217_v44  ;;  %v6293_v43 = vld [vmem:[#allocation7 + $0x1c8] ss:$16 sps:$4 sm:$0xff]   ;;  %v6301_v44 = vld [vmem:[#allocation7 + $0x1ec] ss:$16 sps:$4 sm:$0xff]  }
 0x172   : > { %2486 = vmatpush1.bf16.msra.mxu0 %v6212_v45  ;;  %2712 = vmatpush1.bf16.msra.mxu1 %v6215_v46  ;;  %v6296_v45 = vld [vmem:[#allocation7 + $0x1e0] ss:$16 sps:$4 sm:$0xff]   ;;  %v6299_v46 = vld [vmem:[#allocation7 + $0x1e8] ss:$16 sps:$4 sm:$0xff]  }
 0x173   : > { %2487 = vmatprep.subr.bf16.mxu0 %v6220_v47  ;;  %2713 = vmatprep.subr.bf16.mxu1 %v6223_v48  ;;  %v6304_v47 = vld [vmem:[#allocation7 + $0x204] ss:$16 sps:$4 sm:$0xff]   ;;  %v6307_v48 = vld [vmem:[#allocation7 + $0x20c] ss:$16 sps:$4 sm:$0xff]  }
 0x174   : > { %1328 = vmatmul.mubr.bf16.gmra.mrb[4].mxu0 %v6199_v49  ;;  %1441 = vmatmul.mubr.bf16.gmra.mrb[4].mxu1 %v6199_v49  ;;  %v1514_v49 = vshrl.u32 %v505_v51, 7 }
 0x175   : > { %1337 = vmatprep.mubr.bf16.mxu0 %v6849_v0  ;;  %1450 = vmatprep.mubr.bf16.mxu1 %v6849_v0 }
 0x176   : > { %2488 = vmatpush1.bf16.msra.mxu0 %v6218_v50  ;;  %2714 = vmatpush1.bf16.msra.mxu1 %v6221_v52  ;;  %v7364_v50 = vsub.s32 2, %v1514_v49  ;;  %v1511_v52 = vld [vmem:[%s7825_s4] sm:$0xf] }
 0x177   : > { %2489 = vmatprep.subr.bf16.mxu0 %v6226_v53  ;;  %2715 = vmatprep.subr.bf16.mxu1 %v6229_v54  ;;  %v7369_v53 = vsub.s32 0, %v1514_v49  ;;  %v7371_v54 = vsub.s32 1, %v1514_v49 }
 0x17a   : > { %2490 = vmatpush1.bf16.msra.mxu0 %v6224_v55  ;;  %2716 = vmatpush1.bf16.msra.mxu1 %v6227_v56  ;;  %v7373_v55 = vsub.s32 3, %v1514_v49  ;;  %v7376_v56 = vrot.slane %v1511_v52, %v7364_v50 }
 0x17b   : > { %2491 = vmatprep.subr.bf16.mxu0 %v6232_v57  ;;  %2717 = vmatprep.subr.bf16.mxu1 %v6235_v58  ;;  %v7379_v57 = vrot.slane %v1511_v52, %v7369_v53 }
 0x17c   : > { %1338 = vmatmul.mubr.bf16.gmra.mrb[8].mxu0 %v6200_v59  ;;  %1451 = vmatmul.mubr.bf16.gmra.mrb[8].mxu1 %v6200_v59  ;;  %v7382_v59 = vrot.slane %v1511_v52, %v7371_v54 }
 0x17d   : > { %1347 = vmatprep.mubr.bf16.mxu0 %v6849_v0  ;;  %1460 = vmatprep.mubr.bf16.mxu1 %v6849_v0 }
 0x17e   : > { %2492 = vmatpush1.bf16.msra.mxu0 %v6230_v60  ;;  %2718 = vmatpush1.bf16.msra.mxu1 %v6233_v61  ;;  %v7385_v60 = vrot.slane %v1511_v52, %v7373_v55 }
 0x17f   : > { %2493 = vmatprep.subr.bf16.mxu0 %v6238_v62  ;;  %2719 = vmatprep.subr.bf16.mxu1 %v6241_v63 }
 0x182   : > { %2494 = vmatpush1.bf16.msra.mxu0 %v6236_v1  ;;  %2720 = vmatpush1.bf16.msra.mxu1 %v6239_v2 }
 0x183   : > { %2495 = vmatprep.subr.bf16.mxu0 %v6244_v3  ;;  %2721 = vmatprep.subr.bf16.mxu1 %v6247_v4 }
 0x184   : > { %1348 = vmatmul.mubr.bf16.gmra.mrb[12].mxu0 %v6201_v5  ;;  %1461 = vmatmul.mubr.bf16.gmra.mrb[12].mxu1 %v6201_v5 }
 0x185   : > { %1357 = vmatprep.mubr.bf16.mxu0 %v6849_v0  ;;  %1470 = vmatprep.mubr.bf16.mxu1 %v6849_v0 }
 0x186   : > { %2496 = vmatpush1.bf16.msra.mxu0 %v6242_v6  ;;  %2722 = vmatpush1.bf16.msra.mxu1 %v6245_v7 }
 0x187   : > { %2497 = vmatprep.subr.bf16.mxu0 %v6250_v8  ;;  %2723 = vmatprep.subr.bf16.mxu1 %v6253_v9 }
 0x18a   : > { %2498 = vmatpush1.bf16.msra.mxu0 %v6248_v10  ;;  %2724 = vmatpush1.bf16.msra.mxu1 %v6251_v11 }
 0x18b   : > { %2499 = vmatprep.subr.bf16.mxu0 %v6256_v12  ;;  %2725 = vmatprep.subr.bf16.mxu1 %v6259_v13 }
 0x18c   : > { %1358 = vmatmul.mubr.bf16.gmra.mrb[16].mxu0 %v6202_v14  ;;  %1471 = vmatmul.mubr.bf16.gmra.mrb[16].mxu1 %v6202_v14 }
 0x18d   : > { %1367 = vmatprep.mubr.bf16.mxu0 %v6849_v0  ;;  %1480 = vmatprep.mubr.bf16.mxu1 %v6849_v0 }
 0x18e   : > { %2500 = vmatpush1.bf16.msra.mxu0 %v6254_v15  ;;  %2726 = vmatpush1.bf16.msra.mxu1 %v6257_v16 }
 0x18f   : > { %2501 = vmatprep.subr.bf16.mxu0 %v6262_v17  ;;  %2727 = vmatprep.subr.bf16.mxu1 %v6265_v18 }
 0x192   : > { %2502 = vmatpush1.bf16.msra.mxu0 %v6260_v19  ;;  %2728 = vmatpush1.bf16.msra.mxu1 %v6263_v20 }
 0x193   : > { %2503 = vmatprep.subr.bf16.mxu0 %v6268_v21  ;;  %2729 = vmatprep.subr.bf16.mxu1 %v6271_v22 }
 0x194   : > { %1368 = vmatmul.mubr.bf16.gmra.mrb[20].mxu0 %v6203_v23  ;;  %1481 = vmatmul.mubr.bf16.gmra.mrb[20].mxu1 %v6203_v23 }
 0x195   : > { %1377 = vmatprep.mubr.bf16.mxu0 %v6849_v0  ;;  %1490 = vmatprep.mubr.bf16.mxu1 %v6849_v0 }
 0x196   : > { %2504 = vmatpush1.bf16.msra.mxu0 %v6266_v24  ;;  %2730 = vmatpush1.bf16.msra.mxu1 %v6269_v25 }
 0x197   : > { %2505 = vmatprep.subr.bf16.mxu0 %v6274_v26  ;;  %2731 = vmatprep.subr.bf16.mxu1 %v6277_v27  ;;  %v6302_v27 = vld [vmem:[#allocation7 + $0x200] ss:$16 sps:$4 sm:$0xff]  }
 0x19a   : > { %2506 = vmatpush1.bf16.msra.mxu0 %v6272_v28  ;;  %2732 = vmatpush1.bf16.msra.mxu1 %v6275_v29  ;;  %v6305_v28 = vld [vmem:[#allocation7 + $0x208] ss:$16 sps:$4 sm:$0xff]  }
 0x19b   : > { %2507 = vmatprep.subr.bf16.mxu0 %v6280_v30  ;;  %2733 = vmatprep.subr.bf16.mxu1 %v6283_v31 }
 0x19c   : > { %1378 = vmatmul.mubr.bf16.gmra.mrb[24].mxu0 %v6204_v32  ;;  %1491 = vmatmul.mubr.bf16.gmra.mrb[24].mxu1 %v6204_v32 }
 0x19d   : > { %1387 = vmatprep.mubr.bf16.mxu0 %v6849_v0  ;;  %1500 = vmatprep.mubr.bf16.mxu1 %v6849_v0  ;;  %v6298_v0 = vld [vmem:[#allocation7 + $0x1e4] ss:$16 sps:$4 sm:$0xff]  }
 0x19e   : > { %2508 = vmatpush1.bf16.msra.mxu0 %v6278_v33  ;;  %2734 = vmatpush1.bf16.msra.mxu1 %v6281_v34 }
 0x19f   : > { %2509 = vmatprep.subr.bf16.mxu0 %v6286_v36  ;;  %2735 = vmatprep.subr.bf16.mxu1 %v6289_v37  ;;  %v6313_v36 = vld [vmem:[#allocation7 + $0x22c] ss:$16 sps:$4 sm:$0xff]  }
 0x1a2   : > { %2510 = vmatpush1.bf16.msra.mxu0 %v6284_v38  ;;  %2736 = vmatpush1.bf16.msra.mxu1 %v6287_v39 }
 0x1a3   : > { %2511 = vmatprep.subr.bf16.mxu0 %v6292_v40  ;;  %2737 = vmatprep.subr.bf16.mxu1 %v6295_v41 }
 0x1a4   : > { %1388 = vmatmul.mubr.bf16.gmra.mrb[28].mxu0 %v6205_v35  ;;  %1501 = vmatmul.mubr.bf16.gmra.mrb[28].mxu1 %v6205_v35  ;;  %v6310_v35 = vld [vmem:[#allocation7 + $0x224] ss:$16 sps:$4 sm:$0xff]  }
 0x1a6   : > { %2512 = vmatpush1.bf16.msra.mxu0 %v6290_v42  ;;  %2738 = vmatpush1.bf16.msra.mxu1 %v6293_v43 }
 0x1a7   : > { %2513 = vmatprep.subr.bf16.mxu0 %v6298_v0  ;;  %2739 = vmatprep.subr.bf16.mxu1 %v6301_v44  ;;  %v6308_v0 = vld [vmem:[#allocation7 + $0x220] ss:$16 sps:$4 sm:$0xff]   ;;  %v6311_v44 = vld [vmem:[#allocation7 + $0x228] ss:$16 sps:$4 sm:$0xff]  }
 0x1aa   : > { %2514 = vmatpush1.bf16.msra.mxu0 %v6296_v45  ;;  %2740 = vmatpush1.bf16.msra.mxu1 %v6299_v46  ;;  %v6316_v46 = vld [vmem:[#allocation7 + $0x244] ss:$16 sps:$4 sm:$0xff]  }
 0x1ab   : > { %2596 = vmatprep.subr.bf16.mxu0 %v6304_v47  ;;  %2822 = vmatprep.subr.bf16.mxu1 %v6307_v48  ;;  %v6319_v47 = vld [vmem:[#allocation7 + $0x24c] ss:$16 sps:$4 sm:$0xff]  }
 0x23f   : > { %v1319_v58 = vpop.f32.mrb[0].mxu0  ;;  %v1432_v51 = vpop.f32.mrb[0].mxu1 }
 0x240   : > { %v1535_v61 = vadd.f32 %v7376_v56, %v1432_v51  ;;  %v1321_v62 = vpop.f32.mrb[1].mxu0  ;;  %v1434_v63 = vpop.f32.mrb[1].mxu1  ;;  %v1533_v3 = vadd.f32 %v7379_v57, %v1319_v58 }
 0x241   : > { %v1323_v1 = vpop.f32.mrb[2].mxu0  ;;  %v1436_v2 = vpop.f32.mrb[2].mxu1  ;;  %v1534_v8 = vadd.f32 %v7382_v59, %v1321_v62  ;;  %v1536_v9 = vadd.f32 %v7385_v60, %v1434_v63 }
 0x242   : > { %v1537_v4 = vadd.f32 %v7379_v57, %v1323_v1  ;;  %v1539_v5 = vadd.f32 %v7376_v56, %v1436_v2  ;;  %v1325_v6 = vpop.f32.mrb[3].mxu0  ;;  %v1438_v7 = vpop.f32.mrb[3].mxu1 }
 0x243   : > { %v1538_v10 = vadd.f32 %v7382_v59, %v1325_v6  ;;  %v1540_v11 = vadd.f32 %v7385_v60, %v1438_v7 }
 0x244   : > { %v1597_v12 = vpack.c.bf16 %v1537_v4, %v1533_v3  ;;  %v7395_v13 = vpack.c.bf16 %v1539_v5, %v1535_v61  ;;  %v6314_v3 = vld [vmem:[#allocation7 + $0x240] ss:$16 sps:$4 sm:$0xff]   ;;  %v6317_v5 = vld [vmem:[#allocation7 + $0x248] ss:$16 sps:$4 sm:$0xff]  }
 0x245   : > { %v1598_v14 = vpack.c.bf16 %v1538_v10, %v1534_v8  ;;  %v7397_v15 = vpack.c.bf16 %v1540_v11, %v1536_v9  ;;  %v6322_v11 = vld [vmem:[#allocation7 + $0x264] ss:$16 sps:$4 sm:$0xff]  }
 0x246   : > { %v1629_v16 = vmul.bf16 1045249613, %v1597_v12 }
 0x247   : > { %v1630_v17 = vmul.bf16 1045249613, %v1598_v14  ;;  %v1329_v18 = vpop.f32.mrb[4].mxu0  ;;  %v1442_v19 = vpop.f32.mrb[4].mxu1 }
 0x248   : > { %v1543_v20 = vadd.f32 %v7376_v56, %v1442_v19  ;;  %v1331_v21 = vpop.f32.mrb[5].mxu0  ;;  %v1444_v22 = vpop.f32.mrb[5].mxu1  ;;  %v1661_v23 = vmax.bf16 %v1629_v16, %v1597_v12  ;;  %v1541_v29 = vadd.f32 %v7379_v57, %v1329_v18  ;;  %v6325_v12 = vld [vmem:[#allocation7 + $0x26c] ss:$16 sps:$4 sm:$0xff]  }
 0x249   : > { %v1333_v24 = vpop.f32.mrb[6].mxu0  ;;  %v1446_v25 = vpop.f32.mrb[6].mxu1  ;;  %v1662_v26 = vmax.bf16 %v1630_v17, %v1598_v14  ;;  %v1542_v30 = vadd.f32 %v7382_v59, %v1331_v21  ;;  %v1544_v37 = vadd.f32 %v7385_v60, %v1444_v22  ;;  %v6320_v22 = vld [vmem:[#allocation7 + $0x260] ss:$16 sps:$4 sm:$0xff]  }
 0x24a   : > { %v1545_v31 = vadd.f32 %v7379_v57, %v1333_v24  ;;  %v1547_v32 = vadd.f32 %v7376_v56, %v1446_v25  ;;  %v1335_v33 = vpop.f32.mrb[7].mxu0  ;;  %v1448_v34 = vpop.f32.mrb[7].mxu1  ;;  %v6328_v25 = vld [vmem:[#allocation7 + $0x284] ss:$16 sps:$4 sm:$0xff]  }
 0x24b   : > { %v1546_v38 = vadd.f32 %v7382_v59, %v1335_v33  ;;  %v1548_v39 = vadd.f32 %v7385_v60, %v1448_v34  ;;  %2515 = vmatprep.mubr.bf16.mxu0 %v1662_v26  ;;  %2741 = vmatprep.mubr.bf16.mxu1 %v1662_v26  ;;  %v6331_v26 = vld [vmem:[#allocation7 + $0x28c] ss:$16 sps:$4 sm:$0xff]  }
 0x24c   : > { %v1601_v40 = vpack.c.bf16 %v1545_v31, %v1541_v29  ;;  %v7407_v41 = vpack.c.bf16 %v1547_v32, %v1543_v20  ;;  %2516 = vmatmul.mubr.bf16.vlgmr.msra.gmra.mrb[32].mxu0 %v1661_v23  ;;  %2742 = vmatmul.mubr.bf16.vlgmr.msra.gmra.mrb[32].mxu1 %v1661_v23  ;;  %v6323_v23 = vld [vmem:[#allocation7 + $0x268] ss:$16 sps:$4 sm:$0xff]  }
 0x24d   : > { %v1602_v42 = vpack.c.bf16 %v1546_v38, %v1542_v30  ;;  %v7409_v43 = vpack.c.bf16 %v1548_v39, %v1544_v37  ;;  %2597 = vmatpush1.bf16.msra.mxu0 %v6302_v27  ;;  %2823 = vmatpush1.bf16.msra.mxu1 %v6305_v28  ;;  %v6326_v37 = vld [vmem:[#allocation7 + $0x280] ss:$16 sps:$4 sm:$0xff]   ;;  %v6329_v39 = vld [vmem:[#allocation7 + $0x288] ss:$16 sps:$4 sm:$0xff]  }
 0x24e   : > { %v1633_v45 = vmul.bf16 1045249613, %v1601_v40  ;;  %2598 = vmatprep.subr.bf16.mxu0 %v6310_v35  ;;  %2824 = vmatprep.subr.bf16.mxu1 %v6313_v36 }
 0x24f   : > { %v1634_v48 = vmul.bf16 1045249613, %v1602_v42  ;;  %v1339_v49 = vpop.f32.mrb[8].mxu0  ;;  %v1452_v52 = vpop.f32.mrb[8].mxu1 }
 0x250   : > { %v1551_v58 = vadd.f32 %v7376_v56, %v1452_v52  ;;  %v1341_v51 = vpop.f32.mrb[9].mxu0  ;;  %v1454_v61 = vpop.f32.mrb[9].mxu1  ;;  %v1549_v62 = vadd.f32 %v7379_v57, %v1339_v49  ;;  %v1665_v4 = vmax.bf16 %v1633_v45, %v1601_v40 }
 0x251   : > { %2599 = vmatpush1.bf16.msra.mxu0 %v6308_v0  ;;  %v1343_v63 = vpop.f32.mrb[10].mxu0  ;;  %v1456_v1 = vpop.f32.mrb[10].mxu1  ;;  %2825 = vmatpush1.bf16.msra.mxu1 %v6311_v44  ;;  %v1666_v2 = vmax.bf16 %v1634_v48, %v1602_v42  ;;  %v1550_v6 = vadd.f32 %v7382_v59, %v1341_v51  ;;  %v1552_v14 = vadd.f32 %v7385_v60, %v1454_v61 }
 0x252   : > { %v1553_v7 = vadd.f32 %v7379_v57, %v1343_v63  ;;  %v1555_v8 = vadd.f32 %v7376_v56, %v1456_v1  ;;  %v1345_v9 = vpop.f32.mrb[11].mxu0  ;;  %v1458_v10 = vpop.f32.mrb[11].mxu1  ;;  %2600 = vmatprep.subr.bf16.mxu0 %v6316_v46  ;;  %2826 = vmatprep.subr.bf16.mxu1 %v6319_v47  ;;  %v6334_v46 = vld [vmem:[#allocation7 + $0x2a4] ss:$16 sps:$4 sm:$0xff]   ;;  %v6337_v47 = vld [vmem:[#allocation7 + $0x2ac] ss:$16 sps:$4 sm:$0xff]  }
 0x253   : > { %v1554_v16 = vadd.f32 %v7382_v59, %v1345_v9  ;;  %v1556_v17 = vadd.f32 %v7385_v60, %v1458_v10  ;;  %2525 = vmatprep.mubr.bf16.mxu0 %v1666_v2  ;;  %2751 = vmatprep.mubr.bf16.mxu1 %v1666_v2  ;;  %v6332_v63 = vld [vmem:[#allocation7 + $0x2a0] ss:$16 sps:$4 sm:$0xff]   ;;  %v6335_v1 = vld [vmem:[#allocation7 + $0x2a8] ss:$16 sps:$4 sm:$0xff]  }
 0x254   : > { %v1605_v18 = vpack.c.bf16 %v1553_v7, %v1549_v62  ;;  %v7419_v19 = vpack.c.bf16 %v1555_v8, %v1551_v58  ;;  %2526 = vmatmul.mubr.bf16.gmra.mrb[36].mxu0 %v1665_v4  ;;  %2752 = vmatmul.mubr.bf16.gmra.mrb[36].mxu1 %v1665_v4  ;;  %v6343_v4 = vld [vmem:[#allocation7 + $0x2cc] ss:$16 sps:$4 sm:$0xff]  }
 0x255   : > { %v1606_v20 = vpack.c.bf16 %v1554_v16, %v1550_v6  ;;  %v7421_v21 = vpack.c.bf16 %v1556_v17, %v1552_v14  ;;  %2601 = vmatpush1.bf16.msra.mxu0 %v6314_v3  ;;  %2827 = vmatpush1.bf16.msra.mxu1 %v6317_v5  ;;  %v6340_v3 = vld [vmem:[#allocation7 + $0x2c4] ss:$16 sps:$4 sm:$0xff]   ;;  %v6338_v17 = vld [vmem:[#allocation7 + $0x2c0] ss:$16 sps:$4 sm:$0xff]  }
 0x256   : > { %v1637_v24 = vmul.bf16 1045249613, %v1605_v18  ;;  %2602 = vmatprep.subr.bf16.mxu0 %v6322_v11  ;;  %2828 = vmatprep.subr.bf16.mxu1 %v6325_v12 }
 0x257   : > { %v1638_v27 = vmul.bf16 1045249613, %v1606_v20  ;;  %v1349_v28 = vpop.f32.mrb[12].mxu0  ;;  %v1462_v29 = vpop.f32.mrb[12].mxu1 }
 0x258   : > { %v1559_v30 = vadd.f32 %v7376_v56, %v1462_v29  ;;  %v1351_v31 = vpop.f32.mrb[13].mxu0  ;;  %v1464_v32 = vpop.f32.mrb[13].mxu1  ;;  %v1557_v33 = vadd.f32 %v7379_v57, %v1349_v28  ;;  %v1669_v38 = vmax.bf16 %v1637_v24, %v1605_v18  ;;  %v6349_v28 = vld [vmem:[#allocation7 + $0x2ec] ss:$16 sps:$4 sm:$0xff]  }
 0x259   : > { %2603 = vmatpush1.bf16.msra.mxu0 %v6320_v22  ;;  %v1353_v34 = vpop.f32.mrb[14].mxu0  ;;  %v1466_v35 = vpop.f32.mrb[14].mxu1  ;;  %2829 = vmatpush1.bf16.msra.mxu1 %v6323_v23  ;;  %v1670_v36 = vmax.bf16 %v1638_v27, %v1606_v20  ;;  %v1558_v40 = vadd.f32 %v7382_v59, %v1351_v31  ;;  %v1560_v48 = vadd.f32 %v7385_v60, %v1464_v32  ;;  %v6341_v20 = vld [vmem:[#allocation7 + $0x2c8] ss:$16 sps:$4 sm:$0xff]   ;;  %v6346_v27 = vld [vmem:[#allocation7 + $0x2e4] ss:$16 sps:$4 sm:$0xff]  }
 0x25a   : > { %v1561_v42 = vadd.f32 %v7379_v57, %v1353_v34  ;;  %v1563_v0 = vadd.f32 %v7376_v56, %v1466_v35  ;;  %v1355_v44 = vpop.f32.mrb[15].mxu0  ;;  %v1468_v45 = vpop.f32.mrb[15].mxu1  ;;  %2604 = vmatprep.subr.bf16.mxu0 %v6328_v25  ;;  %2830 = vmatprep.subr.bf16.mxu1 %v6331_v26 }
 0x25b   : > { %v1562_v49 = vadd.f32 %v7382_v59, %v1355_v44  ;;  %v1564_v52 = vadd.f32 %v7385_v60, %v1468_v45  ;;  %2535 = vmatprep.mubr.bf16.mxu0 %v1670_v36  ;;  %2761 = vmatprep.mubr.bf16.mxu1 %v1670_v36  ;;  %v6344_v36 = vld [vmem:[#allocation7 + $0x2e0] ss:$16 sps:$4 sm:$0xff]  }
 0x25c   : > { %v1609_v58 = vpack.c.bf16 %v1561_v42, %v1557_v33  ;;  %v7431_v51 = vpack.c.bf16 %v1563_v0, %v1559_v30  ;;  %2536 = vmatmul.mubr.bf16.gmra.mrb[40].mxu0 %v1669_v38  ;;  %2762 = vmatmul.mubr.bf16.gmra.mrb[40].mxu1 %v1669_v38 }
 0x25d   : > { %v1610_v61 = vpack.c.bf16 %v1562_v49, %v1558_v40  ;;  %v7433_v62 = vpack.c.bf16 %v1564_v52, %v1560_v48  ;;  %2605 = vmatpush1.bf16.msra.mxu0 %v6326_v37  ;;  %2831 = vmatpush1.bf16.msra.mxu1 %v6329_v39  ;;  %v6347_v37 = vld [vmem:[#allocation7 + $0x2e8] ss:$16 sps:$4 sm:$0xff]   ;;  %v6352_v39 = vld [vmem:[#allocation7 + $0x304] ss:$16 sps:$4 sm:$0xff]   ;;  %v6355_v40 = vld [vmem:[#allocation7 + $0x30c] ss:$16 sps:$4 sm:$0xff]  }
 0x25e   : > { %v1641_v2 = vmul.bf16 1045249613, %v1609_v58  ;;  %2606 = vmatprep.subr.bf16.mxu0 %v6334_v46  ;;  %2832 = vmatprep.subr.bf16.mxu1 %v6337_v47 }
 0x25f   : > { %v1642_v5 = vmul.bf16 1045249613, %v1610_v61  ;;  %v1359_v6 = vpop.f32.mrb[16].mxu0  ;;  %v1472_v7 = vpop.f32.mrb[16].mxu1 }
 0x260   : > { %v1567_v8 = vadd.f32 %v7376_v56, %v1472_v7  ;;  %v1361_v9 = vpop.f32.mrb[17].mxu0  ;;  %v1474_v10 = vpop.f32.mrb[17].mxu1  ;;  %v1565_v11 = vadd.f32 %v7379_v57, %v1359_v6  ;;  %v1673_v18 = vmax.bf16 %v1641_v2, %v1609_v58  ;;  %v6358_v7 = vld [vmem:[#allocation7 + $0x324] ss:$16 sps:$4 sm:$0xff]  }
 0x261   : > { %2607 = vmatpush1.bf16.msra.mxu0 %v6332_v63  ;;  %v1363_v12 = vpop.f32.mrb[18].mxu0  ;;  %v1476_v14 = vpop.f32.mrb[18].mxu1  ;;  %2833 = vmatpush1.bf16.msra.mxu1 %v6335_v1  ;;  %v1674_v16 = vmax.bf16 %v1642_v5, %v1610_v61  ;;  %v1566_v22 = vadd.f32 %v7382_v59, %v1361_v9  ;;  %v1568_v29 = vadd.f32 %v7385_v60, %v1474_v10  ;;  %v6350_v61 = vld [vmem:[#allocation7 + $0x300] ss:$16 sps:$4 sm:$0xff]   ;;  %v6353_v1 = vld [vmem:[#allocation7 + $0x308] ss:$16 sps:$4 sm:$0xff]  }
 0x262   : > { %v1569_v23 = vadd.f32 %v7379_v57, %v1363_v12  ;;  %v1571_v24 = vadd.f32 %v7376_v56, %v1476_v14  ;;  %v1365_v25 = vpop.f32.mrb[19].mxu0  ;;  %v1478_v26 = vpop.f32.mrb[19].mxu1  ;;  %2608 = vmatprep.subr.bf16.mxu0 %v6340_v3  ;;  %2834 = vmatprep.subr.bf16.mxu1 %v6343_v4 }
 0x263   : > { %v1570_v30 = vadd.f32 %v7382_v59, %v1365_v25  ;;  %v1572_v31 = vadd.f32 %v7385_v60, %v1478_v26  ;;  %2545 = vmatprep.mubr.bf16.mxu0 %v1674_v16  ;;  %2771 = vmatprep.mubr.bf16.mxu1 %v1674_v16 }
 0x264   : > { %v1613_v32 = vpack.c.bf16 %v1569_v23, %v1565_v11  ;;  %v7443_v33 = vpack.c.bf16 %v1571_v24, %v1567_v8  ;;  %2546 = vmatmul.mubr.bf16.gmra.mrb[44].mxu0 %v1673_v18  ;;  %2772 = vmatmul.mubr.bf16.gmra.mrb[44].mxu1 %v1673_v18  ;;  %v6361_v8 = vld [vmem:[#allocation7 + $0x32c] ss:$16 sps:$4 sm:$0xff]   ;;  %v6356_v18 = vld [vmem:[#allocation7 + $0x320] ss:$16 sps:$4 sm:$0xff]   ;;  %v6364_v23 = vld [vmem:[#allocation7 + $0x344] ss:$16 sps:$4 sm:$0xff]  }
 0x265   : > { %v1614_v34 = vpack.c.bf16 %v1570_v30, %v1566_v22  ;;  %v7445_v35 = vpack.c.bf16 %v1572_v31, %v1568_v29  ;;  %2609 = vmatpush1.bf16.msra.mxu0 %v6338_v17  ;;  %2835 = vmatpush1.bf16.msra.mxu1 %v6341_v20  ;;  %v6359_v20 = vld [vmem:[#allocation7 + $0x328] ss:$16 sps:$4 sm:$0xff]   ;;  %v6367_v24 = vld [vmem:[#allocation7 + $0x34c] ss:$16 sps:$4 sm:$0xff]  }
 0x266   : > { %v1645_v38 = vmul.bf16 1045249613, %v1613_v32  ;;  %2610 = vmatprep.subr.bf16.mxu0 %v6346_v27  ;;  %2836 = vmatprep.subr.bf16.mxu1 %v6349_v28 }
 0x267   : > { %v1646_v42 = vmul.bf16 1045249613, %v1614_v34  ;;  %v1369_v0 = vpop.f32.mrb[20].mxu0  ;;  %v1482_v44 = vpop.f32.mrb[20].mxu1 }
 0x268   : > { %v1575_v45 = vadd.f32 %v7376_v56, %v1482_v44  ;;  %v1371_v46 = vpop.f32.mrb[21].mxu0  ;;  %v1484_v47 = vpop.f32.mrb[21].mxu1  ;;  %v1573_v48 = vadd.f32 %v7379_v57, %v1369_v0  ;;  %v1677_v63 = vmax.bf16 %v1645_v38, %v1613_v32 }
 0x269   : > { %2611 = vmatpush1.bf16.msra.mxu0 %v6344_v36  ;;  %v1373_v49 = vpop.f32.mrb[22].mxu0  ;;  %v1486_v52 = vpop.f32.mrb[22].mxu1  ;;  %2837 = vmatpush1.bf16.msra.mxu1 %v6347_v37  ;;  %v1678_v58 = vmax.bf16 %v1646_v42, %v1614_v34  ;;  %v1574_v2 = vadd.f32 %v7382_v59, %v1371_v46  ;;  %v1576_v9 = vadd.f32 %v7385_v60, %v1484_v47  ;;  %v6362_v37 = vld [vmem:[#allocation7 + $0x340] ss:$16 sps:$4 sm:$0xff]   ;;  %v6370_v46 = vld [vmem:[#allocation7 + $0x364] ss:$16 sps:$4 sm:$0xff]  }
 0x26a   : > { %v1577_v3 = vadd.f32 %v7379_v57, %v1373_v49  ;;  %v1579_v4 = vadd.f32 %v7376_v56, %v1486_v52  ;;  %v1375_v5 = vpop.f32.mrb[23].mxu0  ;;  %v1488_v6 = vpop.f32.mrb[23].mxu1  ;;  %2612 = vmatprep.subr.bf16.mxu0 %v6352_v39  ;;  %2838 = vmatprep.subr.bf16.mxu1 %v6355_v40  ;;  %v6365_v39 = vld [vmem:[#allocation7 + $0x348] ss:$16 sps:$4 sm:$0xff]   ;;  %v6373_v47 = vld [vmem:[#allocation7 + $0x36c] ss:$16 sps:$4 sm:$0xff]  }
 0x26b   : > { %v1578_v10 = vadd.f32 %v7382_v59, %v1375_v5  ;;  %v1580_v11 = vadd.f32 %v7385_v60, %v1488_v6  ;;  %2555 = vmatprep.mubr.bf16.mxu0 %v1678_v58  ;;  %2781 = vmatprep.mubr.bf16.mxu1 %v1678_v58  ;;  %v6376_v5 = vld [vmem:[#allocation7 + $0x384] ss:$16 sps:$4 sm:$0xff]   ;;  %v6379_v6 = vld [vmem:[#allocation7 + $0x38c] ss:$16 sps:$4 sm:$0xff]  }
 0x26c   : > { %v1617_v12 = vpack.c.bf16 %v1577_v3, %v1573_v48  ;;  %v7455_v14 = vpack.c.bf16 %v1579_v4, %v1575_v45  ;;  %2556 = vmatmul.mubr.bf16.gmra.mrb[48].mxu0 %v1677_v63  ;;  %2782 = vmatmul.mubr.bf16.gmra.mrb[48].mxu1 %v1677_v63  ;;  %v6371_v3 = vld [vmem:[#allocation7 + $0x368] ss:$16 sps:$4 sm:$0xff]  }
 0x26d   : > { %v1618_v16 = vpack.c.bf16 %v1578_v10, %v1574_v2  ;;  %v7457_v17 = vpack.c.bf16 %v1580_v11, %v1576_v9  ;;  %2613 = vmatpush1.bf16.msra.mxu0 %v6350_v61  ;;  %2839 = vmatpush1.bf16.msra.mxu1 %v6353_v1  ;;  %v6368_v2 = vld [vmem:[#allocation7 + $0x360] ss:$16 sps:$4 sm:$0xff]  }
 0x26e   : > { %v1649_v22 = vmul.bf16 1045249613, %v1617_v12  ;;  %2614 = vmatprep.subr.bf16.mxu0 %v6358_v7  ;;  %2840 = vmatprep.subr.bf16.mxu1 %v6361_v8 }
 0x26f   : > { %v1650_v25 = vmul.bf16 1045249613, %v1618_v16  ;;  %v1379_v26 = vpop.f32.mrb[24].mxu0  ;;  %v1492_v27 = vpop.f32.mrb[24].mxu1 }
 0x270   : > { %v1583_v28 = vadd.f32 %v7376_v56, %v1492_v27  ;;  %v1381_v29 = vpop.f32.mrb[25].mxu0  ;;  %v1494_v30 = vpop.f32.mrb[25].mxu1  ;;  %v1581_v31 = vadd.f32 %v7379_v57, %v1379_v26  ;;  %v1681_v38 = vmax.bf16 %v1649_v22, %v1617_v12 }
 0x271   : > { %2615 = vmatpush1.bf16.msra.mxu0 %v6356_v18  ;;  %v1383_v32 = vpop.f32.mrb[26].mxu0  ;;  %v1496_v34 = vpop.f32.mrb[26].mxu1  ;;  %2841 = vmatpush1.bf16.msra.mxu1 %v6359_v20  ;;  %v1682_v36 = vmax.bf16 %v1650_v25, %v1618_v16  ;;  %v1582_v40 = vadd.f32 %v7382_v59, %v1381_v29  ;;  %v1584_v48 = vadd.f32 %v7385_v60, %v1494_v30  ;;  %v6377_v25 = vld [vmem:[#allocation7 + $0x388] ss:$16 sps:$4 sm:$0xff]  }
 0x272   : > { %v1585_v42 = vadd.f32 %v7379_v57, %v1383_v32  ;;  %v1587_v0 = vadd.f32 %v7376_v56, %v1496_v34  ;;  %v1385_v44 = vpop.f32.mrb[27].mxu0  ;;  %v1498_v45 = vpop.f32.mrb[27].mxu1  ;;  %2616 = vmatprep.subr.bf16.mxu0 %v6364_v23  ;;  %2842 = vmatprep.subr.bf16.mxu1 %v6367_v24  ;;  %v6374_v23 = vld [vmem:[#allocation7 + $0x380] ss:$16 sps:$4 sm:$0xff]   ;;  %v6385_v32 = vld [vmem:[#allocation7 + $0x3ac] ss:$16 sps:$4 sm:$0xff]  }
 0x273   : > { %v1586_v49 = vadd.f32 %v7382_v59, %v1385_v44  ;;  %v1588_v52 = vadd.f32 %v7385_v60, %v1498_v45  ;;  %2565 = vmatprep.mubr.bf16.mxu0 %v1682_v36  ;;  %2791 = vmatprep.mubr.bf16.mxu1 %v1682_v36  ;;  %v6391_v44 = vld [vmem:[#allocation7 + $0x3cc] ss:$16 sps:$4 sm:$0xff]  }
 0x274   : > { %v1621_v58 = vpack.c.bf16 %v1585_v42, %v1581_v31  ;;  %v7467_v61 = vpack.c.bf16 %v1587_v0, %v1583_v28  ;;  %2566 = vmatmul.mubr.bf16.gmra.mrb[52].mxu0 %v1681_v38  ;;  %2792 = vmatmul.mubr.bf16.gmra.mrb[52].mxu1 %v1681_v38  ;;  %v6382_v31 = vld [vmem:[#allocation7 + $0x3a4] ss:$16 sps:$4 sm:$0xff]   ;;  %v6383_v42 = vld [vmem:[#allocation7 + $0x3a8] ss:$16 sps:$4 sm:$0xff]  }
 0x275   : > { %v1622_v63 = vpack.c.bf16 %v1586_v49, %v1582_v40  ;;  %v7469_v1 = vpack.c.bf16 %v1588_v52, %v1584_v48  ;;  %2617 = vmatpush1.bf16.msra.mxu0 %v6362_v37  ;;  %2843 = vmatpush1.bf16.msra.mxu1 %v6365_v39  ;;  %v6380_v40 = vld [vmem:[#allocation7 + $0x3a0] ss:$16 sps:$4 sm:$0xff]   ;;  %v6389_v49 = vld [vmem:[#allocation7 + $0x3c8] ss:$16 sps:$4 sm:$0xff]  }
 0x276   : > { %v1653_v4 = vmul.bf16 1045249613, %v1621_v58  ;;  %2618 = vmatprep.subr.bf16.mxu0 %v6370_v46  ;;  %2844 = vmatprep.subr.bf16.mxu1 %v6373_v47  ;;  %v6386_v47 = vld [vmem:[#allocation7 + $0x3c0] ss:$16 sps:$4 sm:$0xff]  }
 0x277   : > { %v1654_v7 = vmul.bf16 1045249613, %v1622_v63  ;;  %v1389_v8 = vpop.f32.mrb[28].mxu0  ;;  %v1502_v9 = vpop.f32.mrb[28].mxu1 }
 0x278   : > { %v1591_v10 = vadd.f32 %v7376_v56, %v1502_v9  ;;  %v1391_v11 = vpop.f32.mrb[29].mxu0  ;;  %v1504_v12 = vpop.f32.mrb[29].mxu1  ;;  %v1589_v16 = vadd.f32 %v7379_v57, %v1389_v8  ;;  %v1685_v24 = vmax.bf16 %v1653_v4, %v1621_v58  ;;  %v6394_v58 = vld [vmem:[#allocation7 + $0x3e4] ss:$16 sps:$4 sm:$0xff]   ;;  %v6395_v4 = vld [vmem:[#allocation7 + $0x3e8] ss:$16 sps:$4 sm:$0xff]  }
 0x279   : > { %2619 = vmatpush1.bf16.msra.mxu0 %v6368_v2  ;;  %v1393_v18 = vpop.f32.mrb[30].mxu0  ;;  %v1506_v20 = vpop.f32.mrb[30].mxu1  ;;  %2845 = vmatpush1.bf16.msra.mxu1 %v6371_v3  ;;  %v1686_v22 = vmax.bf16 %v1654_v7, %v1622_v63  ;;  %v1590_v26 = vadd.f32 %v7382_v59, %v1391_v11  ;;  %v1592_v34 = vadd.f32 %v7385_v60, %v1504_v12  ;;  %v6397_v63 = vld [vmem:[#allocation7 + $0x3ec] ss:$16 sps:$4 sm:$0xff]   ;;  %v6392_v2 = vld [vmem:[#allocation7 + $0x3e0] ss:$16 sps:$4 sm:$0xff]  }
 0x27a   : > { %v1593_v27 = vadd.f32 %v7379_v57, %v1393_v18  ;;  %v1595_v28 = vadd.f32 %v7376_v56, %v1506_v20  ;;  %v1395_v29 = vpop.f32.mrb[31].mxu0  ;;  %v1508_v30 = vpop.f32.mrb[31].mxu1  ;;  %2620 = vmatprep.subr.bf16.mxu0 %v6376_v5  ;;  %2846 = vmatprep.subr.bf16.mxu1 %v6379_v6  ;;  %v1631_v3 = vmul.bf16 1045249613, %v7395_v13  ;;  %v6400_v5 = vld [vmem:[#allocation8 + $0x4] ss:$16 sps:$4 sm:$0xff]  }
 0x27b   : > { %v1594_v36 = vadd.f32 %v7382_v59, %v1395_v29  ;;  %v1596_v37 = vadd.f32 %v7385_v60, %v1508_v30  ;;  %2575 = vmatprep.mubr.bf16.mxu0 %v1686_v22  ;;  %2801 = vmatprep.mubr.bf16.mxu1 %v1686_v22  ;;  %v6388_v59 = vld [vmem:[#allocation7 + $0x3c4] ss:$16 sps:$4 sm:$0xff]   ;;  %v1632_v60 = vmul.bf16 1045249613, %v7397_v15  ;;  %v1636_v6 = vmul.bf16 1045249613, %v7409_v43 }
 0x27c   : > { %v1625_v38 = vpack.c.bf16 %v1593_v27, %v1589_v16  ;;  %v7479_v39 = vpack.c.bf16 %v1595_v28, %v1591_v10  ;;  %2576 = vmatmul.mubr.bf16.gmra.mrb[56].mxu0 %v1685_v24  ;;  %2802 = vmatmul.mubr.bf16.gmra.mrb[56].mxu1 %v1685_v24  ;;  %v6403_v7 = vld [vmem:[#allocation8 + $0xc] ss:$16 sps:$4 sm:$0xff]   ;;  %v6398_v8 = vld [vmem:[#allocation8] ss:$16 sps:$4 sm:$0xff]   ;;  %v6401_v10 = vld [vmem:[#allocation8 + $0x8] ss:$16 sps:$4 sm:$0xff]  }
 0x27d   : > { %v1626_v56 = vpack.c.bf16 %v1594_v36, %v1590_v26  ;;  %v7481_v57 = vpack.c.bf16 %v1596_v37, %v1592_v34  ;;  %2621 = vmatpush1.bf16.msra.mxu0 %v6374_v23  ;;  %2847 = vmatpush1.bf16.msra.mxu1 %v6377_v25  ;;  %v1664_v52 = vmax.bf16 %v1632_v60, %v7397_v15  ;;  %v6406_v11 = vld [vmem:[#allocation8 + $0x24] ss:$16 sps:$4 sm:$0xff]   ;;  %v6409_v12 = vld [vmem:[#allocation8 + $0x2c] ss:$16 sps:$4 sm:$0xff]   ;;  %v1635_v16 = vmul.bf16 1045249613, %v7407_v41 }
 0x27e   : > { %v1657_v0 = vmul.bf16 1045249613, %v1625_v38  ;;  %2622 = vmatprep.subr.bf16.mxu0 %v6382_v31  ;;  %2848 = vmatprep.subr.bf16.mxu1 %v6385_v32  ;;  %v1663_v15 = vmax.bf16 %v1631_v3, %v7395_v13  ;;  %v1668_v9 = vmax.bf16 %v1636_v6, %v7409_v43  ;;  %v6404_v18 = vld [vmem:[#allocation8 + $0x20] ss:$16 sps:$4 sm:$0xff]   ;;  %v1640_v20 = vmul.bf16 1045249613, %v7421_v21 }
 0x27f   : > { %v1658_v45 = vmul.bf16 1045249613, %v1626_v56  ;;  %v6407_v13 = vld [vmem:[#allocation8 + $0x28] ss:$16 sps:$4 sm:$0xff]   ;;  %v6412_v22 = vld [vmem:[#allocation8 + $0x44] ss:$16 sps:$4 sm:$0xff]   ;;  %v1667_v23 = vmax.bf16 %v1635_v16, %v7407_v41 }
 0x280   : > { %v1689_v48 = vmax.bf16 %v1657_v0, %v1625_v38  ;;  %v6415_v43 = vld [vmem:[#allocation8 + $0x4c] ss:$16 sps:$4 sm:$0xff]   ;;  %v6410_v24 = vld [vmem:[#allocation8 + $0x40] ss:$16 sps:$4 sm:$0xff]   ;;  %v1672_v25 = vmax.bf16 %v1640_v20, %v7421_v21  ;;  %v6413_v26 = vld [vmem:[#allocation8 + $0x48] ss:$16 sps:$4 sm:$0xff]  }
 0x281   : > { %2623 = vmatpush1.bf16.msra.mxu0 %v6380_v40  ;;  %2849 = vmatpush1.bf16.msra.mxu1 %v6383_v42  ;;  %v1690_v46 = vmax.bf16 %v1658_v45, %v1626_v56  ;;  %v6418_v27 = vld [vmem:[#allocation8 + $0x64] ss:$16 sps:$4 sm:$0xff]   ;;  %v6421_v28 = vld [vmem:[#allocation8 + $0x6c] ss:$16 sps:$4 sm:$0xff]   ;;  %v1639_v29 = vmul.bf16 1045249613, %v7419_v19 }
 0x282   : > { %2624 = vmatprep.subr.bf16.mxu0 %v6388_v59  ;;  %2850 = vmatprep.subr.bf16.mxu1 %v6391_v44  ;;  %v6416_v30 = vld [vmem:[#allocation8 + $0x60] ss:$16 sps:$4 sm:$0xff]   ;;  %v1644_v41 = vmul.bf16 1045249613, %v7433_v62  ;;  %v6419_v31 = vld [vmem:[#allocation8 + $0x68] ss:$16 sps:$4 sm:$0xff]  }
 0x283   : > { %2585 = vmatprep.mubr.bf16.mxu0 %v1690_v46  ;;  %2811 = vmatprep.mubr.bf16.mxu1 %v1690_v46  ;;  %v6424_v21 = vld [vmem:[#allocation8 + $0x84] ss:$16 sps:$4 sm:$0xff]   ;;  %v6427_v32 = vld [vmem:[#allocation8 + $0x8c] ss:$16 sps:$4 sm:$0xff]   ;;  %v1671_v34 = vmax.bf16 %v1639_v29, %v7419_v19  ;;  %v6422_v36 = vld [vmem:[#allocation8 + $0x80] ss:$16 sps:$4 sm:$0xff]  }
 0x284   : > { %2586 = vmatmul.mubr.bf16.gmra.mrb[60].mxu0 %v1689_v48  ;;  %2812 = vmatmul.mubr.bf16.gmra.mrb[60].mxu1 %v1689_v48  ;;  %v1676_v37 = vmax.bf16 %v1644_v41, %v7433_v62  ;;  %v6425_v38 = vld [vmem:[#allocation8 + $0x88] ss:$16 sps:$4 sm:$0xff]   ;;  %v6430_v56 = vld [vmem:[#allocation8 + $0xa4] ss:$16 sps:$4 sm:$0xff]   ;;  %v6433_v40 = vld [vmem:[#allocation8 + $0xac] ss:$16 sps:$4 sm:$0xff]  }
 0x285   : > { %2625 = vmatpush1.bf16.msra.mxu0 %v6386_v47  ;;  %2628 = vmatprep.mubr.bf16.mxu0 %v1664_v52  ;;  %v1643_v42 = vmul.bf16 1045249613, %v7431_v51  ;;  %v6428_v0 = vld [vmem:[#allocation8 + $0xa0] ss:$16 sps:$4 sm:$0xff]   ;;  %v1648_v19 = vmul.bf16 1045249613, %v7445_v35 }
 0x286   : > { %2851 = vmatpush1.bf16.msra.mxu1 %v6389_v49  ;;  %2854 = vmatprep.mubr.bf16.mxu1 %v1664_v52  ;;  %v6431_v59 = vld [vmem:[#allocation8 + $0xa8] ss:$16 sps:$4 sm:$0xff]   ;;  %v6436_v62 = vld [vmem:[#allocation8 + $0xc4] ss:$16 sps:$4 sm:$0xff]   ;;  %v6439_v44 = vld [vmem:[#allocation8 + $0xcc] ss:$16 sps:$4 sm:$0xff]  }
 0x287   : > { %2626 = vmatprep.subr.bf16.mxu0 %v6394_v58  ;;  %2852 = vmatprep.subr.bf16.mxu1 %v6397_v63  ;;  %v1675_v60 = vmax.bf16 %v1643_v42, %v7431_v51  ;;  %v6434_v45 = vld [vmem:[#allocation8 + $0xc0] ss:$16 sps:$4 sm:$0xff]   ;;  %v1680_v46 = vmax.bf16 %v1648_v19, %v7445_v35  ;;  %v6437_v47 = vld [vmem:[#allocation8 + $0xc8] ss:$16 sps:$4 sm:$0xff]   ;;  %v6442_v48 = vld [vmem:[#allocation8 + $0xe4] ss:$16 sps:$4 sm:$0xff]  }
 0x288   : > { %v6445_v49 = vld [vmem:[#allocation8 + $0xec] ss:$16 sps:$4 sm:$0xff]   ;;  %v1647_v52 = vmul.bf16 1045249613, %v7443_v33  ;;  %v6440_v58 = vld [vmem:[#allocation8 + $0xe0] ss:$16 sps:$4 sm:$0xff]  }
 0x289   : > { %2627 = vmatpush1.bf16.msra.mxu0 %v6392_v2  ;;  %v1652_v51 = vmul.bf16 1045249613, %v7457_v17  ;;  %v6443_v63 = vld [vmem:[#allocation8 + $0xe8] ss:$16 sps:$4 sm:$0xff]   ;;  %v6448_v35 = vld [vmem:[#allocation8 + $0x104] ss:$16 sps:$4 sm:$0xff]  }
 0x28a   : > { %2853 = vmatpush1.bf16.msra.mxu1 %v6395_v4  ;;  %3821 = vmatprep.subr.bf16.mxu0 %v6400_v5  ;;  %v6451_v2 = vld [vmem:[#allocation8 + $0x10c] ss:$16 sps:$4 sm:$0xff]   ;;  %v1679_v3 = vmax.bf16 %v1647_v52, %v7443_v33  ;;  %v6446_v4 = vld [vmem:[#allocation8 + $0x100] ss:$16 sps:$4 sm:$0xff]   ;;  %v6449_v6 = vld [vmem:[#allocation8 + $0x108] ss:$16 sps:$4 sm:$0xff]  }
 0x28b   : > { %4047 = vmatprep.subr.bf16.mxu1 %v6403_v7  ;;  %v1684_v5 = vmax.bf16 %v1652_v51, %v7457_v17  ;;  %v6454_v7 = vld [vmem:[#allocation8 + $0x124] ss:$16 sps:$4 sm:$0xff]   ;;  %v1656_v33 = vmul.bf16 1045249613, %v7469_v1  ;;  %v6458_v16 = vld [vmem:[#allocation8 + $0x140] ss:$16 sps:$4 sm:$0xff]  }
 0x28c   : > { %2629 = vmatmul.mubr.bf16.vlgmr.msra.gmra.mrb[32].mxu0 %v1663_v15  ;;  %v6460_v17 = vld [vmem:[#allocation8 + $0x144] ss:$16 sps:$4 sm:$0xff]   ;;  %v6461_v20 = vld [vmem:[#allocation8 + $0x148] ss:$16 sps:$4 sm:$0xff]   ;;  %v1821_v19 = vld [vmem:[%s7827_s6] sm:$0xf] }
 0x28d   : > { %2855 = vmatmul.mubr.bf16.vlgmr.msra.gmra.mrb[32].mxu1 %v1663_v15  ;;  %2638 = vmatprep.mubr.bf16.mxu0 %v1668_v9  ;;  %v6457_v15 = vld [vmem:[#allocation8 + $0x12c] ss:$16 sps:$4 sm:$0xff]   ;;  %v6473_v29 = vld [vmem:[#allocation8 + $0x188] ss:$16 sps:$4 sm:$0xff]   ;;  %v6496_v42 = vld [vmem:[#allocation8 + $0x204] ss:$16 sps:$4 sm:$0xff]  }
 0x28e   : > { %2864 = vmatprep.mubr.bf16.mxu1 %v1668_v9  ;;  %3822 = vmatpush1.bf16.msra.mxu0 %v6398_v8  ;;  %v1651_v8 = vmul.bf16 1045249613, %v7455_v14  ;;  %v6452_v9 = vld [vmem:[#allocation8 + $0x120] ss:$16 sps:$4 sm:$0xff]  }
 0x28f   : > { %4048 = vmatpush1.bf16.msra.mxu1 %v6401_v10  ;;  %3823 = vmatprep.subr.bf16.mxu0 %v6406_v11  ;;  %v6455_v10 = vld [vmem:[#allocation8 + $0x128] ss:$16 sps:$4 sm:$0xff]   ;;  %v6463_v11 = vld [vmem:[#allocation8 + $0x14c] ss:$16 sps:$4 sm:$0xff]  }
 0x290   : > { %4049 = vmatprep.subr.bf16.mxu1 %v6409_v12  ;;  %v1683_v12 = vmax.bf16 %v1651_v8, %v7455_v14  ;;  %v1660_v14 = vmul.bf16 1045249613, %v7481_v57 }
 0x292   : > { %3824 = vmatpush1.bf16.msra.mxu0 %v6404_v18  ;;  %v1688_v18 = vmax.bf16 %v1656_v33, %v7469_v1  ;;  %v6472_v1 = vld [vmem:[#allocation8 + $0x184] ss:$16 sps:$4 sm:$0xff]  }
 0x293   : > { %4050 = vmatpush1.bf16.msra.mxu1 %v6407_v13  ;;  %3825 = vmatprep.subr.bf16.mxu0 %v6412_v22  ;;  %v6466_v13 = vld [vmem:[#allocation8 + $0x164] ss:$16 sps:$4 sm:$0xff]   ;;  %v6469_v22 = vld [vmem:[#allocation8 + $0x16c] ss:$16 sps:$4 sm:$0xff]  }
 0x294   : > { %2639 = vmatmul.mubr.bf16.gmra.mrb[36].mxu0 %v1667_v23  ;;  %4051 = vmatprep.subr.bf16.mxu1 %v6415_v43  ;;  %v1655_v43 = vmul.bf16 1045249613, %v7467_v61 }
 0x295   : > { %2865 = vmatmul.mubr.bf16.gmra.mrb[36].mxu1 %v1667_v23  ;;  %2648 = vmatprep.mubr.bf16.mxu0 %v1672_v25  ;;  %v6464_v23 = vld [vmem:[#allocation8 + $0x160] ss:$16 sps:$4 sm:$0xff]  }
 0x296   : > { %2874 = vmatprep.mubr.bf16.mxu1 %v1672_v25  ;;  %3826 = vmatpush1.bf16.msra.mxu0 %v6410_v24  ;;  %v6467_v24 = vld [vmem:[#allocation8 + $0x168] ss:$16 sps:$4 sm:$0xff]   ;;  %v6475_v25 = vld [vmem:[#allocation8 + $0x18c] ss:$16 sps:$4 sm:$0xff]  }
 0x297   : > { %4052 = vmatpush1.bf16.msra.mxu1 %v6413_v26  ;;  %3827 = vmatprep.subr.bf16.mxu0 %v6418_v27  ;;  %v1687_v26 = vmax.bf16 %v1655_v43, %v7467_v61  ;;  %v6470_v27 = vld [vmem:[#allocation8 + $0x180] ss:$16 sps:$4 sm:$0xff]   ;;  %v6478_v61 = vld [vmem:[#allocation8 + $0x1a4] ss:$16 sps:$4 sm:$0xff]   ;;  %v6497_v43 = vld [vmem:[#allocation8 + $0x208] ss:$16 sps:$4 sm:$0xff]  }
 0x298   : > { %4053 = vmatprep.subr.bf16.mxu1 %v6421_v28  ;;  %v1692_v28 = vmax.bf16 %v1660_v14, %v7481_v57  ;;  %v6479_v57 = vld [vmem:[#allocation8 + $0x1a8] ss:$16 sps:$4 sm:$0xff]  }
 0x29a   : > { %3828 = vmatpush1.bf16.msra.mxu0 %v6416_v30  ;;  %v1659_v30 = vmul.bf16 1045249613, %v7479_v39 }
 0x29b   : > { %4054 = vmatpush1.bf16.msra.mxu1 %v6419_v31  ;;  %3829 = vmatprep.subr.bf16.mxu0 %v6424_v21  ;;  %v6481_v31 = vld [vmem:[#allocation8 + $0x1ac] ss:$16 sps:$4 sm:$0xff]   ;;  %v6476_v21 = vld [vmem:[#allocation8 + $0x1a0] ss:$16 sps:$4 sm:$0xff]  }
 0x29c   : > { %2649 = vmatmul.mubr.bf16.gmra.mrb[40].mxu0 %v1671_v34  ;;  %4055 = vmatprep.subr.bf16.mxu1 %v6427_v32  ;;  %v1691_v41 = vmax.bf16 %v1659_v30, %v7479_v39  ;;  %v6484_v32 = vld [vmem:[#allocation8 + $0x1c4] ss:$16 sps:$4 sm:$0xff]   ;;  %v6493_v39 = vld [vmem:[#allocation8 + $0x1ec] ss:$16 sps:$4 sm:$0xff]  }
 0x29d   : > { %2875 = vmatmul.mubr.bf16.gmra.mrb[40].mxu1 %v1671_v34  ;;  %2658 = vmatprep.mubr.bf16.mxu0 %v1676_v37  ;;  %v6487_v34 = vld [vmem:[#allocation8 + $0x1cc] ss:$16 sps:$4 sm:$0xff]  }
 0x29e   : > { %2884 = vmatprep.mubr.bf16.mxu1 %v1676_v37  ;;  %3830 = vmatpush1.bf16.msra.mxu0 %v6422_v36  ;;  %v6482_v36 = vld [vmem:[#allocation8 + $0x1c0] ss:$16 sps:$4 sm:$0xff]   ;;  %v6485_v37 = vld [vmem:[#allocation8 + $0x1c8] ss:$16 sps:$4 sm:$0xff]  }
 0x29f   : > { %4056 = vmatpush1.bf16.msra.mxu1 %v6425_v38  ;;  %3831 = vmatprep.subr.bf16.mxu0 %v6430_v56  ;;  %v6490_v38 = vld [vmem:[#allocation8 + $0x1e4] ss:$16 sps:$4 sm:$0xff]   ;;  %v6488_v56 = vld [vmem:[#allocation8 + $0x1e0] ss:$16 sps:$4 sm:$0xff]  }
 0x2a0   : > { %4057 = vmatprep.subr.bf16.mxu1 %v6433_v40  ;;  %v6491_v40 = vld [vmem:[#allocation8 + $0x1e8] ss:$16 sps:$4 sm:$0xff]  }
 0x2a2   : > { %3832 = vmatpush1.bf16.msra.mxu0 %v6428_v0  ;;  %v6499_v0 = vld [vmem:[#allocation8 + $0x20c] ss:$16 sps:$4 sm:$0xff]  }
 0x2a3   : > { %4058 = vmatpush1.bf16.msra.mxu1 %v6431_v59  ;;  %3833 = vmatprep.subr.bf16.mxu0 %v6436_v62  ;;  %v7519_v59 = vrot.slane %v1821_v19, %v7369_v53 }
 0x2a4   : > { %2659 = vmatmul.mubr.bf16.gmra.mrb[44].mxu0 %v1675_v60  ;;  %4059 = vmatprep.subr.bf16.mxu1 %v6439_v44  ;;  %v7522_v44 = vrot.slane %v1821_v19, %v7364_v50 }
 0x2a5   : > { %2885 = vmatmul.mubr.bf16.gmra.mrb[44].mxu1 %v1675_v60  ;;  %2668 = vmatprep.mubr.bf16.mxu0 %v1680_v46  ;;  %v7525_v60 = vrot.slane %v1821_v19, %v7371_v54 }
 0x2a6   : > { %2894 = vmatprep.mubr.bf16.mxu1 %v1680_v46  ;;  %3834 = vmatpush1.bf16.msra.mxu0 %v6434_v45 }
 0x2a7   : > { %4060 = vmatpush1.bf16.msra.mxu1 %v6437_v47  ;;  %3835 = vmatprep.subr.bf16.mxu0 %v6442_v48  ;;  %v7528_v47 = vrot.slane %v1821_v19, %v7373_v55 }
 0x2a8   : > { %4061 = vmatprep.subr.bf16.mxu1 %v6445_v49 }
 0x2aa   : > { %3836 = vmatpush1.bf16.msra.mxu0 %v6440_v58 }
 0x2ab   : > { %4062 = vmatpush1.bf16.msra.mxu1 %v6443_v63  ;;  %3837 = vmatprep.subr.bf16.mxu0 %v6448_v35 }
 0x2ac   : > { %2669 = vmatmul.mubr.bf16.gmra.mrb[48].mxu0 %v1679_v3  ;;  %4063 = vmatprep.subr.bf16.mxu1 %v6451_v2 }
 0x2ad   : > { %2895 = vmatmul.mubr.bf16.gmra.mrb[48].mxu1 %v1679_v3  ;;  %2678 = vmatprep.mubr.bf16.mxu0 %v1684_v5 }
 0x2ae   : > { %2904 = vmatprep.mubr.bf16.mxu1 %v1684_v5  ;;  %3838 = vmatpush1.bf16.msra.mxu0 %v6446_v4 }
 0x2af   : > { %4064 = vmatpush1.bf16.msra.mxu1 %v6449_v6  ;;  %3839 = vmatprep.subr.bf16.mxu0 %v6454_v7 }
 0x2b0   : > { %4065 = vmatprep.subr.bf16.mxu1 %v6457_v15 }
 0x2b2   : > { %3840 = vmatpush1.bf16.msra.mxu0 %v6452_v9 }
 0x2b3   : > { %4066 = vmatpush1.bf16.msra.mxu1 %v6455_v10  ;;  %3841 = vmatprep.subr.bf16.mxu0 %v6460_v17 }
 0x2b4   : > { %2679 = vmatmul.mubr.bf16.gmra.mrb[52].mxu0 %v1683_v12  ;;  %4067 = vmatprep.subr.bf16.mxu1 %v6463_v11 }
 0x2b5   : > { %2905 = vmatmul.mubr.bf16.gmra.mrb[52].mxu1 %v1683_v12  ;;  %2688 = vmatprep.mubr.bf16.mxu0 %v1688_v18 }
 0x2b6   : > { %2914 = vmatprep.mubr.bf16.mxu1 %v1688_v18  ;;  %3842 = vmatpush1.bf16.msra.mxu0 %v6458_v16 }
 0x2b7   : > { %4068 = vmatpush1.bf16.msra.mxu1 %v6461_v20  ;;  %3843 = vmatprep.subr.bf16.mxu0 %v6466_v13 }
 0x2b8   : > { %4069 = vmatprep.subr.bf16.mxu1 %v6469_v22  ;;  %v6494_v22 = vld [vmem:[#allocation8 + $0x200] ss:$16 sps:$4 sm:$0xff]  }
 0x2ba   : > { %3844 = vmatpush1.bf16.msra.mxu0 %v6464_v23 }
 0x2bb   : > { %4070 = vmatpush1.bf16.msra.mxu1 %v6467_v24  ;;  %3845 = vmatprep.subr.bf16.mxu0 %v6472_v1 }
 0x2bc   : > { %2689 = vmatmul.mubr.bf16.gmra.mrb[56].mxu0 %v1687_v26  ;;  %4071 = vmatprep.subr.bf16.mxu1 %v6475_v25 }
 0x2bd   : > { %2915 = vmatmul.mubr.bf16.gmra.mrb[56].mxu1 %v1687_v26  ;;  %2698 = vmatprep.mubr.bf16.mxu0 %v1692_v28 }
 0x2be   : > { %2924 = vmatprep.mubr.bf16.mxu1 %v1692_v28  ;;  %3846 = vmatpush1.bf16.msra.mxu0 %v6470_v27  ;;  %v6502_v27 = vld [vmem:[#allocation8 + $0x224] ss:$16 sps:$4 sm:$0xff]   ;;  %v6505_v28 = vld [vmem:[#allocation8 + $0x22c] ss:$16 sps:$4 sm:$0xff]  }
 0x2bf   : > { %4072 = vmatpush1.bf16.msra.mxu1 %v6473_v29  ;;  %3847 = vmatprep.subr.bf16.mxu0 %v6478_v61 }
 0x2c0   : > { %4073 = vmatprep.subr.bf16.mxu1 %v6481_v31 }
 0x2c2   : > { %3848 = vmatpush1.bf16.msra.mxu0 %v6476_v21 }
 0x2c3   : > { %4074 = vmatpush1.bf16.msra.mxu1 %v6479_v57  ;;  %3849 = vmatprep.subr.bf16.mxu0 %v6484_v32 }
 0x2c4   : > { %2699 = vmatmul.mubr.bf16.gmra.mrb[60].mxu0 %v1691_v41  ;;  %4075 = vmatprep.subr.bf16.mxu1 %v6487_v34 }
 0x2c5   : > { %2925 = vmatmul.mubr.bf16.gmra.mrb[60].mxu1 %v1691_v41 }
 0x2c6   : > { %3850 = vmatpush1.bf16.msra.mxu0 %v6482_v36  ;;  %v6500_v36 = vld [vmem:[#allocation8 + $0x220] ss:$16 sps:$4 sm:$0xff]  }
 0x2c7   : > { %4076 = vmatpush1.bf16.msra.mxu1 %v6485_v37  ;;  %3851 = vmatprep.subr.bf16.mxu0 %v6490_v38  ;;  %v6503_v37 = vld [vmem:[#allocation8 + $0x228] ss:$16 sps:$4 sm:$0xff]  }
 0x2c8   : > { %4077 = vmatprep.subr.bf16.mxu1 %v6493_v39 }
 0x2ca   : > { %3852 = vmatpush1.bf16.msra.mxu0 %v6488_v56  ;;  %v6508_v56 = vld [vmem:[#allocation8 + $0x244] ss:$16 sps:$4 sm:$0xff]  }
 0x2cb   : > { %4078 = vmatpush1.bf16.msra.mxu1 %v6491_v40  ;;  %3934 = vmatprep.subr.bf16.mxu0 %v6496_v42  ;;  %v6511_v40 = vld [vmem:[#allocation8 + $0x24c] ss:$16 sps:$4 sm:$0xff]  }
 0x2cc   : > { %4160 = vmatprep.subr.bf16.mxu1 %v6499_v0 }
 0x35f   : > { %v2630_v62 = vpop.f32.mrb[32].mxu0 }
 0x360   : > { %v2856_v45 = vpop.f32.mrb[32].mxu1  ;;  %v2632_v46 = vpop.f32.mrb[33].mxu0  ;;  %v5685_v52 = vadd.f32 %v2630_v62, %v7519_v59 }
 0x361   : > { %v2858_v48 = vpop.f32.mrb[33].mxu1  ;;  %v2634_v49 = vpop.f32.mrb[34].mxu0  ;;  %v5717_v35 = vadd.f32 %v2856_v45, %v7522_v44  ;;  %v5686_v2 = vadd.f32 %v2632_v46, %v7525_v60 }
 0x362   : > { %v5687_v58 = vadd.f32 %v2634_v49, %v7519_v59  ;;  %v2860_v51 = vpop.f32.mrb[34].mxu1  ;;  %v2636_v63 = vpop.f32.mrb[35].mxu0  ;;  %v5718_v6 = vadd.f32 %v2858_v48, %v7528_v47 }
 0x363   : > { %v5719_v3 = vadd.f32 %v2860_v51, %v7522_v44  ;;  %v5688_v4 = vadd.f32 %v2636_v63, %v7525_v60  ;;  %v2862_v5 = vpop.f32.mrb[35].mxu1 }
 0x364   : > { %v2935_v7 = vpack.c.bf16 %v5687_v58, %v5685_v52  ;;  %v5720_v15 = vadd.f32 %v2862_v5, %v7528_v47  ;;  %v6506_v52 = vld [vmem:[#allocation8 + $0x240] ss:$16 sps:$4 sm:$0xff]   ;;  %v6509_v58 = vld [vmem:[#allocation8 + $0x248] ss:$16 sps:$4 sm:$0xff]   ;;  %v6517_v5 = vld [vmem:[#allocation8 + $0x26c] ss:$16 sps:$4 sm:$0xff]  }
 0x365   : > { %v7538_v8 = vpack.c.bf16 %v5719_v3, %v5717_v35  ;;  %v2936_v9 = vpack.c.bf16 %v5688_v4, %v5686_v2  ;;  %v6514_v4 = vld [vmem:[#allocation8 + $0x264] ss:$16 sps:$4 sm:$0xff]  }
 0x366   : > { %v2967_v33 = vmul.bf16 1045249613, %v2935_v7  ;;  %v7540_v10 = vpack.c.bf16 %v5720_v15, %v5718_v6 }
 0x367   : > { %v2968_v17 = vmul.bf16 1045249613, %v2936_v9  ;;  %v2640_v11 = vpop.f32.mrb[36].mxu0 }
 0x368   : > { %v2866_v12 = vpop.f32.mrb[36].mxu1  ;;  %v2642_v16 = vpop.f32.mrb[37].mxu0  ;;  %v2999_v23 = vmax.bf16 %v2967_v33, %v2935_v7  ;;  %v5689_v14 = vadd.f32 %v2640_v11, %v7519_v59 }
 0x369   : > { %v2868_v18 = vpop.f32.mrb[37].mxu1  ;;  %v2644_v20 = vpop.f32.mrb[38].mxu0  ;;  %v3000_v13 = vmax.bf16 %v2968_v17, %v2936_v9  ;;  %v5721_v24 = vadd.f32 %v2866_v12, %v7522_v44  ;;  %v5690_v29 = vadd.f32 %v2642_v16, %v7525_v60 }
 0x36a   : > { %v5691_v1 = vadd.f32 %v2644_v20, %v7519_v59  ;;  %v2870_v25 = vpop.f32.mrb[38].mxu1  ;;  %v2646_v26 = vpop.f32.mrb[39].mxu0  ;;  %v5722_v31 = vadd.f32 %v2868_v18, %v7528_v47  ;;  %v6512_v18 = vld [vmem:[#allocation8 + $0x260] ss:$16 sps:$4 sm:$0xff]   ;;  %v6515_v20 = vld [vmem:[#allocation8 + $0x268] ss:$16 sps:$4 sm:$0xff]  }
 0x36b   : > { %v5723_v30 = vadd.f32 %v2870_v25, %v7522_v44  ;;  %v5692_v41 = vadd.f32 %v2646_v26, %v7525_v60  ;;  %v2872_v61 = vpop.f32.mrb[39].mxu1  ;;  %3853 = vmatprep.mubr.bf16.mxu0 %v3000_v13  ;;  %4079 = vmatprep.mubr.bf16.mxu1 %v3000_v13 }
 0x36c   : > { %v2939_v21 = vpack.c.bf16 %v5691_v1, %v5689_v14  ;;  %v5724_v57 = vadd.f32 %v2872_v61, %v7528_v47  ;;  %3854 = vmatmul.mubr.bf16.vlgmr.msra.gmra.mrb[64].mxu0 %v2999_v23  ;;  %4080 = vmatmul.mubr.bf16.vlgmr.msra.gmra.mrb[64].mxu1 %v2999_v23  ;;  %v6523_v23 = vld [vmem:[#allocation8 + $0x28c] ss:$16 sps:$4 sm:$0xff]  }
 0x36d   : > { %v7550_v32 = vpack.c.bf16 %v5723_v30, %v5721_v24  ;;  %v2940_v34 = vpack.c.bf16 %v5692_v41, %v5690_v29  ;;  %3935 = vmatpush1.bf16.msra.mxu0 %v6494_v22  ;;  %4161 = vmatpush1.bf16.msra.mxu1 %v6497_v43  ;;  %v6520_v43 = vld [vmem:[#allocation8 + $0x284] ss:$16 sps:$4 sm:$0xff]   ;;  %v6518_v30 = vld [vmem:[#allocation8 + $0x280] ss:$16 sps:$4 sm:$0xff]   ;;  %v6521_v41 = vld [vmem:[#allocation8 + $0x288] ss:$16 sps:$4 sm:$0xff]  }
 0x36e   : > { %v2971_v38 = vmul.bf16 1045249613, %v2939_v21  ;;  %v7552_v39 = vpack.c.bf16 %v5724_v57, %v5722_v31  ;;  %3936 = vmatprep.subr.bf16.mxu0 %v6502_v27  ;;  %4162 = vmatprep.subr.bf16.mxu1 %v6505_v28 }
 0x36f   : > { %v2972_v42 = vmul.bf16 1045249613, %v2940_v34  ;;  %v2650_v0 = vpop.f32.mrb[40].mxu0 }
 0x370   : > { %v2876_v19 = vpop.f32.mrb[40].mxu1  ;;  %v2652_v62 = vpop.f32.mrb[41].mxu0  ;;  %v5693_v45 = vadd.f32 %v2650_v0, %v7519_v59  ;;  %v3003_v3 = vmax.bf16 %v2971_v38, %v2939_v21 }
 0x371   : > { %v2878_v46 = vpop.f32.mrb[41].mxu1  ;;  %3937 = vmatpush1.bf16.msra.mxu0 %v6500_v36  ;;  %v2654_v48 = vpop.f32.mrb[42].mxu0  ;;  %4163 = vmatpush1.bf16.msra.mxu1 %v6503_v37  ;;  %v3004_v49 = vmax.bf16 %v2972_v42, %v2940_v34  ;;  %v5725_v51 = vadd.f32 %v2876_v19, %v7522_v44  ;;  %v5694_v6 = vadd.f32 %v2652_v62, %v7525_v60  ;;  %v6526_v36 = vld [vmem:[#allocation8 + $0x2a4] ss:$16 sps:$4 sm:$0xff]   ;;  %v6529_v37 = vld [vmem:[#allocation8 + $0x2ac] ss:$16 sps:$4 sm:$0xff]  }
 0x372   : > { %v5695_v63 = vadd.f32 %v2654_v48, %v7519_v59  ;;  %v2880_v35 = vpop.f32.mrb[42].mxu1  ;;  %v2656_v2 = vpop.f32.mrb[43].mxu0  ;;  %3938 = vmatprep.subr.bf16.mxu0 %v6508_v56  ;;  %4164 = vmatprep.subr.bf16.mxu1 %v6511_v40  ;;  %v5726_v33 = vadd.f32 %v2878_v46, %v7528_v47  ;;  %v6524_v48 = vld [vmem:[#allocation8 + $0x2a0] ss:$16 sps:$4 sm:$0xff]  }
 0x373   : > { %v5727_v7 = vadd.f32 %v2880_v35, %v7522_v44  ;;  %v5696_v15 = vadd.f32 %v2656_v2, %v7525_v60  ;;  %v2882_v9 = vpop.f32.mrb[43].mxu1  ;;  %3863 = vmatprep.mubr.bf16.mxu0 %v3004_v49  ;;  %4089 = vmatprep.mubr.bf16.mxu1 %v3004_v49  ;;  %v6527_v49 = vld [vmem:[#allocation8 + $0x2a8] ss:$16 sps:$4 sm:$0xff]  }
 0x374   : > { %v2943_v17 = vpack.c.bf16 %v5695_v63, %v5693_v45  ;;  %v5728_v11 = vadd.f32 %v2882_v9, %v7528_v47  ;;  %3864 = vmatmul.mubr.bf16.gmra.mrb[68].mxu0 %v3003_v3  ;;  %4090 = vmatmul.mubr.bf16.gmra.mrb[68].mxu1 %v3003_v3  ;;  %v6535_v63 = vld [vmem:[#allocation8 + $0x2cc] ss:$16 sps:$4 sm:$0xff]   ;;  %v6530_v9 = vld [vmem:[#allocation8 + $0x2c0] ss:$16 sps:$4 sm:$0xff]  }
 0x375   : > { %v7562_v12 = vpack.c.bf16 %v5727_v7, %v5725_v51  ;;  %v2944_v16 = vpack.c.bf16 %v5696_v15, %v5694_v6  ;;  %3939 = vmatpush1.bf16.msra.mxu0 %v6506_v52  ;;  %4165 = vmatpush1.bf16.msra.mxu1 %v6509_v58  ;;  %v6532_v51 = vld [vmem:[#allocation8 + $0x2c4] ss:$16 sps:$4 sm:$0xff]  }
 0x376   : > { %v2975_v13 = vmul.bf16 1045249613, %v2943_v17  ;;  %v7564_v22 = vpack.c.bf16 %v5728_v11, %v5726_v33  ;;  %3940 = vmatprep.subr.bf16.mxu0 %v6514_v4  ;;  %4166 = vmatprep.subr.bf16.mxu1 %v6517_v5  ;;  %v6533_v33 = vld [vmem:[#allocation8 + $0x2c8] ss:$16 sps:$4 sm:$0xff]  }
 0x377   : > { %v2976_v14 = vmul.bf16 1045249613, %v2944_v16  ;;  %v2660_v24 = vpop.f32.mrb[44].mxu0 }
 0x378   : > { %v2886_v1 = vpop.f32.mrb[44].mxu1  ;;  %v2662_v25 = vpop.f32.mrb[45].mxu0  ;;  %v5697_v26 = vadd.f32 %v2660_v24, %v7519_v59  ;;  %v3007_v34 = vmax.bf16 %v2975_v13, %v2943_v17  ;;  %v6538_v13 = vld [vmem:[#allocation8 + $0x2e4] ss:$16 sps:$4 sm:$0xff]  }
 0x379   : > { %v2888_v27 = vpop.f32.mrb[45].mxu1  ;;  %3941 = vmatpush1.bf16.msra.mxu0 %v6512_v18  ;;  %v2664_v28 = vpop.f32.mrb[46].mxu0  ;;  %4167 = vmatpush1.bf16.msra.mxu1 %v6515_v20  ;;  %v3008_v29 = vmax.bf16 %v2976_v14, %v2944_v16  ;;  %v5729_v61 = vadd.f32 %v2886_v1, %v7522_v44  ;;  %v5698_v38 = vadd.f32 %v2662_v25, %v7525_v60 }
 0x37a   : > { %v5699_v31 = vadd.f32 %v2664_v28, %v7519_v59  ;;  %v2890_v21 = vpop.f32.mrb[46].mxu1  ;;  %v2666_v57 = vpop.f32.mrb[47].mxu0  ;;  %3942 = vmatprep.subr.bf16.mxu0 %v6520_v43  ;;  %4168 = vmatprep.subr.bf16.mxu1 %v6523_v23  ;;  %v5730_v0 = vadd.f32 %v2888_v27, %v7528_v47  ;;  %v6541_v43 = vld [vmem:[#allocation8 + $0x2ec] ss:$16 sps:$4 sm:$0xff]  }
 0x37b   : > { %v5731_v56 = vadd.f32 %v2890_v21, %v7522_v44  ;;  %v5700_v40 = vadd.f32 %v2666_v57, %v7525_v60  ;;  %v2892_v42 = vpop.f32.mrb[47].mxu1  ;;  %3873 = vmatprep.mubr.bf16.mxu0 %v3008_v29  ;;  %4099 = vmatprep.mubr.bf16.mxu1 %v3008_v29  ;;  %v6544_v21 = vld [vmem:[#allocation8 + $0x304] ss:$16 sps:$4 sm:$0xff]   ;;  %v6547_v57 = vld [vmem:[#allocation8 + $0x30c] ss:$16 sps:$4 sm:$0xff]  }
 0x37c   : > { %v2947_v19 = vpack.c.bf16 %v5699_v31, %v5697_v26  ;;  %v5732_v62 = vadd.f32 %v2892_v42, %v7528_v47  ;;  %3874 = vmatmul.mubr.bf16.gmra.mrb[72].mxu0 %v3007_v34  ;;  %4100 = vmatmul.mubr.bf16.gmra.mrb[72].mxu1 %v3007_v34 }
 0x37d   : > { %v7574_v45 = vpack.c.bf16 %v5731_v56, %v5729_v61  ;;  %v2948_v46 = vpack.c.bf16 %v5700_v40, %v5698_v38  ;;  %3943 = vmatpush1.bf16.msra.mxu0 %v6518_v30  ;;  %4169 = vmatpush1.bf16.msra.mxu1 %v6521_v41  ;;  %v6536_v30 = vld [vmem:[#allocation8 + $0x2e0] ss:$16 sps:$4 sm:$0xff]   ;;  %v6539_v41 = vld [vmem:[#allocation8 + $0x2e8] ss:$16 sps:$4 sm:$0xff]  }
 0x37e   : > { %v2979_v52 = vmul.bf16 1045249613, %v2947_v19  ;;  %v7576_v58 = vpack.c.bf16 %v5732_v62, %v5730_v0  ;;  %3944 = vmatprep.subr.bf16.mxu0 %v6526_v36  ;;  %4170 = vmatprep.subr.bf16.mxu1 %v6529_v37  ;;  %v6545_v62 = vld [vmem:[#allocation8 + $0x308] ss:$16 sps:$4 sm:$0xff]  }
 0x37f   : > { %v2980_v35 = vmul.bf16 1045249613, %v2948_v46  ;;  %v2670_v2 = vpop.f32.mrb[48].mxu0 }
 0x380   : > { %v2896_v3 = vpop.f32.mrb[48].mxu1  ;;  %v2672_v4 = vpop.f32.mrb[49].mxu0  ;;  %v5701_v5 = vadd.f32 %v2670_v2, %v7519_v59  ;;  %v3011_v20 = vmax.bf16 %v2979_v52, %v2947_v19  ;;  %v6542_v19 = vld [vmem:[#allocation8 + $0x300] ss:$16 sps:$4 sm:$0xff]  }
 0x381   : > { %v2898_v6 = vpop.f32.mrb[49].mxu1  ;;  %3945 = vmatpush1.bf16.msra.mxu0 %v6524_v48  ;;  %v2674_v7 = vpop.f32.mrb[50].mxu0  ;;  %4171 = vmatpush1.bf16.msra.mxu1 %v6527_v49  ;;  %v3012_v15 = vmax.bf16 %v2980_v35, %v2948_v46  ;;  %v5733_v17 = vadd.f32 %v2896_v3, %v7522_v44  ;;  %v5702_v23 = vadd.f32 %v2672_v4, %v7525_v60  ;;  %v6553_v35 = vld [vmem:[#allocation8 + $0x32c] ss:$16 sps:$4 sm:$0xff]  }
 0x382   : > { %v5703_v11 = vadd.f32 %v2674_v7, %v7519_v59  ;;  %v2900_v16 = vpop.f32.mrb[50].mxu1  ;;  %v2676_v18 = vpop.f32.mrb[51].mxu0  ;;  %3946 = vmatprep.subr.bf16.mxu0 %v6532_v51  ;;  %4172 = vmatprep.subr.bf16.mxu1 %v6535_v63  ;;  %v5734_v25 = vadd.f32 %v2898_v6, %v7528_v47  ;;  %v6550_v63 = vld [vmem:[#allocation8 + $0x324] ss:$16 sps:$4 sm:$0xff]  }
 0x383   : > { %v5735_v14 = vadd.f32 %v2900_v16, %v7522_v44  ;;  %v5704_v24 = vadd.f32 %v2676_v18, %v7525_v60  ;;  %v2902_v1 = vpop.f32.mrb[51].mxu1  ;;  %3883 = vmatprep.mubr.bf16.mxu0 %v3012_v15  ;;  %4109 = vmatprep.mubr.bf16.mxu1 %v3012_v15 }
 0x384   : > { %v2951_v26 = vpack.c.bf16 %v5703_v11, %v5701_v5  ;;  %v5736_v27 = vadd.f32 %v2902_v1, %v7528_v47  ;;  %3884 = vmatmul.mubr.bf16.gmra.mrb[76].mxu0 %v3011_v20  ;;  %4110 = vmatmul.mubr.bf16.gmra.mrb[76].mxu1 %v3011_v20  ;;  %v6551_v11 = vld [vmem:[#allocation8 + $0x328] ss:$16 sps:$4 sm:$0xff]   ;;  %v6556_v20 = vld [vmem:[#allocation8 + $0x344] ss:$16 sps:$4 sm:$0xff]  }
 0x385   : > { %v7586_v28 = vpack.c.bf16 %v5735_v14, %v5733_v17  ;;  %v2952_v29 = vpack.c.bf16 %v5704_v24, %v5702_v23  ;;  %3947 = vmatpush1.bf16.msra.mxu0 %v6530_v9  ;;  %4173 = vmatpush1.bf16.msra.mxu1 %v6533_v33  ;;  %v6548_v17 = vld [vmem:[#allocation8 + $0x320] ss:$16 sps:$4 sm:$0xff]  }
 0x386   : > { %v2983_v61 = vmul.bf16 1045249613, %v2951_v26  ;;  %v7588_v31 = vpack.c.bf16 %v5736_v27, %v5734_v25  ;;  %3948 = vmatprep.subr.bf16.mxu0 %v6538_v13  ;;  %4174 = vmatprep.subr.bf16.mxu1 %v6541_v43  ;;  %v6559_v13 = vld [vmem:[#allocation8 + $0x34c] ss:$16 sps:$4 sm:$0xff]  }
 0x387   : > { %v2984_v34 = vmul.bf16 1045249613, %v2952_v29  ;;  %v2680_v36 = vpop.f32.mrb[52].mxu0 }
 0x388   : > { %v2906_v37 = vpop.f32.mrb[52].mxu1  ;;  %v2682_v38 = vpop.f32.mrb[53].mxu0  ;;  %v5705_v56 = vadd.f32 %v2680_v36, %v7519_v59  ;;  %v3015_v51 = vmax.bf16 %v2983_v61, %v2951_v26  ;;  %v6562_v36 = vld [vmem:[#allocation8 + $0x364] ss:$16 sps:$4 sm:$0xff]  }
 0x389   : > { %v2908_v40 = vpop.f32.mrb[53].mxu1  ;;  %3949 = vmatpush1.bf16.msra.mxu0 %v6536_v30  ;;  %v2684_v42 = vpop.f32.mrb[54].mxu0  ;;  %4175 = vmatpush1.bf16.msra.mxu1 %v6539_v41  ;;  %v3016_v0 = vmax.bf16 %v2984_v34, %v2952_v29  ;;  %v5737_v46 = vadd.f32 %v2906_v37, %v7522_v44  ;;  %v5706_v2 = vadd.f32 %v2682_v38, %v7525_v60  ;;  %v6554_v29 = vld [vmem:[#allocation8 + $0x340] ss:$16 sps:$4 sm:$0xff]   ;;  %v6557_v30 = vld [vmem:[#allocation8 + $0x348] ss:$16 sps:$4 sm:$0xff]  }
 0x38a   : > { %v5707_v48 = vadd.f32 %v2684_v42, %v7519_v59  ;;  %v2910_v49 = vpop.f32.mrb[54].mxu1  ;;  %v2686_v52 = vpop.f32.mrb[55].mxu0  ;;  %3950 = vmatprep.subr.bf16.mxu0 %v6544_v21  ;;  %4176 = vmatprep.subr.bf16.mxu1 %v6547_v57  ;;  %v5738_v6 = vadd.f32 %v2908_v40, %v7528_v47  ;;  %v6565_v37 = vld [vmem:[#allocation8 + $0x36c] ss:$16 sps:$4 sm:$0xff]  }
 0x38b   : > { %v5739_v3 = vadd.f32 %v2910_v49, %v7522_v44  ;;  %v5708_v4 = vadd.f32 %v2686_v52, %v7525_v60  ;;  %v2912_v5 = vpop.f32.mrb[55].mxu1  ;;  %3893 = vmatprep.mubr.bf16.mxu0 %v3016_v0  ;;  %4119 = vmatprep.mubr.bf16.mxu1 %v3016_v0  ;;  %v6560_v49 = vld [vmem:[#allocation8 + $0x360] ss:$16 sps:$4 sm:$0xff]   ;;  %v6563_v52 = vld [vmem:[#allocation8 + $0x368] ss:$16 sps:$4 sm:$0xff]  }
 0x38c   : > { %v2955_v7 = vpack.c.bf16 %v5707_v48, %v5705_v56  ;;  %v5740_v15 = vadd.f32 %v2912_v5, %v7528_v47  ;;  %3894 = vmatmul.mubr.bf16.gmra.mrb[80].mxu0 %v3015_v51  ;;  %4120 = vmatmul.mubr.bf16.gmra.mrb[80].mxu1 %v3015_v51 }
 0x38d   : > { %v7598_v9 = vpack.c.bf16 %v5739_v3, %v5737_v46  ;;  %v2956_v33 = vpack.c.bf16 %v5708_v4, %v5706_v2  ;;  %3951 = vmatpush1.bf16.msra.mxu0 %v6542_v19  ;;  %4177 = vmatpush1.bf16.msra.mxu1 %v6545_v62  ;;  %v6571_v2 = vld [vmem:[#allocation8 + $0x38c] ss:$16 sps:$4 sm:$0xff]  }
 0x38e   : > { %v2987_v16 = vmul.bf16 1045249613, %v2955_v7  ;;  %v7600_v18 = vpack.c.bf16 %v5740_v15, %v5738_v6  ;;  %3952 = vmatprep.subr.bf16.mxu0 %v6550_v63  ;;  %4178 = vmatprep.subr.bf16.mxu1 %v6553_v35  ;;  %v6568_v35 = vld [vmem:[#allocation8 + $0x384] ss:$16 sps:$4 sm:$0xff]  }
 0x38f   : > { %v2988_v43 = vmul.bf16 1045249613, %v2956_v33  ;;  %v2690_v23 = vpop.f32.mrb[56].mxu0 }
 0x390   : > { %v2916_v14 = vpop.f32.mrb[56].mxu1  ;;  %v2692_v24 = vpop.f32.mrb[57].mxu0  ;;  %v5709_v1 = vadd.f32 %v2690_v23, %v7519_v59  ;;  %v3019_v34 = vmax.bf16 %v2987_v16, %v2955_v7  ;;  %v6569_v16 = vld [vmem:[#allocation8 + $0x388] ss:$16 sps:$4 sm:$0xff]  }
 0x391   : > { %v2918_v25 = vpop.f32.mrb[57].mxu1  ;;  %3953 = vmatpush1.bf16.msra.mxu0 %v6548_v17  ;;  %v2694_v26 = vpop.f32.mrb[58].mxu0  ;;  %4179 = vmatpush1.bf16.msra.mxu1 %v6551_v11  ;;  %v3020_v27 = vmax.bf16 %v2988_v43, %v2956_v33  ;;  %v5741_v41 = vadd.f32 %v2916_v14, %v7522_v44  ;;  %v5710_v38 = vadd.f32 %v2692_v24, %v7525_v60  ;;  %v6566_v11 = vld [vmem:[#allocation8 + $0x380] ss:$16 sps:$4 sm:$0xff]   ;;  %v6574_v24 = vld [vmem:[#allocation8 + $0x3a4] ss:$16 sps:$4 sm:$0xff]  }
 0x392   : > { %v5711_v61 = vadd.f32 %v2694_v26, %v7519_v59  ;;  %v2920_v21 = vpop.f32.mrb[58].mxu1  ;;  %v2696_v57 = vpop.f32.mrb[59].mxu0  ;;  %3954 = vmatprep.subr.bf16.mxu0 %v6556_v20  ;;  %4180 = vmatprep.subr.bf16.mxu1 %v6559_v13  ;;  %v5742_v0 = vadd.f32 %v2918_v25, %v7528_v47 }
 0x393   : > { %v5743_v56 = vadd.f32 %v2920_v21, %v7522_v44  ;;  %v5712_v40 = vadd.f32 %v2696_v57, %v7525_v60  ;;  %v2922_v42 = vpop.f32.mrb[59].mxu1  ;;  %3903 = vmatprep.mubr.bf16.mxu0 %v3020_v27  ;;  %4129 = vmatprep.mubr.bf16.mxu1 %v3020_v27  ;;  %v6572_v57 = vld [vmem:[#allocation8 + $0x3a0] ss:$16 sps:$4 sm:$0xff]  }
 0x394   : > { %v2959_v19 = vpack.c.bf16 %v5711_v61, %v5709_v1  ;;  %v5744_v62 = vadd.f32 %v2922_v42, %v7528_v47  ;;  %3904 = vmatmul.mubr.bf16.gmra.mrb[84].mxu0 %v3019_v34  ;;  %4130 = vmatmul.mubr.bf16.gmra.mrb[84].mxu1 %v3019_v34  ;;  %v6577_v1 = vld [vmem:[#allocation8 + $0x3ac] ss:$16 sps:$4 sm:$0xff]   ;;  %v6575_v34 = vld [vmem:[#allocation8 + $0x3a8] ss:$16 sps:$4 sm:$0xff]  }
 0x395   : > { %v7610_v46 = vpack.c.bf16 %v5743_v56, %v5741_v41  ;;  %v2960_v48 = vpack.c.bf16 %v5712_v40, %v5710_v38  ;;  %3955 = vmatpush1.bf16.msra.mxu0 %v6554_v29  ;;  %4181 = vmatpush1.bf16.msra.mxu1 %v6557_v30  ;;  %v2970_v38 = vmul.bf16 1045249613, %v7540_v10  ;;  %v6578_v40 = vld [vmem:[#allocation8 + $0x3c0] ss:$16 sps:$4 sm:$0xff]  }
 0x396   : > { %v2991_v51 = vmul.bf16 1045249613, %v2959_v19  ;;  %v7612_v63 = vpack.c.bf16 %v5744_v62, %v5742_v0  ;;  %3956 = vmatprep.subr.bf16.mxu0 %v6562_v36  ;;  %4182 = vmatprep.subr.bf16.mxu1 %v6565_v37  ;;  %v6583_v37 = vld [vmem:[#allocation8 + $0x3cc] ss:$16 sps:$4 sm:$0xff]   ;;  %v6581_v0 = vld [vmem:[#allocation8 + $0x3c8] ss:$16 sps:$4 sm:$0xff]  }
 0x397   : > { %v2992_v3 = vmul.bf16 1045249613, %v2960_v48  ;;  %v2700_v4 = vpop.f32.mrb[60].mxu0  ;;  %v6586_v62 = vld [vmem:[#allocation8 + $0x3e4] ss:$16 sps:$4 sm:$0xff]  }
 0x398   : > { %v2926_v5 = vpop.f32.mrb[60].mxu1  ;;  %v2702_v6 = vpop.f32.mrb[61].mxu0  ;;  %v5713_v7 = vadd.f32 %v2700_v4, %v7519_v59  ;;  %v3023_v14 = vmax.bf16 %v2991_v51, %v2959_v19  ;;  %v3002_v19 = vmax.bf16 %v2970_v38, %v7540_v10  ;;  %v6587_v51 = vld [vmem:[#allocation8 + $0x3e8] ss:$16 sps:$4 sm:$0xff]   ;;  %v6591_v4 = vld [vmem:[#allocation10] sm:$0xff]  }
 0x399   : > { %v2928_v15 = vpop.f32.mrb[61].mxu1  ;;  %3957 = vmatpush1.bf16.msra.mxu0 %v6560_v49  ;;  %v2704_v33 = vpop.f32.mrb[62].mxu0  ;;  %4183 = vmatpush1.bf16.msra.mxu1 %v6563_v52  ;;  %v3024_v17 = vmax.bf16 %v2992_v3, %v2960_v48  ;;  %v5745_v20 = vadd.f32 %v2926_v5, %v7522_v44  ;;  %v5714_v25 = vadd.f32 %v2702_v6, %v7525_v60  ;;  %v6589_v48 = vld [vmem:[#allocation8 + $0x3ec] ss:$16 sps:$4 sm:$0xff]   ;;  %v6584_v49 = vld [vmem:[#allocation8 + $0x3e0] ss:$16 sps:$4 sm:$0xff]  }
 0x39a   : > { %v5715_v13 = vadd.f32 %v2704_v33, %v7519_v59  ;;  %v2930_v43 = vpop.f32.mrb[62].mxu1  ;;  %v2706_v23 = vpop.f32.mrb[63].mxu0  ;;  %3958 = vmatprep.subr.bf16.mxu0 %v6568_v35  ;;  %4184 = vmatprep.subr.bf16.mxu1 %v6571_v2  ;;  %v5746_v30 = vadd.f32 %v2928_v15, %v7528_v47  ;;  %v2969_v52 = vmul.bf16 1045249613, %v7538_v8  ;;  %v6590_v35 = vld [vmem:[#allocation10 + $0x40] sm:$0xff]   ;;  %v6596_v15 = vld [vmem:[#allocation10 + $0xc8] sm:$0xff]  }
 0x39b   : > { %v5747_v26 = vadd.f32 %v2930_v43, %v7522_v44  ;;  %v5716_v27 = vadd.f32 %v2706_v23, %v7525_v60  ;;  %v2932_v29 = vpop.f32.mrb[63].mxu1  ;;  %3913 = vmatprep.mubr.bf16.mxu0 %v3024_v17  ;;  %4139 = vmatprep.mubr.bf16.mxu1 %v3024_v17  ;;  %v6580_v60 = vld [vmem:[#allocation8 + $0x3c4] ss:$16 sps:$4 sm:$0xff]   ;;  %v2974_v2 = vmul.bf16 1045249613, %v7552_v39  ;;  %v6595_v17 = vld [vmem:[#allocation10 + $0x8] sm:$0xff]  }
 0x39c   : > { %v2963_v41 = vpack.c.bf16 %v5715_v13, %v5713_v7  ;;  %v5748_v59 = vadd.f32 %v2932_v29, %v7528_v47  ;;  %3914 = vmatmul.mubr.bf16.gmra.mrb[88].mxu0 %v3023_v14  ;;  %4140 = vmatmul.mubr.bf16.gmra.mrb[88].mxu1 %v3023_v14  ;;  %v6592_v3 = vld [vmem:[#allocation10 + $0xc0] sm:$0xff]   ;;  %v3001_v10 = vmax.bf16 %v2969_v52, %v7538_v8  ;;  %v6594_v7 = vld [vmem:[#allocation10 + $0x48] sm:$0xff]   ;;  %v2973_v33 = vmul.bf16 1045249613, %v7550_v32  ;;  %v6599_v13 = vld [vmem:[#allocation10 + $0x10] sm:$0xff]  }
 0x39d   : > { %v7622_v61 = vpack.c.bf16 %v5747_v26, %v5745_v20  ;;  %v2964_v21 = vpack.c.bf16 %v5716_v27, %v5714_v25  ;;  %3959 = vmatpush1.bf16.msra.mxu0 %v6566_v11  ;;  %4185 = vmatpush1.bf16.msra.mxu1 %v6569_v16  ;;  %v3006_v5 = vmax.bf16 %v2974_v2, %v7552_v39  ;;  %v6593_v6 = vld [vmem:[#allocation10 + $0x80] sm:$0xff]   ;;  %v2978_v11 = vmul.bf16 1045249613, %v7564_v22  ;;  %v6597_v8 = vld [vmem:[#allocation10 + $0x88] sm:$0xff]   ;;  %v6598_v16 = vld [vmem:[#allocation10 + $0x50] sm:$0xff]  }
 0x39e   : > { %v2995_v44 = vmul.bf16 1045249613, %v2963_v41  ;;  %v7624_v36 = vpack.c.bf16 %v5748_v59, %v5746_v30  ;;  %3960 = vmatprep.subr.bf16.mxu0 %v6574_v24  ;;  %4186 = vmatprep.subr.bf16.mxu1 %v6577_v1  ;;  %v6600_v39 = vld [vmem:[#allocation10 + $0xd0] sm:$0xff]   ;;  %v3005_v20 = vmax.bf16 %v2973_v33, %v7550_v32  ;;  %v6602_v14 = vld [vmem:[#allocation10 + $0x58] sm:$0xff]   ;;  %v2977_v1 = vmul.bf16 1045249613, %v7562_v12 }
 0x39f   : > { %v2996_v56 = vmul.bf16 1045249613, %v2964_v21  ;;  %v3010_v43 = vmax.bf16 %v2978_v11, %v7564_v22  ;;  %v6601_v23 = vld [vmem:[#allocation10 + $0x90] sm:$0xff]   ;;  %v6604_v24 = vld [vmem:[#allocation10 + $0xd8] sm:$0xff]   ;;  %v2982_v32 = vmul.bf16 1045249613, %v7576_v58 }
 0x3a0   : > { %v3027_v42 = vmax.bf16 %v2995_v44, %v2963_v41  ;;  %v6603_v25 = vld [vmem:[#allocation10 + $0x18] sm:$0xff]   ;;  %v6606_v22 = vld [vmem:[#allocation10 + $0x60] sm:$0xff]   ;;  %v3009_v29 = vmax.bf16 %v2977_v1, %v7562_v12  ;;  %v6611_v44 = vld [vmem:[#allocation10 + $0x28] sm:$0xff]   ;;  %v2986_v12 = vmul.bf16 1045249613, %v7588_v31 }
 0x3a1   : > { %3961 = vmatpush1.bf16.msra.mxu0 %v6572_v57  ;;  %4187 = vmatpush1.bf16.msra.mxu1 %v6575_v34  ;;  %v3028_v47 = vmax.bf16 %v2996_v56, %v2964_v21  ;;  %v6605_v26 = vld [vmem:[#allocation10 + $0x98] sm:$0xff]   ;;  %v6608_v27 = vld [vmem:[#allocation10 + $0xe0] sm:$0xff]   ;;  %v3014_v41 = vmax.bf16 %v2982_v32, %v7576_v58  ;;  %v6610_v21 = vld [vmem:[#allocation10 + $0x68] sm:$0xff]   ;;  %v2981_v34 = vmul.bf16 1045249613, %v7574_v45 }
 0x3a2   : > { %3962 = vmatprep.subr.bf16.mxu0 %v6580_v60  ;;  %4188 = vmatprep.subr.bf16.mxu1 %v6583_v37  ;;  %v6607_v30 = vld [vmem:[#allocation10 + $0x20] sm:$0xff]   ;;  %v6612_v57 = vld [vmem:[#allocation10 + $0xe8] sm:$0xff]   ;;  %v6614_v58 = vld [vmem:[#allocation10 + $0x70] sm:$0xff]   ;;  %v2993_v52 = vmul.bf16 1045249613, %v7610_v46 }
 0x3a3   : > { %3923 = vmatprep.mubr.bf16.mxu0 %v3028_v47  ;;  %4149 = vmatprep.mubr.bf16.mxu1 %v3028_v47  ;;  %v6609_v59 = vld [vmem:[#allocation10 + $0xa0] sm:$0xff]   ;;  %v6613_v60 = vld [vmem:[#allocation10 + $0xa8] sm:$0xff]   ;;  %v6616_v37 = vld [vmem:[#allocation10 + $0xf0] sm:$0xff]   ;;  %v3013_v38 = vmax.bf16 %v2981_v34, %v7574_v45  ;;  %v3018_v47 = vmax.bf16 %v2986_v12, %v7588_v31  ;;  %v2989_v31 = vmul.bf16 1045249613, %v7598_v9 }
 0x3a4   : > { %3924 = vmatmul.mubr.bf16.gmra.mrb[92].mxu0 %v3027_v42  ;;  %4150 = vmatmul.mubr.bf16.gmra.mrb[92].mxu1 %v3027_v42  ;;  %v6615_v56 = vld [vmem:[#allocation10 + $0x30] sm:$0xff]   ;;  %v2985_v42 = vmul.bf16 1045249613, %v7586_v28  ;;  %v6619_v2 = vld [vmem:[#allocation10 + $0x38] sm:$0xff]  }
 0x3a5   : > { %3963 = vmatpush1.bf16.msra.mxu0 %v6578_v40  ;;  %3966 = vmatprep.mubr.bf16.mxu0 %v3002_v19  ;;  %v6617_v40 = vld [vmem:[#allocation10 + $0xb0] sm:$0xff]  }
 0x3a6   : > { %4189 = vmatpush1.bf16.msra.mxu1 %v6581_v0  ;;  %4192 = vmatprep.mubr.bf16.mxu1 %v3002_v19  ;;  %v2990_v0 = vmul.bf16 1045249613, %v7600_v18  ;;  %v3017_v45 = vmax.bf16 %v2985_v42, %v7586_v28  ;;  %v2998_v28 = vmul.bf16 1045249613, %v7624_v36 }
 0x3a7   : > { %3964 = vmatprep.subr.bf16.mxu0 %v6586_v62  ;;  %4190 = vmatprep.subr.bf16.mxu1 %v6589_v48  ;;  %v2994_v62 = vmul.bf16 1045249613, %v7612_v63  ;;  %v3021_v48 = vmax.bf16 %v2989_v31, %v7598_v9 }
 0x3a8   : > { %v3022_v19 = vmax.bf16 %v2990_v0, %v7600_v18  ;;  %v3025_v18 = vmax.bf16 %v2993_v52, %v7610_v46  ;;  %v3159_v46 = vld [vmem:[%s7860_s15] sm:$0xf]  ;;  %s6770_s15 = scalar_lea.vmem %s6769_s23, 2048 }
 0x3a9   : > { %3965 = vmatpush1.bf16.msra.mxu0 %v6584_v49  ;;  %v3026_v49 = vmax.bf16 %v2994_v62, %v7612_v63  ;;  %v6618_v63 = vld [vmem:[#allocation10 + $0x78] sm:$0xff]   ;;  %p6772_p2 = scmp.lt.s32.totalorder %s6770_s15, %s6764_s25 }
 0x3aa   : > { %4191 = vmatpush1.bf16.msra.mxu1 %v6587_v51  ;;  %5557 = vmatprep.subr.bf16.mxu0 %v6590_v35  ;;  %v3030_v51 = vmax.bf16 %v2998_v28, %v7624_v36  ;;  %v2997_v35 = vmul.bf16 1045249613, %v7622_v61  ;;  %v7662_v36 = vrot.slane %v3159_v46, %v7369_v53 }
 0x3ab   : > { %5621 = vmatprep.subr.bf16.mxu1 %v6592_v3  ;;  %v6620_v3 = vld [vmem:[#allocation10 + $0xf8] sm:$0xff]   ;;  %p6773_p13 = por %p6772_p2, %p6771_p1 }
 0x3ac   : > { %3967 = vmatmul.mubr.bf16.vlgmr.msra.gmra.mrb[64].mxu0 %v3001_v10  ;;  %v3029_v9 = vmax.bf16 %v2997_v35, %v7622_v61  ;;  %v7665_v61 = vrot.slane %v3159_v46, %v7364_v50 }
 0x3ad   : > { %4193 = vmatmul.mubr.bf16.vlgmr.msra.gmra.mrb[64].mxu1 %v3001_v10  ;;  %3976 = vmatprep.mubr.bf16.mxu0 %v3006_v5  ;;  %v6621_v10 = vld [vmem:[#allocation10 + $0xb8] sm:$0xff]   ;;  %p6774_p9 = pnand %p6773_p13, %p6767_p12 }
 0x3ae   : > { %4202 = vmatprep.mubr.bf16.mxu1 %v3006_v5  ;;  %5558 = vmatpush3.bf16.msra.mxu0 %v6591_v4  ;;  %v7668_v5 = vrot.slane %v3159_v46, %v7371_v54 }
 0x3af   : > { %5622 = vmatpush3.bf16.msra.mxu1 %v6593_v6  ;;  %5559 = vmatprep.subr.bf16.mxu0 %v6594_v7 }
 0x3b0   : > { %5623 = vmatprep.subr.bf16.mxu1 %v6596_v15  ;;  %v7671_v15 = vrot.slane %v3159_v46, %v7373_v55 }
 0x3b2   : > { %5560 = vmatpush3.bf16.msra.mxu0 %v6595_v17 }
 0x3b3   : > { %5624 = vmatpush3.bf16.msra.mxu1 %v6597_v8  ;;  %5561 = vmatprep.subr.bf16.mxu0 %v6598_v16 }
 0x3b4   : > { %3977 = vmatmul.mubr.bf16.gmra.mrb[68].mxu0 %v3005_v20  ;;  %5625 = vmatprep.subr.bf16.mxu1 %v6600_v39 }
 0x3b5   : > { %4203 = vmatmul.mubr.bf16.gmra.mrb[68].mxu1 %v3005_v20  ;;  %3986 = vmatprep.mubr.bf16.mxu0 %v3010_v43 }
 0x3b6   : > { %4212 = vmatprep.mubr.bf16.mxu1 %v3010_v43  ;;  %5562 = vmatpush3.bf16.msra.mxu0 %v6599_v13 }
 0x3b7   : > { %5626 = vmatpush3.bf16.msra.mxu1 %v6601_v23  ;;  %5563 = vmatprep.subr.bf16.mxu0 %v6602_v14 }
 0x3b8   : > { %5627 = vmatprep.subr.bf16.mxu1 %v6604_v24 }
 0x3ba   : > { %5564 = vmatpush3.bf16.msra.mxu0 %v6603_v25 }
 0x3bb   : > { %5628 = vmatpush3.bf16.msra.mxu1 %v6605_v26  ;;  %5565 = vmatprep.subr.bf16.mxu0 %v6606_v22 }
 0x3bc   : > { %3987 = vmatmul.mubr.bf16.gmra.mrb[72].mxu0 %v3009_v29  ;;  %5629 = vmatprep.subr.bf16.mxu1 %v6608_v27 }
 0x3bd   : > { %4213 = vmatmul.mubr.bf16.gmra.mrb[72].mxu1 %v3009_v29  ;;  %3996 = vmatprep.mubr.bf16.mxu0 %v3014_v41 }
 0x3be   : > { %4222 = vmatprep.mubr.bf16.mxu1 %v3014_v41  ;;  %5566 = vmatpush3.bf16.msra.mxu0 %v6607_v30 }
 0x3bf   : > { %5630 = vmatpush3.bf16.msra.mxu1 %v6609_v59  ;;  %5567 = vmatprep.subr.bf16.mxu0 %v6610_v21 }
 0x3c0   : > { %5631 = vmatprep.subr.bf16.mxu1 %v6612_v57 }
 0x3c2   : > { %5568 = vmatpush3.bf16.msra.mxu0 %v6611_v44 }
 0x3c3   : > { %5632 = vmatpush3.bf16.msra.mxu1 %v6613_v60  ;;  %5569 = vmatprep.subr.bf16.mxu0 %v6614_v58 }
 0x3c4   : > { %3997 = vmatmul.mubr.bf16.gmra.mrb[76].mxu0 %v3013_v38  ;;  %5633 = vmatprep.subr.bf16.mxu1 %v6616_v37 }
 0x3c5   : > { %4223 = vmatmul.mubr.bf16.gmra.mrb[76].mxu1 %v3013_v38  ;;  %4006 = vmatprep.mubr.bf16.mxu0 %v3018_v47 }
 0x3c6   : > { %4232 = vmatprep.mubr.bf16.mxu1 %v3018_v47  ;;  %5570 = vmatpush3.bf16.msra.mxu0 %v6615_v56 }
 0x3c7   : > { %5634 = vmatpush3.bf16.msra.mxu1 %v6617_v40  ;;  %5571 = vmatprep.subr.bf16.mxu0 %v6618_v63 }
 0x3c8   : > { %5635 = vmatprep.subr.bf16.mxu1 %v6620_v3 }
 0x3ca   : > { %5572 = vmatpush3.bf16.msra.mxu0 %v6619_v2 }
 0x3cb   : > { %5636 = vmatpush3.bf16.msra.mxu1 %v6621_v10 }
 0x3cc   : > { %4007 = vmatmul.mubr.bf16.gmra.mrb[80].mxu0 %v3017_v45 }
 0x3cd   : > { %4233 = vmatmul.mubr.bf16.gmra.mrb[80].mxu1 %v3017_v45  ;;  %4016 = vmatprep.mubr.bf16.mxu0 %v3022_v19 }
 0x3ce   : > { %4242 = vmatprep.mubr.bf16.mxu1 %v3022_v19 }
 0x3d4   : > { %4017 = vmatmul.mubr.bf16.gmra.mrb[84].mxu0 %v3021_v48 }
 0x3d5   : > { %4243 = vmatmul.mubr.bf16.gmra.mrb[84].mxu1 %v3021_v48  ;;  %4026 = vmatprep.mubr.bf16.mxu0 %v3026_v49 }
 0x3d6   : > { %4252 = vmatprep.mubr.bf16.mxu1 %v3026_v49 }
 0x3dc   : > { %4027 = vmatmul.mubr.bf16.gmra.mrb[88].mxu0 %v3025_v18 }
 0x3dd   : > { %4253 = vmatmul.mubr.bf16.gmra.mrb[88].mxu1 %v3025_v18  ;;  %4036 = vmatprep.mubr.bf16.mxu0 %v3030_v51 }
 0x3de   : > { %4262 = vmatprep.mubr.bf16.mxu1 %v3030_v51 }
 0x3e4   : > { %4037 = vmatmul.mubr.bf16.gmra.mrb[92].mxu0 %v3029_v9 }
 0x3e5   : > { %4263 = vmatmul.mubr.bf16.gmra.mrb[92].mxu1 %v3029_v9 }
 0x47f   : > { %v3968_v4 = vpop.f32.mrb[64].mxu0 }
 0x480   : > { %v4194_v6 = vpop.f32.mrb[64].mxu1  ;;  %v3970_v7 = vpop.f32.mrb[65].mxu0  ;;  %v5749_v11 = vadd.f32 %v3968_v4, %v7662_v36 }
 0x481   : > { %v4196_v33 = vpop.f32.mrb[65].mxu1  ;;  %v3972_v17 = vpop.f32.mrb[66].mxu0  ;;  %v5781_v39 = vadd.f32 %v4194_v6, %v7665_v61  ;;  %v5750_v50 = vadd.f32 %v3970_v7, %v7668_v5 }
 0x482   : > { %v5751_v8 = vadd.f32 %v3972_v17, %v7662_v36  ;;  %v4198_v53 = vpop.f32.mrb[66].mxu1  ;;  %v3974_v16 = vpop.f32.mrb[67].mxu0  ;;  %v5782_v55 = vadd.f32 %v4196_v33, %v7671_v15 }
 0x483   : > { %v5783_v54 = vadd.f32 %v4198_v53, %v7665_v61  ;;  %v5752_v20 = vadd.f32 %v3974_v16, %v7668_v5  ;;  %v4200_v13 = vpop.f32.mrb[67].mxu1 }
 0x484   : > { %v4273_v43 = vpack.c.bf16 %v5751_v8, %v5749_v11  ;;  %v5784_v23 = vadd.f32 %v4200_v13, %v7671_v15 }
 0x485   : > { %v4275_v14 = vpack.c.bf16 %v5783_v54, %v5781_v39  ;;  %v4274_v24 = vpack.c.bf16 %v5752_v20, %v5750_v50 }
 0x486   : > { %v4305_v1 = vmul.bf16 1045249613, %v4273_v43  ;;  %v4276_v25 = vpack.c.bf16 %v5784_v23, %v5782_v55 }
 0x487   : > { %v4307_v32 = vmul.bf16 1045249613, %v4275_v14  ;;  %v4306_v26 = vmul.bf16 1045249613, %v4274_v24  ;;  %v3978_v22 = vpop.f32.mrb[68].mxu0 }
 0x488   : > { %v4308_v27 = vmul.bf16 1045249613, %v4276_v25  ;;  %v4204_v29 = vpop.f32.mrb[68].mxu1  ;;  %v3980_v30 = vpop.f32.mrb[69].mxu0  ;;  %v4337_v41 = vmax.bf16 %v4305_v1, %v4273_v43  ;;  %v5753_v44 = vadd.f32 %v3978_v22, %v7662_v36 }
 0x489   : > { %v4206_v59 = vpop.f32.mrb[69].mxu1  ;;  %v3982_v21 = vpop.f32.mrb[70].mxu0  ;;  %v4338_v57 = vmax.bf16 %v4306_v26, %v4274_v24  ;;  %v4339_v34 = vmax.bf16 %v4307_v32, %v4275_v14  ;;  %v5785_v38 = vadd.f32 %v4204_v29, %v7665_v61  ;;  %v5754_v56 = vadd.f32 %v3980_v30, %v7668_v5 }
 0x48a   : > { %v5755_v12 = vadd.f32 %v3982_v21, %v7662_v36  ;;  %v4208_v60 = vpop.f32.mrb[70].mxu1  ;;  %v3984_v58 = vpop.f32.mrb[71].mxu0  ;;  %v4340_v37 = vmax.bf16 %v4308_v27, %v4276_v25  ;;  %v5786_v0 = vadd.f32 %v4206_v59, %v7671_v15 }
 0x48b   : > { %v5787_v47 = vadd.f32 %v4208_v60, %v7665_v61  ;;  %v5756_v40 = vadd.f32 %v3984_v58, %v7668_v5  ;;  %v4210_v42 = vpop.f32.mrb[71].mxu1  ;;  %4664 = vmatprep.mubr.bf16.mxu0 %v4338_v57 }
 0x48c   : > { %v4277_v45 = vpack.c.bf16 %v5755_v12, %v5753_v44  ;;  %v5788_v19 = vadd.f32 %v4210_v42, %v7671_v15  ;;  %4761 = vmatprep.mubr.bf16.mxu1 %v4340_v37  ;;  %4665 = vmatmul.mubr.bf16.vlgmr.msra.gmra.mrb[96].mxu0 %v4337_v41 }
 0x48d   : > { %v4279_v31 = vpack.c.bf16 %v5787_v47, %v5785_v38  ;;  %v4278_v62 = vpack.c.bf16 %v5756_v40, %v5754_v56  ;;  %4762 = vmatmul.mubr.bf16.vlgmr.msra.gmra.mrb[96].mxu1 %v4339_v34 }
 0x48e   : > { %v4309_v48 = vmul.bf16 1045249613, %v4277_v45  ;;  %v4280_v49 = vpack.c.bf16 %v5788_v19, %v5786_v0 }
 0x48f   : > { %v4311_v52 = vmul.bf16 1045249613, %v4279_v31  ;;  %v4310_v28 = vmul.bf16 1045249613, %v4278_v62  ;;  %v3988_v18 = vpop.f32.mrb[72].mxu0 }
 0x490   : > { %v4312_v51 = vmul.bf16 1045249613, %v4280_v49  ;;  %v4214_v35 = vpop.f32.mrb[72].mxu1  ;;  %v3990_v9 = vpop.f32.mrb[73].mxu0  ;;  %v5757_v63 = vadd.f32 %v3988_v18, %v7662_v36  ;;  %v4341_v17 = vmax.bf16 %v4309_v48, %v4277_v45 }
 0x491   : > { %v4216_v2 = vpop.f32.mrb[73].mxu1  ;;  %v3992_v3 = vpop.f32.mrb[74].mxu0  ;;  %v4342_v10 = vmax.bf16 %v4310_v28, %v4278_v62  ;;  %v5789_v46 = vadd.f32 %v4214_v35, %v7665_v61  ;;  %v5758_v11 = vadd.f32 %v3990_v9, %v7668_v5  ;;  %v4343_v39 = vmax.bf16 %v4311_v52, %v4279_v31 }
 0x492   : > { %v5759_v4 = vadd.f32 %v3992_v3, %v7662_v36  ;;  %v4218_v6 = vpop.f32.mrb[74].mxu1  ;;  %v3994_v7 = vpop.f32.mrb[75].mxu0  ;;  %v4344_v33 = vmax.bf16 %v4312_v51, %v4280_v49  ;;  %v5790_v50 = vadd.f32 %v4216_v2, %v7671_v15 }
 0x493   : > { %v5791_v8 = vadd.f32 %v4218_v6, %v7665_v61  ;;  %v5760_v53 = vadd.f32 %v3994_v7, %v7668_v5  ;;  %v4220_v16 = vpop.f32.mrb[75].mxu1  ;;  %4672 = vmatprep.mubr.bf16.mxu0 %v4342_v10 }
 0x494   : > { %v4281_v54 = vpack.c.bf16 %v5759_v4, %v5757_v63  ;;  %v5792_v20 = vadd.f32 %v4220_v16, %v7671_v15  ;;  %4769 = vmatprep.mubr.bf16.mxu1 %v4344_v33  ;;  %4673 = vmatmul.mubr.bf16.gmra.mrb[100].mxu0 %v4341_v17 }
 0x495   : > { %v4283_v13 = vpack.c.bf16 %v5791_v8, %v5789_v46  ;;  %v4282_v55 = vpack.c.bf16 %v5760_v53, %v5758_v11  ;;  %4770 = vmatmul.mubr.bf16.gmra.mrb[100].mxu1 %v4343_v39 }
 0x496   : > { %v4313_v43 = vmul.bf16 1045249613, %v4281_v54  ;;  %v4284_v23 = vpack.c.bf16 %v5792_v20, %v5790_v50 }
 0x497   : > { %v4315_v14 = vmul.bf16 1045249613, %v4283_v13  ;;  %v4314_v24 = vmul.bf16 1045249613, %v4282_v55  ;;  %v3998_v1 = vpop.f32.mrb[76].mxu0 }
 0x498   : > { %v4316_v25 = vmul.bf16 1045249613, %v4284_v23  ;;  %v4224_v32 = vpop.f32.mrb[76].mxu1  ;;  %v4000_v26 = vpop.f32.mrb[77].mxu0  ;;  %v5761_v22 = vadd.f32 %v3998_v1, %v7662_v36  ;;  %v4345_v44 = vmax.bf16 %v4313_v43, %v4281_v54 }
 0x499   : > { %v4226_v27 = vpop.f32.mrb[77].mxu1  ;;  %v4002_v29 = vpop.f32.mrb[78].mxu0  ;;  %v4346_v30 = vmax.bf16 %v4314_v24, %v4282_v55  ;;  %v5793_v41 = vadd.f32 %v4224_v32, %v7665_v61  ;;  %v5762_v12 = vadd.f32 %v4000_v26, %v7668_v5  ;;  %v4347_v38 = vmax.bf16 %v4315_v14, %v4283_v13 }
 0x49a   : > { %v5763_v59 = vadd.f32 %v4002_v29, %v7662_v36  ;;  %v4228_v21 = vpop.f32.mrb[78].mxu1  ;;  %v4004_v57 = vpop.f32.mrb[79].mxu0  ;;  %v4348_v34 = vmax.bf16 %v4316_v25, %v4284_v23  ;;  %v5794_v56 = vadd.f32 %v4226_v27, %v7671_v15 }
 0x49b   : > { %v5795_v60 = vadd.f32 %v4228_v21, %v7665_v61  ;;  %v5764_v58 = vadd.f32 %v4004_v57, %v7668_v5  ;;  %v4230_v37 = vpop.f32.mrb[79].mxu1  ;;  %4680 = vmatprep.mubr.bf16.mxu0 %v4346_v30 }
 0x49c   : > { %v4285_v47 = vpack.c.bf16 %v5763_v59, %v5761_v22  ;;  %v5796_v40 = vadd.f32 %v4230_v37, %v7671_v15  ;;  %4777 = vmatprep.mubr.bf16.mxu1 %v4348_v34  ;;  %4681 = vmatmul.mubr.bf16.gmra.mrb[104].mxu0 %v4345_v44 }
 0x49d   : > { %v4287_v42 = vpack.c.bf16 %v5795_v60, %v5793_v41  ;;  %v4286_v0 = vpack.c.bf16 %v5764_v58, %v5762_v12  ;;  %4778 = vmatmul.mubr.bf16.gmra.mrb[104].mxu1 %v4347_v38 }
 0x49e   : > { %v4317_v45 = vmul.bf16 1045249613, %v4285_v47  ;;  %v4288_v19 = vpack.c.bf16 %v5796_v40, %v5794_v56 }
 0x49f   : > { %v4319_v31 = vmul.bf16 1045249613, %v4287_v42  ;;  %v4318_v62 = vmul.bf16 1045249613, %v4286_v0  ;;  %v4008_v48 = vpop.f32.mrb[80].mxu0 }
 0x4a0   : > { %v4320_v49 = vmul.bf16 1045249613, %v4288_v19  ;;  %v4234_v52 = vpop.f32.mrb[80].mxu1  ;;  %v4010_v28 = vpop.f32.mrb[81].mxu0  ;;  %v5765_v18 = vadd.f32 %v4008_v48, %v7662_v36  ;;  %v4349_v4 = vmax.bf16 %v4317_v45, %v4285_v47 }
 0x4a1   : > { %v4236_v51 = vpop.f32.mrb[81].mxu1  ;;  %v4012_v35 = vpop.f32.mrb[82].mxu0  ;;  %v4350_v9 = vmax.bf16 %v4318_v62, %v4286_v0  ;;  %v5797_v63 = vadd.f32 %v4234_v52, %v7665_v61  ;;  %v5766_v6 = vadd.f32 %v4010_v28, %v7668_v5  ;;  %v4351_v11 = vmax.bf16 %v4319_v31, %v4287_v42 }
 0x4a2   : > { %v5767_v2 = vadd.f32 %v4012_v35, %v7662_v36  ;;  %v4238_v3 = vpop.f32.mrb[82].mxu1  ;;  %v4014_v10 = vpop.f32.mrb[83].mxu0  ;;  %v4352_v46 = vmax.bf16 %v4320_v49, %v4288_v19  ;;  %v5798_v8 = vadd.f32 %v4236_v51, %v7671_v15 }
 0x4a3   : > { %v5799_v7 = vadd.f32 %v4238_v3, %v7665_v61  ;;  %v5768_v33 = vadd.f32 %v4014_v10, %v7668_v5  ;;  %v4240_v17 = vpop.f32.mrb[83].mxu1  ;;  %4688 = vmatprep.mubr.bf16.mxu0 %v4350_v9 }
 0x4a4   : > { %v4289_v53 = vpack.c.bf16 %v5767_v2, %v5765_v18  ;;  %v5800_v16 = vadd.f32 %v4240_v17, %v7671_v15  ;;  %4785 = vmatprep.mubr.bf16.mxu1 %v4352_v46  ;;  %4689 = vmatmul.mubr.bf16.gmra.mrb[108].mxu0 %v4349_v4 }
 0x4a5   : > { %v4291_v39 = vpack.c.bf16 %v5799_v7, %v5797_v63  ;;  %v4290_v50 = vpack.c.bf16 %v5768_v33, %v5766_v6  ;;  %4786 = vmatmul.mubr.bf16.gmra.mrb[108].mxu1 %v4351_v11 }
 0x4a6   : > { %v4321_v54 = vmul.bf16 1045249613, %v4289_v53  ;;  %v4292_v20 = vpack.c.bf16 %v5800_v16, %v5798_v8 }
 0x4a7   : > { %v4323_v13 = vmul.bf16 1045249613, %v4291_v39  ;;  %v4322_v55 = vmul.bf16 1045249613, %v4290_v50  ;;  %v4018_v43 = vpop.f32.mrb[84].mxu0 }
 0x4a8   : > { %v4324_v23 = vmul.bf16 1045249613, %v4292_v20  ;;  %v4244_v14 = vpop.f32.mrb[84].mxu1  ;;  %v4020_v24 = vpop.f32.mrb[85].mxu0  ;;  %v5769_v1 = vadd.f32 %v4018_v43, %v7662_v36  ;;  %v4353_v59 = vmax.bf16 %v4321_v54, %v4289_v53 }
 0x4a9   : > { %v4246_v25 = vpop.f32.mrb[85].mxu1  ;;  %v4022_v32 = vpop.f32.mrb[86].mxu0  ;;  %v4354_v26 = vmax.bf16 %v4322_v55, %v4290_v50  ;;  %v5801_v22 = vadd.f32 %v4244_v14, %v7665_v61  ;;  %v5770_v21 = vadd.f32 %v4020_v24, %v7668_v5  ;;  %v4355_v12 = vmax.bf16 %v4323_v13, %v4291_v39 }
 0x4aa   : > { %v5771_v27 = vadd.f32 %v4022_v32, %v7662_v36  ;;  %v4248_v29 = vpop.f32.mrb[86].mxu1  ;;  %v4024_v30 = vpop.f32.mrb[87].mxu0  ;;  %v4356_v41 = vmax.bf16 %v4324_v23, %v4292_v20  ;;  %v5802_v60 = vadd.f32 %v4246_v25, %v7671_v15 }
 0x4ab   : > { %v5803_v57 = vadd.f32 %v4248_v29, %v7665_v61  ;;  %v5772_v34 = vadd.f32 %v4024_v30, %v7668_v5  ;;  %v4250_v44 = vpop.f32.mrb[87].mxu1  ;;  %4696 = vmatprep.mubr.bf16.mxu0 %v4354_v26 }
 0x4ac   : > { %v4293_v58 = vpack.c.bf16 %v5771_v27, %v5769_v1  ;;  %v5804_v37 = vadd.f32 %v4250_v44, %v7671_v15  ;;  %4793 = vmatprep.mubr.bf16.mxu1 %v4356_v41  ;;  %4697 = vmatmul.mubr.bf16.gmra.mrb[112].mxu0 %v4353_v59 }
 0x4ad   : > { %v4295_v38 = vpack.c.bf16 %v5803_v57, %v5801_v22  ;;  %v4294_v56 = vpack.c.bf16 %v5772_v34, %v5770_v21  ;;  %4794 = vmatmul.mubr.bf16.gmra.mrb[112].mxu1 %v4355_v12 }
 0x4ae   : > { %v4325_v47 = vmul.bf16 1045249613, %v4293_v58  ;;  %v4296_v40 = vpack.c.bf16 %v5804_v37, %v5802_v60 }
 0x4af   : > { %v4327_v42 = vmul.bf16 1045249613, %v4295_v38  ;;  %v4326_v0 = vmul.bf16 1045249613, %v4294_v56  ;;  %v4028_v45 = vpop.f32.mrb[88].mxu0 }
 0x4b0   : > { %v4328_v19 = vmul.bf16 1045249613, %v4296_v40  ;;  %v4254_v31 = vpop.f32.mrb[88].mxu1  ;;  %v4030_v62 = vpop.f32.mrb[89].mxu0  ;;  %v5773_v48 = vadd.f32 %v4028_v45, %v7662_v36  ;;  %v4357_v2 = vmax.bf16 %v4325_v47, %v4293_v58 }
 0x4b1   : > { %v4256_v49 = vpop.f32.mrb[89].mxu1  ;;  %v4032_v52 = vpop.f32.mrb[90].mxu0  ;;  %v4358_v28 = vmax.bf16 %v4326_v0, %v4294_v56  ;;  %v5805_v18 = vadd.f32 %v4254_v31, %v7665_v61  ;;  %v5774_v3 = vadd.f32 %v4030_v62, %v7668_v5  ;;  %v4359_v6 = vmax.bf16 %v4327_v42, %v4295_v38  ;;  %v7740_v0 = vld [vmem:[%s7861_s16] ss:$0 sm:$0xff] }
 0x4b2   : > { %v5775_v51 = vadd.f32 %v4032_v52, %v7662_v36  ;;  %v4258_v35 = vpop.f32.mrb[90].mxu1  ;;  %v4034_v9 = vpop.f32.mrb[91].mxu0  ;;  %v4360_v63 = vmax.bf16 %v4328_v19, %v4296_v40  ;;  %v5806_v7 = vadd.f32 %v4256_v49, %v7671_v15 }
 0x4b3   : > { %v5807_v10 = vadd.f32 %v4258_v35, %v7665_v61  ;;  %v5776_v46 = vadd.f32 %v4034_v9, %v7668_v5  ;;  %v4260_v4 = vpop.f32.mrb[91].mxu1  ;;  %4704 = vmatprep.mubr.bf16.mxu0 %v4358_v28 }
 0x4b4   : > { %v4297_v33 = vpack.c.bf16 %v5775_v51, %v5773_v48  ;;  %v5808_v17 = vadd.f32 %v4260_v4, %v7671_v15  ;;  %4801 = vmatprep.mubr.bf16.mxu1 %v4360_v63  ;;  %4705 = vmatmul.mubr.bf16.gmra.mrb[116].mxu0 %v4357_v2 }
 0x4b5   : > { %v4299_v11 = vpack.c.bf16 %v5807_v10, %v5805_v18  ;;  %v4298_v8 = vpack.c.bf16 %v5776_v46, %v5774_v3  ;;  %4802 = vmatmul.mubr.bf16.gmra.mrb[116].mxu1 %v4359_v6 }
 0x4b6   : > { %v4329_v53 = vmul.bf16 1045249613, %v4297_v33  ;;  %v4300_v16 = vpack.c.bf16 %v5808_v17, %v5806_v7 }
 0x4b7   : > { %v4331_v39 = vmul.bf16 1045249613, %v4299_v11  ;;  %v4330_v50 = vmul.bf16 1045249613, %v4298_v8  ;;  %v4038_v54 = vpop.f32.mrb[92].mxu0 }
 0x4b8   : > { %v4332_v20 = vmul.bf16 1045249613, %v4300_v16  ;;  %v4264_v13 = vpop.f32.mrb[92].mxu1  ;;  %v4040_v55 = vpop.f32.mrb[93].mxu0  ;;  %v5777_v43 = vadd.f32 %v4038_v54, %v7662_v36  ;;  %v4361_v27 = vmax.bf16 %v4329_v53, %v4297_v33 }
 0x4b9   : > { %v4266_v23 = vpop.f32.mrb[93].mxu1  ;;  %v4042_v14 = vpop.f32.mrb[94].mxu0  ;;  %v4362_v24 = vmax.bf16 %v4330_v50, %v4298_v8  ;;  %v5809_v1 = vadd.f32 %v4264_v13, %v7665_v61  ;;  %v5778_v29 = vadd.f32 %v4040_v55, %v7668_v5  ;;  %v4363_v21 = vmax.bf16 %v4331_v39, %v4299_v11 }
 0x4ba   : > { %v5779_v25 = vadd.f32 %v4042_v14, %v7662_v36  ;;  %v4268_v32 = vpop.f32.mrb[94].mxu1  ;;  %v4044_v26 = vpop.f32.mrb[95].mxu0  ;;  %v4364_v22 = vmax.bf16 %v4332_v20, %v4300_v16  ;;  %v5810_v57 = vadd.f32 %v4266_v23, %v7671_v15 }
 0x4bb   : > { %v5811_v30 = vadd.f32 %v4268_v32, %v7665_v61  ;;  %v5780_v41 = vadd.f32 %v4044_v26, %v7668_v5  ;;  %v4270_v59 = vpop.f32.mrb[95].mxu1  ;;  %4712 = vmatprep.mubr.bf16.mxu0 %v4362_v24 }
 0x4bc   : > { %v4301_v34 = vpack.c.bf16 %v5779_v25, %v5777_v43  ;;  %v5812_v44 = vadd.f32 %v4270_v59, %v7671_v15  ;;  %4809 = vmatprep.mubr.bf16.mxu1 %v4364_v22  ;;  %4713 = vmatmul.mubr.bf16.gmra.mrb[120].mxu0 %v4361_v27 }
 0x4bd   : > { %v4303_v36 = vpack.c.bf16 %v5811_v30, %v5809_v1  ;;  %v4302_v12 = vpack.c.bf16 %v5780_v41, %v5778_v29  ;;  %4810 = vmatmul.mubr.bf16.gmra.mrb[120].mxu1 %v4363_v21 }
 0x4be   : > { %v4333_v60 = vmul.bf16 1045249613, %v4301_v34  ;;  %v4304_v58 = vpack.c.bf16 %v5812_v44, %v5810_v57 }
 0x4bf   : > { %v4335_v37 = vmul.bf16 1045249613, %v4303_v36  ;;  %v4334_v38 = vmul.bf16 1045249613, %v4302_v12 }
 0x4c0   : > { %v4336_v61 = vmul.bf16 1045249613, %v4304_v58  ;;  %v4365_v47 = vmax.bf16 %v4333_v60, %v4301_v34 }
 0x4c1   : > { %v4366_v56 = vmax.bf16 %v4334_v38, %v4302_v12  ;;  %v4367_v40 = vmax.bf16 %v4335_v37, %v4303_v36 }
 0x4c2   : > { %v4368_v5 = vmax.bf16 %v4336_v61, %v4304_v58 }
 0x4c3   : > { %4720 = vmatprep.mubr.bf16.mxu0 %v4366_v56 }
 0x4c4   : > { %4817 = vmatprep.mubr.bf16.mxu1 %v4368_v5  ;;  %4721 = vmatmul.mubr.bf16.gmra.mrb[124].mxu0 %v4365_v47 }
 0x4c5   : > { %4818 = vmatmul.mubr.bf16.gmra.mrb[124].mxu1 %v4367_v40 }
 0x55f   : > { %v5573_v42 = vpop.f32.mrb[96].mxu0 }
 0x560   : > { %v5637_v15 = vpop.f32.mrb[96].mxu1  ;;  %v5574_v45 = vpop.f32.mrb[97].mxu0 }
 0x561   : > { %v5575_v19 = vadd.f32 %v5574_v45, %v5573_v42  ;;  %v5638_v31 = vpop.f32.mrb[97].mxu1  ;;  %v5576_v62 = vpop.f32.mrb[98].mxu0 }
 0x562   : > { %v5639_v48 = vadd.f32 %v5638_v31, %v5637_v15  ;;  %v5640_v49 = vpop.f32.mrb[98].mxu1  ;;  %v5577_v52 = vpop.f32.mrb[99].mxu0 }
 0x563   : > { %v4667_v28 = vadd.f32 %v5575_v19, %v7740_v0  ;;  %v5578_v18 = vadd.f32 %v5577_v52, %v5576_v62  ;;  %v5641_v51 = vpop.f32.mrb[99].mxu1 }
 0x564   : > { %v5642_v35 = vadd.f32 %v5641_v51, %v5640_v49 }
 0x565   : > { %v4764_v9 = vadd.f32 %v5639_v48, %v4667_v28  ;;  %v4670_v63 = vadd.f32 %v5578_v18, %v7740_v0 }
 0x567   : > { %v4767_v2 = vadd.f32 %v5642_v35, %v4670_v63  ;;  %v5579_v3 = vpop.f32.mrb[100].mxu0 }
 0x568   : > { %v5643_v10 = vpop.f32.mrb[100].mxu1  ;;  %v5580_v46 = vpop.f32.mrb[101].mxu0 }
 0x569   : > { %v5513_v4 = vpack.c.bf16 %v4767_v2, %v4764_v9  ;;  %v5581_v6 = vadd.f32 %v5580_v46, %v5579_v3  ;;  %v5644_v7 = vpop.f32.mrb[101].mxu1  ;;  %v5582_v33 = vpop.f32.mrb[102].mxu0 }
 0x56a   : > { %v5645_v17 = vadd.f32 %v5644_v7, %v5643_v10  ;;  %v5646_v11 = vpop.f32.mrb[102].mxu1  ;;  %v5583_v8 = vpop.f32.mrb[103].mxu0 }
 0x56b   : > { %5514 = vst [vmem:[%s7746_s10] sm:$0xff] %v5513_v4   ;;  %v4675_v53 = vadd.f32 %v5581_v6, %v7740_v0  ;;  %v5584_v16 = vadd.f32 %v5583_v8, %v5582_v33  ;;  %v5647_v39 = vpop.f32.mrb[103].mxu1 }
 0x56c   : > { %v5648_v50 = vadd.f32 %v5647_v39, %v5646_v11 }
 0x56d   : > { %v4772_v54 = vadd.f32 %v5645_v17, %v4675_v53  ;;  %v4678_v20 = vadd.f32 %v5584_v16, %v7740_v0 }
 0x56f   : > { %v4775_v13 = vadd.f32 %v5648_v50, %v4678_v20  ;;  %v5585_v55 = vpop.f32.mrb[104].mxu0 }
 0x570   : > { %v5649_v43 = vpop.f32.mrb[104].mxu1  ;;  %v5586_v23 = vpop.f32.mrb[105].mxu0 }
 0x571   : > { %v5518_v14 = vpack.c.bf16 %v4775_v13, %v4772_v54  ;;  %v5587_v24 = vadd.f32 %v5586_v23, %v5585_v55  ;;  %v5650_v1 = vpop.f32.mrb[105].mxu1  ;;  %v5588_v25 = vpop.f32.mrb[106].mxu0 }
 0x572   : > { %v5651_v32 = vadd.f32 %v5650_v1, %v5649_v43  ;;  %v5652_v26 = vpop.f32.mrb[106].mxu1  ;;  %v5589_v22 = vpop.f32.mrb[107].mxu0 }
 0x573   : > { %5550 = vst [vmem:[%s7746_s10 + $0x8] sm:$0xff] %v5518_v14   ;;  %v4683_v27 = vadd.f32 %v5587_v24, %v7740_v0  ;;  %v5590_v29 = vadd.f32 %v5589_v22, %v5588_v25  ;;  %v5653_v30 = vpop.f32.mrb[107].mxu1 }
 0x574   : > { %v5654_v41 = vadd.f32 %v5653_v30, %v5652_v26 }
 0x575   : > { %v4780_v59 = vadd.f32 %v5651_v32, %v4683_v27  ;;  %v4686_v21 = vadd.f32 %v5590_v29, %v7740_v0 }
 0x577   : > { %v4783_v57 = vadd.f32 %v5654_v41, %v4686_v21  ;;  %v5591_v34 = vpop.f32.mrb[108].mxu0 }
 0x578   : > { %v5655_v44 = vpop.f32.mrb[108].mxu1  ;;  %v5592_v36 = vpop.f32.mrb[109].mxu0 }
 0x579   : > { %v5523_v12 = vpack.c.bf16 %v4783_v57, %v4780_v59  ;;  %v5593_v60 = vadd.f32 %v5592_v36, %v5591_v34  ;;  %v5656_v58 = vpop.f32.mrb[109].mxu1  ;;  %v5594_v37 = vpop.f32.mrb[110].mxu0 }
 0x57a   : > { %v5657_v38 = vadd.f32 %v5656_v58, %v5655_v44  ;;  %v5658_v61 = vpop.f32.mrb[110].mxu1  ;;  %v5595_v56 = vpop.f32.mrb[111].mxu0 }
 0x57b   : > { %5551 = vst [vmem:[%s7746_s10 + $0x10] sm:$0xff] %v5523_v12   ;;  %v4691_v5 = vadd.f32 %v5593_v60, %v7740_v0  ;;  %v5596_v47 = vadd.f32 %v5595_v56, %v5594_v37  ;;  %v5659_v40 = vpop.f32.mrb[111].mxu1 }
 0x57c   : > { %v5660_v42 = vadd.f32 %v5659_v40, %v5658_v61 }
 0x57d   : > { %v4788_v15 = vadd.f32 %v5657_v38, %v4691_v5  ;;  %v4694_v45 = vadd.f32 %v5596_v47, %v7740_v0 }
 0x57f   : > { %v4791_v19 = vadd.f32 %v5660_v42, %v4694_v45  ;;  %v5597_v31 = vpop.f32.mrb[112].mxu0 }
 0x580   : > { %v5661_v62 = vpop.f32.mrb[112].mxu1  ;;  %v5598_v48 = vpop.f32.mrb[113].mxu0 }
 0x581   : > { %v5528_v49 = vpack.c.bf16 %v4791_v19, %v4788_v15  ;;  %v5599_v52 = vadd.f32 %v5598_v48, %v5597_v31  ;;  %v5662_v28 = vpop.f32.mrb[113].mxu1  ;;  %v5600_v18 = vpop.f32.mrb[114].mxu0 }
 0x582   : > { %v5663_v51 = vadd.f32 %v5662_v28, %v5661_v62  ;;  %v5664_v35 = vpop.f32.mrb[114].mxu1  ;;  %v5601_v9 = vpop.f32.mrb[115].mxu0 }
 0x583   : > { %5552 = vst [vmem:[%s7746_s10 + $0x18] sm:$0xff] %v5528_v49   ;;  %v4699_v63 = vadd.f32 %v5599_v52, %v7740_v0  ;;  %v5602_v2 = vadd.f32 %v5601_v9, %v5600_v18  ;;  %v5665_v3 = vpop.f32.mrb[115].mxu1 }
 0x584   : > { %v5666_v10 = vadd.f32 %v5665_v3, %v5664_v35 }
 0x585   : > { %v4796_v46 = vadd.f32 %v5663_v51, %v4699_v63  ;;  %v4702_v4 = vadd.f32 %v5602_v2, %v7740_v0 }
 0x587   : > { %v4799_v6 = vadd.f32 %v5666_v10, %v4702_v4  ;;  %v5603_v7 = vpop.f32.mrb[116].mxu0 }
 0x588   : > { %v5667_v33 = vpop.f32.mrb[116].mxu1  ;;  %v5604_v17 = vpop.f32.mrb[117].mxu0 }
 0x589   : > { %v5533_v11 = vpack.c.bf16 %v4799_v6, %v4796_v46  ;;  %v5605_v8 = vadd.f32 %v5604_v17, %v5603_v7  ;;  %v5668_v53 = vpop.f32.mrb[117].mxu1  ;;  %v5606_v16 = vpop.f32.mrb[118].mxu0 }
 0x58a   : > { %v5669_v39 = vadd.f32 %v5668_v53, %v5667_v33  ;;  %v5670_v50 = vpop.f32.mrb[118].mxu1  ;;  %v5607_v54 = vpop.f32.mrb[119].mxu0 }
 0x58b   : > { %5553 = vst [vmem:[%s7746_s10 + $0x20] sm:$0xff] %v5533_v11   ;;  %v4707_v20 = vadd.f32 %v5605_v8, %v7740_v0  ;;  %v5608_v13 = vadd.f32 %v5607_v54, %v5606_v16  ;;  %v5671_v55 = vpop.f32.mrb[119].mxu1 }
 0x58c   : > { %v5672_v43 = vadd.f32 %v5671_v55, %v5670_v50 }
 0x58d   : > { %v4804_v23 = vadd.f32 %v5669_v39, %v4707_v20  ;;  %v4710_v14 = vadd.f32 %v5608_v13, %v7740_v0 }
 0x58f   : > { %v4807_v24 = vadd.f32 %v5672_v43, %v4710_v14  ;;  %v5609_v1 = vpop.f32.mrb[120].mxu0 }
 0x590   : > { %v5673_v25 = vpop.f32.mrb[120].mxu1  ;;  %v5610_v32 = vpop.f32.mrb[121].mxu0 }
 0x591   : > { %v5538_v26 = vpack.c.bf16 %v4807_v24, %v4804_v23  ;;  %v5611_v22 = vadd.f32 %v5610_v32, %v5609_v1  ;;  %v5674_v27 = vpop.f32.mrb[121].mxu1  ;;  %v5612_v29 = vpop.f32.mrb[122].mxu0 }
 0x592   : > { %v5675_v30 = vadd.f32 %v5674_v27, %v5673_v25  ;;  %v5676_v41 = vpop.f32.mrb[122].mxu1  ;;  %v5613_v59 = vpop.f32.mrb[123].mxu0 }
 0x593   : > { %5554 = vst [vmem:[%s7746_s10 + $0x28] sm:$0xff] %v5538_v26   ;;  %v4715_v21 = vadd.f32 %v5611_v22, %v7740_v0  ;;  %v5614_v57 = vadd.f32 %v5613_v59, %v5612_v29  ;;  %v5677_v34 = vpop.f32.mrb[123].mxu1 }
 0x594   : > { %v5678_v44 = vadd.f32 %v5677_v34, %v5676_v41 }
 0x595   : > { %v4812_v36 = vadd.f32 %v5675_v30, %v4715_v21  ;;  %v4718_v12 = vadd.f32 %v5614_v57, %v7740_v0 }
 0x597   : > { %v4815_v60 = vadd.f32 %v5678_v44, %v4718_v12  ;;  %v5615_v58 = vpop.f32.mrb[124].mxu0 }
 0x598   : > { %v5679_v37 = vpop.f32.mrb[124].mxu1  ;;  %v5616_v38 = vpop.f32.mrb[125].mxu0 }
 0x599   : > { %v5543_v61 = vpack.c.bf16 %v4815_v60, %v4812_v36  ;;  %v5617_v56 = vadd.f32 %v5616_v38, %v5615_v58  ;;  %v5680_v5 = vpop.f32.mrb[125].mxu1  ;;  %v5618_v47 = vpop.f32.mrb[126].mxu0 }
 0x59a   : > { %v5681_v40 = vadd.f32 %v5680_v5, %v5679_v37  ;;  %v5682_v42 = vpop.f32.mrb[126].mxu1  ;;  %v5619_v15 = vpop.f32.mrb[127].mxu0 }
 0x59b   : > { %5555 = vst [vmem:[%s7746_s10 + $0x30] sm:$0xff] %v5543_v61   ;;  %v4723_v45 = vadd.f32 %v5617_v56, %v7740_v0  ;;  %v5620_v19 = vadd.f32 %v5619_v15, %v5618_v47  ;;  %v5683_v31 = vpop.f32.mrb[127].mxu1 }
 0x59c   : > { %v5684_v62 = vadd.f32 %v5683_v31, %v5682_v42 }
 0x59d   : > { %v4820_v48 = vadd.f32 %v5681_v40, %v4723_v45  ;;  %v4726_v49 = vadd.f32 %v5620_v19, %v7740_v0 }
 0x59f   : > { %v4823_v52 = vadd.f32 %v5684_v62, %v4726_v49 }
 0x5a1   : > { %v5548_v28 = vpack.c.bf16 %v4823_v52, %v4820_v48 }
 0x5a3   : > { %5556 = vst [vmem:[%s7746_s10 + $0x38] sm:$0xff] %v5548_v28  }
 0x5a4   : > { %6777 = shalt.err (!%p6774_p9)
}
 0x5a5   : > { %s6778_s24 = scalar_lea.hbm %s7774_s14, 1024  ;;  %s6782_s10 = scalar_lea.hbm %s7862_s11, 2048 }
 0x5a6   : > { %p6779_p0 = scmp.ne.s32.totalorder %s7774_s14, %s6778_s24  ;;  %p6783_p8 = scmp.lt.u32.totalorder %s7774_s14, %s7862_s11 }
 0x5a7   : > { %p6784_p6 = scmp.lt.u32.totalorder %s6782_s10, %s6778_s24  ;;  %p6786_p5 = scmp.lt.u32.totalorder %s6778_s24, %s7774_s14 }
 0x5a8   : > { %p6780_p11 = pnand %p6779_p0, %p7088_p3 }
 0x5a9   : > { %p6785_p10 = por %p6784_p6, %p6783_p8 }
 0x5aa   : > { %p6781_p4 = pneg %p6780_p11 }
 0x5ab   : > { %p6787_p7 = por %p6786_p5, %p6785_p10 }
 0x5ad   : > { %p6788_p12 = pnand %p6787_p7, %p6781_p4 }
 0x5af   : > { %6791 = shalt.err (!%p6788_p12)
}
 0x5b0   : > { %s6852_s30 = smov 64   ;;  %s6853_s25 = smov 4  }
 0x5b1   : > { %6023 = dma.vmem_to_hbm [thread:$0]  (%p7088_p3), %s7776_s26, 1024, %s7774_s14, %s4907_s13, %s6852_s30, %s6852_s30, %s6853_s25  }
 0x5b2 PF: > { %s7863_s21 = sld [smem:[#allocation16_spill]]  ;;  %s7864_s23 = sld [smem:[#allocation17_spill]] }
 0x5b3   : > { %p7866_p2 = scmp.ge.s32.totalorder %s6838_s20, 2 }
 0x5b8   : > { %s4935_s15 = sand.u32 1, %s7863_s21   ;;  %p7865_p1 = scmp.ne.s32.totalorder %s7864_s23, 0 }
 0x5b9   : > { %s4936_s24 = scalar_lea.sflag [#allocation4], %s4935_s15 }
 0x5ba   : > { %p6043_p13 = pnand %p7866_p2, %p7865_p1 }
 0x5bc   : > { %6821 = dma.done.wait (!%p6043_p13), %s4936_s24, 1024  }
 0x5bd   : > { %6823 = vsyncadd (!%p6043_p13), %s4936_s24, 4294966272  ;;  %p26_p9 = scmp.ge.s32.totalorder %s7075_s8, 4   ;;  %s7867_s17 = smov %s6830_s18 }
 0x5be   : > { %s7868_s18 = smov %s6834_s19  ;;  %s7869_s19 = smov %s7084_s22 }
 0x5bf   : > { %s7870_s20 = smov %s7075_s8  ;;  %28 = sbr.rel (!%p26_p9) target bundleno = 11 (0xb), region = 128 }
 0x5c6   :  { %4941 = vsyncpa [#allocation3], 1 }
 0x5c7   :  { %4943 = vsyncpa [#allocation3 + $0x1], 1 }
 0x5c8   :  { %4944 = vsyncpa [#allocation6], 1 }
 0x5c9   :  { %4945 = vsyncpa [#allocation9], 1 }
 0x5ca   :  { %4946 = vsyncpa [#allocation4], 1 }
 0x5cb   :  { %4948 = vsyncpa [#allocation4 + $0x1], 1 }

</bundles_post_ra>
